<compile_context>
chip_gen: v7x
topology: tpu7x:2x2x1
jax: 0.10.0
libtpu: 0.0.40
codegen_flags: <defaults>
</compile_context>

<pallas_src>
import functools

import jax
import jax.numpy as jnp
from jax import lax
from jax.experimental import pallas as pl
from jax.experimental.pallas import tpu as pltpu


# ----------------------------------------------------------------------------
# Kernel
# ----------------------------------------------------------------------------
def _lstm_kernel(gx_ref, h0_ref, c0_ref, whh_ref,
                 out_ref, hN_ref, cN_ref,
                 h_scr, c_scr, *, time_chunk, seq_len):
    """One grid step = `time_chunk` LSTM timesteps for one batch block."""
    t_blk = pl.program_id(1)
    last_t = pl.num_programs(1) - 1
    H = h_scr.shape[-1]                      # lane-padded hidden size
    mm_dtype = whh_ref.dtype
    needs_mask = (seq_len % time_chunk) != 0  # static Python bool

    # Load the initial hidden / cell state at the first time chunk.
    @pl.when(t_blk == 0)
    def _():
        h_scr[...] = h0_ref[0].astype(jnp.float32)
        c_scr[...] = c0_ref[0].astype(jnp.float32)

    def run_chunk(masked):
        # Weight-stationary across the unrolled chunk: read W_hh^T once per
        # chunk instead of once per unrolled timestep.
        # TODO(synk): for Bb << MXU rows, pltpu.matmul_push_rhs/acc_lhs/pop
        # could hold W_hh inside the MXU across the whole chunk.
        w = whh_ref[...]

        def step(s, carry):
            h, c = carry
            # gates = (x_t @ W_ih^T + b_ih + b_hh)   [hoisted, gx_ref]
            #         + h @ W_hh^T                   [recurrent, MXU, f32 acc]
            gates = gx_ref[s].astype(jnp.float32) + jnp.dot(
                h.astype(mm_dtype), w, preferred_element_type=jnp.float32)
            # PyTorch gate order i, f, g, o; gate math stays f32 (VPU/EUP).
            i_g = jax.nn.sigmoid(gates[:, 0 * H:1 * H])
            f_g = jax.nn.sigmoid(gates[:, 1 * H:2 * H])
            g_g = jnp.tanh(gates[:, 2 * H:3 * H])
            o_g = jax.nn.sigmoid(gates[:, 3 * H:4 * H])
            c_new = f_g * c + i_g * g_g
            h_new = o_g * jnp.tanh(c_new)
            if masked:
                # Freeze the carry on zero-padded tail timesteps (t >= seq_len).
                valid = (t_blk * time_chunk + s) < seq_len
                h_new = jnp.where(valid, h_new, h)
                c_new = jnp.where(valid, c_new, c)
            out_ref[s] = h_new.astype(out_ref.dtype)
            return h_new, c_new

        h_fin, c_fin = lax.fori_loop(
            0, time_chunk, step, (h_scr[...], c_scr[...]), unroll=True)
        h_scr[...] = h_fin
        c_scr[...] = c_fin

    if needs_mask:
        # Only the LAST time chunk pays the two carry-freeze selects per step.
        @pl.when(t_blk != last_t)
        def _():
            run_chunk(False)

        @pl.when(t_blk == last_t)
        def _():
            run_chunk(True)
    else:
        run_chunk(False)

    # Emit final hidden / cell state on the last time chunk.
    @pl.when(t_blk == last_t)
    def _():
        hN_ref[0] = h_scr[...].astype(hN_ref.dtype)
        cN_ref[0] = c_scr[...].astype(cN_ref.dtype)


# ----------------------------------------------------------------------------
# Sizing helpers (generation-aware, best-effort)
# ----------------------------------------------------------------------------
def _tensorcores_per_device():
    try:
        kind = jax.devices()[0].device_kind.lower()
    except Exception:
        return 1
    # v7x (and v4 megacore) expose 2 TensorCores behind one device; v5e/v6e 1.
    return 2 if ("v7" in kind or "v4" in kind) else 1


def _physical_vmem_bytes():
    try:
        return int(pltpu.get_tpu_info().vmem_capacity_bytes)
    except Exception:
        return 64 << 20   # assume the smallest generation (v7x) if unknown


def _pick_batch_block(B_pad, n_cores):
    # v7x: give the "parallel" batch axis >= 2 blocks so megacore sharding has
    # something to shard, but only when each half still fills MXU rows.
    # v5e/v6e (single TC): keep one big block so the skinny (Bb, H) recurrent
    # matmul uses as many MXU rows as possible.
    if n_cores >= 2 and B_pad >= 256 and (B_pad // 2) % 8 == 0:
        return B_pad // 2
    return B_pad


def _vmem_budget_bytes(Tc, Bb, Hp, gates_dtype, out_dtype, whh_dtype,
                       single_buffer_invariants):
    gsz = jnp.dtype(gates_dtype).itemsize
    osz = jnp.dtype(out_dtype).itemsize
    wsz = jnp.dtype(whh_dtype).itemsize
    inv = 1 if single_buffer_invariants else 2
    total = 0
    total += 2 * Tc * Bb * 4 * Hp * gsz     # gates_x tiles (double-buffered)
    total += 2 * Tc * Bb * Hp * osz         # output tiles  (double-buffered)
    total += 2 * 2 * Bb * Hp * osz          # final h / c output tiles
    total += inv * 2 * Bb * Hp * 4          # h0 / c0 (f32)
    total += inv * Hp * 4 * Hp * wsz        # W_hh^T (block-invariant)
    total += 2 * Bb * Hp * 4                # h / c carry scratch (f32)
    return total


# ----------------------------------------------------------------------------
# Wrapper: EncoderLSTM.forward(inputs, (hidden, state))
# ----------------------------------------------------------------------------
def encoder_lstm_forward(inputs, hidden, state, w_ih, w_hh, b_ih, b_hh,
                         *, time_chunk=16, batch_block=None,
                         matmul_dtype=jnp.bfloat16, gates_dtype=jnp.bfloat16):
    """Equivalent of EncoderLSTM.forward: returns (output, hidden, state)."""
    T, B, I = inputs.shape
    H = hidden.shape[-1]
    out_dtype = inputs.dtype
    if matmul_dtype is None:
        matmul_dtype = jnp.float32
    if gates_dtype is None:
        gates_dtype = jnp.float32

    # Pad the hidden dim to a lane multiple (128): gate slices become
    # vreg-aligned and the output block's last dim is lane-dense.
    Hp = pl.cdiv(H, 128) * 128

    # ---- Hoisted, time-independent input projection: ONE big matmul. ----
    bias = (b_ih + b_hh).astype(jnp.float32)
    gates_x = (inputs.reshape(T * B, I).astype(jnp.float32)
               @ jnp.transpose(w_ih).astype(jnp.float32) + bias)
    # Pad each gate block i|f|g|o from H to Hp, then stream compactly.
    gates_x = gates_x.reshape(T, B, 4, H)
    gates_x = jnp.pad(gates_x, ((0, 0), (0, 0), (0, 0), (0, Hp - H)))
    gates_x = gates_x.reshape(T, B, 4 * Hp).astype(gates_dtype)

    # Recurrent weight, transposed + per-gate padded: (Hp, 4*Hp).
    whh_t = jnp.transpose(w_hh).reshape(H, 4, H)
    whh_t = jnp.pad(whh_t, ((0, Hp - H), (0, 0), (0, Hp - H)))
    whh_t = whh_t.reshape(Hp, 4 * Hp).astype(matmul_dtype)

    # Initial states, hidden-dim padded (padded columns stay inert: zero
    # weights/bias -> zero h, and zero W_hh rows -> no leakage into valid H).
    h0 = jnp.pad(hidden.astype(jnp.float32), ((0, 0), (0, 0), (0, Hp - H)))
    c0 = jnp.pad(state.astype(jnp.float32), ((0, 0), (0, 0), (0, Hp - H)))

    # ---- Batch / time tiling. ----
    B_pad = pl.cdiv(B, 8) * 8
    n_cores = _tensorcores_per_device()
    Bb = batch_block if batch_block is not None else _pick_batch_block(B_pad, n_cores)
    assert B_pad % Bb == 0 and Bb % 8 == 0

    phys_vmem = _physical_vmem_bytes()
    Tc = max(1, min(time_chunk, T))
    # Shrink the time chunk until the tile set fits the physical VMEM with
    # headroom (matters on v7x: 64 MiB vs 128 MiB on v5e/v6e).
    while Tc > 1 and 1.5 * _vmem_budget_bytes(
            Tc, Bb, Hp, gates_dtype, out_dtype, matmul_dtype, True) > 0.9 * phys_vmem:
        Tc = max(1, Tc // 2)
    T_pad = pl.cdiv(T, Tc) * Tc

    gates_x = jnp.pad(gates_x, ((0, T_pad - T), (0, B_pad - B), (0, 0)))
    h0 = jnp.pad(h0, ((0, 0), (0, B_pad - B), (0, 0)))
    c0 = jnp.pad(c0, ((0, 0), (0, B_pad - B), (0, 0)))

    grid = (B_pad // Bb, T_pad // Tc)
    kernel = functools.partial(_lstm_kernel, time_chunk=Tc, seq_len=T)

    def build_call(single_buffer_invariants):
        budget = _vmem_budget_bytes(Tc, Bb, Hp, gates_dtype, out_dtype,
                                    matmul_dtype, single_buffer_invariants)
        vmem_limit = int(min(0.9 * phys_vmem, max(32 << 20, 1.5 * budget)))

        def spec(block_shape, index_map, invariant):
            if single_buffer_invariants and invariant:
                # Block-invariant operands: single-buffer to halve their VMEM.
                return pl.BlockSpec(block_shape, index_map,
                                    pipeline_mode=pl.Buffered(1))
            return pl.BlockSpec(block_shape, index_map)

        return pl.pallas_call(
            kernel,
            out_shape=(
                jax.ShapeDtypeStruct((T_pad, B_pad, Hp), out_dtype),
                jax.ShapeDtypeStruct((1, B_pad, Hp), out_dtype),
                jax.ShapeDtypeStruct((1, B_pad, Hp), out_dtype),
            ),
            grid_spec=pltpu.PrefetchScalarGridSpec(
                num_scalar_prefetch=0,
                grid=grid,
                in_specs=[
                    spec((Tc, Bb, 4 * Hp), lambda b, t: (t, b, 0), False),  # x-gates
                    spec((1, Bb, Hp), lambda b, t: (0, b, 0), True),        # h0
                    spec((1, Bb, Hp), lambda b, t: (0, b, 0), True),        # c0
                    spec((Hp, 4 * Hp), lambda b, t: (0, 0), True),          # W_hh^T
                ],
                out_specs=[
                    pl.BlockSpec((Tc, Bb, Hp), lambda b, t: (t, b, 0)),     # output
                    pl.BlockSpec((1, Bb, Hp), lambda b, t: (0, b, 0)),      # final h
                    pl.BlockSpec((1, Bb, Hp), lambda b, t: (0, b, 0)),      # final c
                ],
                scratch_shapes=[
                    pltpu.VMEM((Bb, Hp), jnp.float32),   # h carry
                    pltpu.VMEM((Bb, Hp), jnp.float32),   # c carry
                ],
            ),
            compiler_params=pltpu.CompilerParams(
                # Batch blocks are independent (megacore-parallel on v7x);
                # the time axis is the sequential recurrence.
                dimension_semantics=("parallel", "arbitrary"),
                vmem_limit_bytes=vmem_limit),
        )

    try:
        out, hN, cN = jax.block_until_ready(
            build_call(True)(gates_x, h0, c0, whh_t))
    except Exception:
        # Fallback: Pallas version without BlockSpec(pipeline_mode=...).
        out, hN, cN = build_call(False)(gates_x, h0, c0, whh_t)

    return out[:T, :B, :H], hN[:, :B, :H], cN[:, :B, :H]


# ----------------------------------------------------------------------------
# Plain-JAX reference of PyTorch's single-layer nn.LSTM forward
# ----------------------------------------------------------------------------
def _reference_lstm(inputs, hidden, state, w_ih, w_hh, b_ih, b_hh):
    def step(carry, x_t):
        h, c = carry
        gates = x_t @ w_ih.T + h @ w_hh.T + b_ih + b_hh
        i, f, g, o = jnp.split(gates, 4, axis=-1)
        i = jax.nn.sigmoid(i)
        f = jax.nn.sigmoid(f)
        g = jnp.tanh(g)
        o = jax.nn.sigmoid(o)
        c = f * c + i * g
        h = o * jnp.tanh(c)
        return (h, c), h
    (hN, cN), out = lax.scan(step, (hidden[0], state[0]), inputs)
    return out, hN[None], cN[None]


if __name__ == "__main__":
    SEQ, BATCH, INPUT, HIDDEN = 8, 4, 16, 32

    key = jax.random.PRNGKey(0)
    k = jax.random.split(key, 7)

    # PyTorch LSTM param shapes, gate order i, f, g, o.
    scale = 1.0 / jnp.sqrt(HIDDEN)
    w_ih = jax.random.uniform(k[0], (4 * HIDDEN, INPUT), jnp.float32, -scale, scale)
    w_hh = jax.random.uniform(k[1], (4 * HIDDEN, HIDDEN), jnp.float32, -scale, scale)
    b_ih = jax.random.uniform(k[2], (4 * HIDDEN,), jnp.float32, -scale, scale)
    b_hh = jax.random.uniform(k[3], (4 * HIDDEN,), jnp.float32, -scale, scale)

    inputs = jax.random.normal(k[4], (SEQ, BATCH, INPUT), jnp.float32)
    hidden = jax.random.normal(k[5], (1, BATCH, HIDDEN), jnp.float32)
    state = jax.random.normal(k[6], (1, BATCH, HIDDEN), jnp.float32)

    out_ref, hN_ref, cN_ref = _reference_lstm(inputs, hidden, state,
                                              w_ih, w_hh, b_ih, b_hh)

    # 1) Production configuration: bf16 gate stream + bf16 recurrent weight
    #    (f32 accumulation). Looser tolerance vs. the f32 reference.
    out, hN, cN = encoder_lstm_forward(inputs, hidden, state,
                                       w_ih, w_hh, b_ih, b_hh,
                                       time_chunk=16)
    out = jax.block_until_ready(out)
    hN = jax.block_until_ready(hN)
    cN = jax.block_until_ready(cN)
    assert out.shape == (SEQ, BATCH, HIDDEN)
    assert hN.shape == (1, BATCH, HIDDEN) and cN.shape == (1, BATCH, HIDDEN)
    assert jnp.allclose(out, out_ref, atol=5e-2, rtol=5e-2)
    assert jnp.allclose(hN, hN_ref, atol=5e-2, rtol=5e-2)
    assert jnp.allclose(cN, cN_ref, atol=5e-2, rtol=5e-2)

    # 2) Exact f32 configuration with a non-dividing time chunk (exercises the
    #    last-chunk carry-freeze path). Tight tolerance.
    out32, hN32, cN32 = encoder_lstm_forward(
        inputs, hidden, state, w_ih, w_hh, b_ih, b_hh,
        time_chunk=5, matmul_dtype=jnp.float32, gates_dtype=jnp.float32)
    out32 = jax.block_until_ready(out32)
    hN32 = jax.block_until_ready(hN32)
    cN32 = jax.block_until_ready(cN32)
    assert jnp.allclose(out32, out_ref, atol=1e-4, rtol=1e-4)
    assert jnp.allclose(hN32, hN_ref, atol=1e-4, rtol=1e-4)
    assert jnp.allclose(cN32, cN_ref, atol=1e-4, rtol=1e-4)

    print("KERNEL_OK")
</pallas_src>

<mosaic_0001>
module attributes {stable_mosaic.version = 11 : i64} {
  func.func @_lstm_kernel(%arg0: i32, %arg1: i32, %arg2: memref<8x8x512xbf16, #tpu.memory_space<vmem>>, %arg3: memref<1x8x128xf32, #tpu.memory_space<vmem>>, %arg4: memref<1x8x128xf32, #tpu.memory_space<vmem>>, %arg5: memref<128x512xbf16, #tpu.memory_space<vmem>>, %arg6: memref<8x8x128xf32, #tpu.memory_space<vmem>>, %arg7: memref<1x8x128xf32, #tpu.memory_space<vmem>>, %arg8: memref<1x8x128xf32, #tpu.memory_space<vmem>>, %arg9: memref<8x128xf32, #tpu.memory_space<vmem>>, %arg10: memref<8x128xf32, #tpu.memory_space<vmem>>) attributes {dimension_semantics = [#tpu.dimension_semantics<parallel>, #tpu.dimension_semantics<arbitrary>], iteration_bounds = array<i64: 1, 1>, scalar_prefetch = 0 : i64, scratch_operands = 2 : i64, tpu.core_type = #tpu.core_type<tc>, window_params = [{transform_indices = @transform_0, window_bounds = array<i64: 8, 8, 512>}, {pipeline_mode = #tpu.pipeline_mode<synchronous>, transform_indices = @transform_1, window_bounds = array<i64: 1, 8, 128>}, {pipeline_mode = #tpu.pipeline_mode<synchronous>, transform_indices = @transform_2, window_bounds = array<i64: 1, 8, 128>}, {pipeline_mode = #tpu.pipeline_mode<synchronous>, transform_indices = @transform_3, window_bounds = array<i64: 128, 512>}, {transform_indices = @transform_4, window_bounds = array<i64: 8, 8, 128>}, {transform_indices = @transform_5, window_bounds = array<i64: 1, 8, 128>}, {transform_indices = @transform_6, window_bounds = array<i64: 1, 8, 128>}]} {
    %c0_i32 = arith.constant 0 : i32
    %0 = arith.cmpi eq, %arg1, %c0_i32 : i32
    %1 = arith.extui %0 : i1 to i32
    %c0_i32_0 = arith.constant 0 : i32
    %2 = arith.cmpi ne, %1, %c0_i32_0 : i32
    scf.if %2 {
      %c0_76 = arith.constant 0 : index
      %c0_77 = arith.constant 0 : index
      %c0_78 = arith.constant 0 : index
      %299 = vector.load %arg3[%c0_76, %c0_77, %c0_78] : memref<1x8x128xf32, #tpu.memory_space<vmem>>, vector<1x8x128xf32>
      %300 = vector.shape_cast %299 : vector<1x8x128xf32> to vector<8x128xf32>
      %c0_79 = arith.constant 0 : index
      %c0_80 = arith.constant 0 : index
      %301 = vector.load %arg9[%c0_79, %c0_80] : memref<8x128xf32, #tpu.memory_space<vmem>>, vector<8x128xf32>
      tpu.vector_store %arg9[%c0_79, %c0_80], %300 {strides = array<i32>} : memref<8x128xf32, #tpu.memory_space<vmem>>, vector<8x128xf32>,
      %c0_81 = arith.constant 0 : index
      %c0_82 = arith.constant 0 : index
      %c0_83 = arith.constant 0 : index
      %302 = vector.load %arg4[%c0_81, %c0_82, %c0_83] : memref<1x8x128xf32, #tpu.memory_space<vmem>>, vector<1x8x128xf32>
      %303 = vector.shape_cast %302 : vector<1x8x128xf32> to vector<8x128xf32>
      %c0_84 = arith.constant 0 : index
      %c0_85 = arith.constant 0 : index
      %304 = vector.load %arg10[%c0_84, %c0_85] : memref<8x128xf32, #tpu.memory_space<vmem>>, vector<8x128xf32>
      tpu.vector_store %arg10[%c0_84, %c0_85], %303 {strides = array<i32>} : memref<8x128xf32, #tpu.memory_space<vmem>>, vector<8x128xf32>,
    } else {
    }
    %c0 = arith.constant 0 : index
    %c0_1 = arith.constant 0 : index
    %3 = vector.load %arg5[%c0, %c0_1] : memref<128x512xbf16, #tpu.memory_space<vmem>>, vector<128x512xbf16>
    %c0_2 = arith.constant 0 : index
    %c0_3 = arith.constant 0 : index
    %4 = vector.load %arg9[%c0_2, %c0_3] : memref<8x128xf32, #tpu.memory_space<vmem>>, vector<8x128xf32>
    %c0_4 = arith.constant 0 : index
    %c0_5 = arith.constant 0 : index
    %5 = vector.load %arg10[%c0_4, %c0_5] : memref<8x128xf32, #tpu.memory_space<vmem>>, vector<8x128xf32>
    %c0_i32_6 = arith.constant 0 : i32
    %6 = arith.index_cast %c0_i32_6 : i32 to index
    %c0_7 = arith.constant 0 : index
    %c0_8 = arith.constant 0 : index
    %7 = vector.load %arg2[%6, %c0_7, %c0_8] : memref<8x8x512xbf16, #tpu.memory_space<vmem>>, vector<1x8x512xbf16>
    %8 = vector.shape_cast %7 : vector<1x8x512xbf16> to vector<8x512xbf16>
    %9 = arith.extf %8 : vector<8x512xbf16> to vector<8x512xf32>
    %10 = arith.truncf %4 : vector<8x128xf32> to vector<8x128xbf16>
    %cst = arith.constant dense<0.000000e+00> : vector<8x512xf32>
    %11 = tpu.matmul %10, %3, %cst {dimension_numbers = #tpu.dot_dimension_numbers<[1], [0], [0], [1], [0, 0, 1, 1], [], []>} : vector<8x128xbf16>, vector<128x512xbf16>, vector<8x512xf32> -> vector<8x512xf32>
    %12 = arith.addf %9, %11 : vector<8x512xf32>
    %13 = vector.extract_strided_slice %12 {offsets = [0, 0], sizes = [8, 128], strides = [1, 1]} : vector<8x512xf32> to vector<8x128xf32>
    %14 = arith.negf %13 : vector<8x128xf32>
    %15 = math.exp %14 : vector<8x128xf32>
    %cst_9 = arith.constant 1.000000e+00 : f32
    %16 = vector.broadcast %cst_9 : f32 to vector<8x128xf32>
    %17 = arith.addf %16, %15 : vector<8x128xf32>
    %18 = arith.divf %16, %17 : vector<8x128xf32>
    %19 = vector.extract_strided_slice %12 {offsets = [0, 128], sizes = [8, 128], strides = [1, 1]} : vector<8x512xf32> to vector<8x128xf32>
    %20 = arith.negf %19 : vector<8x128xf32>
    %21 = math.exp %20 : vector<8x128xf32>
    %cst_10 = arith.constant 1.000000e+00 : f32
    %22 = vector.broadcast %cst_10 : f32 to vector<8x128xf32>
    %23 = arith.addf %22, %21 : vector<8x128xf32>
    %24 = arith.divf %22, %23 : vector<8x128xf32>
    %25 = vector.extract_strided_slice %12 {offsets = [0, 256], sizes = [8, 128], strides = [1, 1]} : vector<8x512xf32> to vector<8x128xf32>
    %26 = math.tanh %25 : vector<8x128xf32>
    %27 = vector.extract_strided_slice %12 {offsets = [0, 384], sizes = [8, 128], strides = [1, 1]} : vector<8x512xf32> to vector<8x128xf32>
    %28 = arith.negf %27 : vector<8x128xf32>
    %29 = math.exp %28 : vector<8x128xf32>
    %cst_11 = arith.constant 1.000000e+00 : f32
    %30 = vector.broadcast %cst_11 : f32 to vector<8x128xf32>
    %31 = arith.addf %30, %29 : vector<8x128xf32>
    %32 = arith.divf %30, %31 : vector<8x128xf32>
    %33 = arith.mulf %24, %5 : vector<8x128xf32>
    %34 = arith.mulf %18, %26 : vector<8x128xf32>
    %35 = arith.addf %33, %34 : vector<8x128xf32>
    %36 = math.tanh %35 : vector<8x128xf32>
    %37 = arith.mulf %32, %36 : vector<8x128xf32>
    %38 = arith.index_cast %c0_i32_6 : i32 to index
    %c0_12 = arith.constant 0 : index
    %c0_13 = arith.constant 0 : index
    %39 = vector.load %arg6[%38, %c0_12, %c0_13] : memref<8x8x128xf32, #tpu.memory_space<vmem>>, vector<1x8x128xf32>
    %40 = vector.shape_cast %39 : vector<1x8x128xf32> to vector<8x128xf32>
    %41 = vector.shape_cast %37 : vector<8x128xf32> to vector<1x8x128xf32>
    tpu.vector_store %arg6[%38, %c0_12, %c0_13], %41 {strides = array<i32>} : memref<8x8x128xf32, #tpu.memory_space<vmem>>, vector<1x8x128xf32>,
    %c1_i32 = arith.constant 1 : i32
    %42 = arith.index_cast %c1_i32 : i32 to index
    %c0_14 = arith.constant 0 : index
    %c0_15 = arith.constant 0 : index
    %43 = vector.load %arg2[%42, %c0_14, %c0_15] : memref<8x8x512xbf16, #tpu.memory_space<vmem>>, vector<1x8x512xbf16>
    %44 = vector.shape_cast %43 : vector<1x8x512xbf16> to vector<8x512xbf16>
    %45 = arith.extf %44 : vector<8x512xbf16> to vector<8x512xf32>
    %46 = arith.truncf %37 : vector<8x128xf32> to vector<8x128xbf16>
    %cst_16 = arith.constant dense<0.000000e+00> : vector<8x512xf32>
    %47 = tpu.matmul %46, %3, %cst_16 {dimension_numbers = #tpu.dot_dimension_numbers<[1], [0], [0], [1], [0, 0, 1, 1], [], []>} : vector<8x128xbf16>, vector<128x512xbf16>, vector<8x512xf32> -> vector<8x512xf32>
    %48 = arith.addf %45, %47 : vector<8x512xf32>
    %49 = vector.extract_strided_slice %48 {offsets = [0, 0], sizes = [8, 128], strides = [1, 1]} : vector<8x512xf32> to vector<8x128xf32>
    %50 = arith.negf %49 : vector<8x128xf32>
    %51 = math.exp %50 : vector<8x128xf32>
    %cst_17 = arith.constant 1.000000e+00 : f32
    %52 = vector.broadcast %cst_17 : f32 to vector<8x128xf32>
    %53 = arith.addf %52, %51 : vector<8x128xf32>
    %54 = arith.divf %52, %53 : vector<8x128xf32>
    %55 = vector.extract_strided_slice %48 {offsets = [0, 128], sizes = [8, 128], strides = [1, 1]} : vector<8x512xf32> to vector<8x128xf32>
    %56 = arith.negf %55 : vector<8x128xf32>
    %57 = math.exp %56 : vector<8x128xf32>
    %cst_18 = arith.constant 1.000000e+00 : f32
    %58 = vector.broadcast %cst_18 : f32 to vector<8x128xf32>
    %59 = arith.addf %58, %57 : vector<8x128xf32>
    %60 = arith.divf %58, %59 : vector<8x128xf32>
    %61 = vector.extract_strided_slice %48 {offsets = [0, 256], sizes = [8, 128], strides = [1, 1]} : vector<8x512xf32> to vector<8x128xf32>
    %62 = math.tanh %61 : vector<8x128xf32>
    %63 = vector.extract_strided_slice %48 {offsets = [0, 384], sizes = [8, 128], strides = [1, 1]} : vector<8x512xf32> to vector<8x128xf32>
    %64 = arith.negf %63 : vector<8x128xf32>
    %65 = math.exp %64 : vector<8x128xf32>
    %cst_19 = arith.constant 1.000000e+00 : f32
    %66 = vector.broadcast %cst_19 : f32 to vector<8x128xf32>
    %67 = arith.addf %66, %65 : vector<8x128xf32>
    %68 = arith.divf %66, %67 : vector<8x128xf32>
    %69 = arith.mulf %60, %35 : vector<8x128xf32>
    %70 = arith.mulf %54, %62 : vector<8x128xf32>
    %71 = arith.addf %69, %70 : vector<8x128xf32>
    %72 = math.tanh %71 : vector<8x128xf32>
    %73 = arith.mulf %68, %72 : vector<8x128xf32>
    %74 = arith.index_cast %c1_i32 : i32 to index
    %c0_20 = arith.constant 0 : index
    %c0_21 = arith.constant 0 : index
    %75 = vector.load %arg6[%74, %c0_20, %c0_21] : memref<8x8x128xf32, #tpu.memory_space<vmem>>, vector<1x8x128xf32>
    %76 = vector.shape_cast %75 : vector<1x8x128xf32> to vector<8x128xf32>
    %77 = vector.shape_cast %73 : vector<8x128xf32> to vector<1x8x128xf32>
    tpu.vector_store %arg6[%74, %c0_20, %c0_21], %77 {strides = array<i32>} : memref<8x8x128xf32, #tpu.memory_space<vmem>>, vector<1x8x128xf32>,
    %c2_i32 = arith.constant 2 : i32
    %78 = arith.index_cast %c2_i32 : i32 to index
    %c0_22 = arith.constant 0 : index
    %c0_23 = arith.constant 0 : index
    %79 = vector.load %arg2[%78, %c0_22, %c0_23] : memref<8x8x512xbf16, #tpu.memory_space<vmem>>, vector<1x8x512xbf16>
    %80 = vector.shape_cast %79 : vector<1x8x512xbf16> to vector<8x512xbf16>
    %81 = arith.extf %80 : vector<8x512xbf16> to vector<8x512xf32>
    %82 = arith.truncf %73 : vector<8x128xf32> to vector<8x128xbf16>
    %cst_24 = arith.constant dense<0.000000e+00> : vector<8x512xf32>
    %83 = tpu.matmul %82, %3, %cst_24 {dimension_numbers = #tpu.dot_dimension_numbers<[1], [0], [0], [1], [0, 0, 1, 1], [], []>} : vector<8x128xbf16>, vector<128x512xbf16>, vector<8x512xf32> -> vector<8x512xf32>
    %84 = arith.addf %81, %83 : vector<8x512xf32>
    %85 = vector.extract_strided_slice %84 {offsets = [0, 0], sizes = [8, 128], strides = [1, 1]} : vector<8x512xf32> to vector<8x128xf32>
    %86 = arith.negf %85 : vector<8x128xf32>
    %87 = math.exp %86 : vector<8x128xf32>
    %cst_25 = arith.constant 1.000000e+00 : f32
    %88 = vector.broadcast %cst_25 : f32 to vector<8x128xf32>
    %89 = arith.addf %88, %87 : vector<8x128xf32>
    %90 = arith.divf %88, %89 : vector<8x128xf32>
    %91 = vector.extract_strided_slice %84 {offsets = [0, 128], sizes = [8, 128], strides = [1, 1]} : vector<8x512xf32> to vector<8x128xf32>
    %92 = arith.negf %91 : vector<8x128xf32>
    %93 = math.exp %92 : vector<8x128xf32>
    %cst_26 = arith.constant 1.000000e+00 : f32
    %94 = vector.broadcast %cst_26 : f32 to vector<8x128xf32>
    %95 = arith.addf %94, %93 : vector<8x128xf32>
    %96 = arith.divf %94, %95 : vector<8x128xf32>
    %97 = vector.extract_strided_slice %84 {offsets = [0, 256], sizes = [8, 128], strides = [1, 1]} : vector<8x512xf32> to vector<8x128xf32>
    %98 = math.tanh %97 : vector<8x128xf32>
    %99 = vector.extract_strided_slice %84 {offsets = [0, 384], sizes = [8, 128], strides = [1, 1]} : vector<8x512xf32> to vector<8x128xf32>
    %100 = arith.negf %99 : vector<8x128xf32>
    %101 = math.exp %100 : vector<8x128xf32>
    %cst_27 = arith.constant 1.000000e+00 : f32
    %102 = vector.broadcast %cst_27 : f32 to vector<8x128xf32>
    %103 = arith.addf %102, %101 : vector<8x128xf32>
    %104 = arith.divf %102, %103 : vector<8x128xf32>
    %105 = arith.mulf %96, %71 : vector<8x128xf32>
    %106 = arith.mulf %90, %98 : vector<8x128xf32>
    %107 = arith.addf %105, %106 : vector<8x128xf32>
    %108 = math.tanh %107 : vector<8x128xf32>
    %109 = arith.mulf %104, %108 : vector<8x128xf32>
    %110 = arith.index_cast %c2_i32 : i32 to index
    %c0_28 = arith.constant 0 : index
    %c0_29 = arith.constant 0 : index
    %111 = vector.load %arg6[%110, %c0_28, %c0_29] : memref<8x8x128xf32, #tpu.memory_space<vmem>>, vector<1x8x128xf32>
    %112 = vector.shape_cast %111 : vector<1x8x128xf32> to vector<8x128xf32>
    %113 = vector.shape_cast %109 : vector<8x128xf32> to vector<1x8x128xf32>
    tpu.vector_store %arg6[%110, %c0_28, %c0_29], %113 {strides = array<i32>} : memref<8x8x128xf32, #tpu.memory_space<vmem>>, vector<1x8x128xf32>,
    %c3_i32 = arith.constant 3 : i32
    %114 = arith.index_cast %c3_i32 : i32 to index
    %c0_30 = arith.constant 0 : index
    %c0_31 = arith.constant 0 : index
    %115 = vector.load %arg2[%114, %c0_30, %c0_31] : memref<8x8x512xbf16, #tpu.memory_space<vmem>>, vector<1x8x512xbf16>
    %116 = vector.shape_cast %115 : vector<1x8x512xbf16> to vector<8x512xbf16>
    %117 = arith.extf %116 : vector<8x512xbf16> to vector<8x512xf32>
    %118 = arith.truncf %109 : vector<8x128xf32> to vector<8x128xbf16>
    %cst_32 = arith.constant dense<0.000000e+00> : vector<8x512xf32>
    %119 = tpu.matmul %118, %3, %cst_32 {dimension_numbers = #tpu.dot_dimension_numbers<[1], [0], [0], [1], [0, 0, 1, 1], [], []>} : vector<8x128xbf16>, vector<128x512xbf16>, vector<8x512xf32> -> vector<8x512xf32>
    %120 = arith.addf %117, %119 : vector<8x512xf32>
    %121 = vector.extract_strided_slice %120 {offsets = [0, 0], sizes = [8, 128], strides = [1, 1]} : vector<8x512xf32> to vector<8x128xf32>
    %122 = arith.negf %121 : vector<8x128xf32>
    %123 = math.exp %122 : vector<8x128xf32>
    %cst_33 = arith.constant 1.000000e+00 : f32
    %124 = vector.broadcast %cst_33 : f32 to vector<8x128xf32>
    %125 = arith.addf %124, %123 : vector<8x128xf32>
    %126 = arith.divf %124, %125 : vector<8x128xf32>
    %127 = vector.extract_strided_slice %120 {offsets = [0, 128], sizes = [8, 128], strides = [1, 1]} : vector<8x512xf32> to vector<8x128xf32>
    %128 = arith.negf %127 : vector<8x128xf32>
    %129 = math.exp %128 : vector<8x128xf32>
    %cst_34 = arith.constant 1.000000e+00 : f32
    %130 = vector.broadcast %cst_34 : f32 to vector<8x128xf32>
    %131 = arith.addf %130, %129 : vector<8x128xf32>
    %132 = arith.divf %130, %131 : vector<8x128xf32>
    %133 = vector.extract_strided_slice %120 {offsets = [0, 256], sizes = [8, 128], strides = [1, 1]} : vector<8x512xf32> to vector<8x128xf32>
    %134 = math.tanh %133 : vector<8x128xf32>
    %135 = vector.extract_strided_slice %120 {offsets = [0, 384], sizes = [8, 128], strides = [1, 1]} : vector<8x512xf32> to vector<8x128xf32>
    %136 = arith.negf %135 : vector<8x128xf32>
    %137 = math.exp %136 : vector<8x128xf32>
    %cst_35 = arith.constant 1.000000e+00 : f32
    %138 = vector.broadcast %cst_35 : f32 to vector<8x128xf32>
    %139 = arith.addf %138, %137 : vector<8x128xf32>
    %140 = arith.divf %138, %139 : vector<8x128xf32>
    %141 = arith.mulf %132, %107 : vector<8x128xf32>
    %142 = arith.mulf %126, %134 : vector<8x128xf32>
    %143 = arith.addf %141, %142 : vector<8x128xf32>
    %144 = math.tanh %143 : vector<8x128xf32>
    %145 = arith.mulf %140, %144 : vector<8x128xf32>
    %146 = arith.index_cast %c3_i32 : i32 to index
    %c0_36 = arith.constant 0 : index
    %c0_37 = arith.constant 0 : index
    %147 = vector.load %arg6[%146, %c0_36, %c0_37] : memref<8x8x128xf32, #tpu.memory_space<vmem>>, vector<1x8x128xf32>
    %148 = vector.shape_cast %147 : vector<1x8x128xf32> to vector<8x128xf32>
    %149 = vector.shape_cast %145 : vector<8x128xf32> to vector<1x8x128xf32>
    tpu.vector_store %arg6[%146, %c0_36, %c0_37], %149 {strides = array<i32>} : memref<8x8x128xf32, #tpu.memory_space<vmem>>, vector<1x8x128xf32>,
    %c4_i32 = arith.constant 4 : i32
    %150 = arith.index_cast %c4_i32 : i32 to index
    %c0_38 = arith.constant 0 : index
    %c0_39 = arith.constant 0 : index
    %151 = vector.load %arg2[%150, %c0_38, %c0_39] : memref<8x8x512xbf16, #tpu.memory_space<vmem>>, vector<1x8x512xbf16>
    %152 = vector.shape_cast %151 : vector<1x8x512xbf16> to vector<8x512xbf16>
    %153 = arith.extf %152 : vector<8x512xbf16> to vector<8x512xf32>
    %154 = arith.truncf %145 : vector<8x128xf32> to vector<8x128xbf16>
    %cst_40 = arith.constant dense<0.000000e+00> : vector<8x512xf32>
    %155 = tpu.matmul %154, %3, %cst_40 {dimension_numbers = #tpu.dot_dimension_numbers<[1], [0], [0], [1], [0, 0, 1, 1], [], []>} : vector<8x128xbf16>, vector<128x512xbf16>, vector<8x512xf32> -> vector<8x512xf32>
    %156 = arith.addf %153, %155 : vector<8x512xf32>
    %157 = vector.extract_strided_slice %156 {offsets = [0, 0], sizes = [8, 128], strides = [1, 1]} : vector<8x512xf32> to vector<8x128xf32>
    %158 = arith.negf %157 : vector<8x128xf32>
    %159 = math.exp %158 : vector<8x128xf32>
    %cst_41 = arith.constant 1.000000e+00 : f32
    %160 = vector.broadcast %cst_41 : f32 to vector<8x128xf32>
    %161 = arith.addf %160, %159 : vector<8x128xf32>
    %162 = arith.divf %160, %161 : vector<8x128xf32>
    %163 = vector.extract_strided_slice %156 {offsets = [0, 128], sizes = [8, 128], strides = [1, 1]} : vector<8x512xf32> to vector<8x128xf32>
    %164 = arith.negf %163 : vector<8x128xf32>
    %165 = math.exp %164 : vector<8x128xf32>
    %cst_42 = arith.constant 1.000000e+00 : f32
    %166 = vector.broadcast %cst_42 : f32 to vector<8x128xf32>
    %167 = arith.addf %166, %165 : vector<8x128xf32>
    %168 = arith.divf %166, %167 : vector<8x128xf32>
    %169 = vector.extract_strided_slice %156 {offsets = [0, 256], sizes = [8, 128], strides = [1, 1]} : vector<8x512xf32> to vector<8x128xf32>
    %170 = math.tanh %169 : vector<8x128xf32>
    %171 = vector.extract_strided_slice %156 {offsets = [0, 384], sizes = [8, 128], strides = [1, 1]} : vector<8x512xf32> to vector<8x128xf32>
    %172 = arith.negf %171 : vector<8x128xf32>
    %173 = math.exp %172 : vector<8x128xf32>
    %cst_43 = arith.constant 1.000000e+00 : f32
    %174 = vector.broadcast %cst_43 : f32 to vector<8x128xf32>
    %175 = arith.addf %174, %173 : vector<8x128xf32>
    %176 = arith.divf %174, %175 : vector<8x128xf32>
    %177 = arith.mulf %168, %143 : vector<8x128xf32>
    %178 = arith.mulf %162, %170 : vector<8x128xf32>
    %179 = arith.addf %177, %178 : vector<8x128xf32>
    %180 = math.tanh %179 : vector<8x128xf32>
    %181 = arith.mulf %176, %180 : vector<8x128xf32>
    %182 = arith.index_cast %c4_i32 : i32 to index
    %c0_44 = arith.constant 0 : index
    %c0_45 = arith.constant 0 : index
    %183 = vector.load %arg6[%182, %c0_44, %c0_45] : memref<8x8x128xf32, #tpu.memory_space<vmem>>, vector<1x8x128xf32>
    %184 = vector.shape_cast %183 : vector<1x8x128xf32> to vector<8x128xf32>
    %185 = vector.shape_cast %181 : vector<8x128xf32> to vector<1x8x128xf32>
    tpu.vector_store %arg6[%182, %c0_44, %c0_45], %185 {strides = array<i32>} : memref<8x8x128xf32, #tpu.memory_space<vmem>>, vector<1x8x128xf32>,
    %c5_i32 = arith.constant 5 : i32
    %186 = arith.index_cast %c5_i32 : i32 to index
    %c0_46 = arith.constant 0 : index
    %c0_47 = arith.constant 0 : index
    %187 = vector.load %arg2[%186, %c0_46, %c0_47] : memref<8x8x512xbf16, #tpu.memory_space<vmem>>, vector<1x8x512xbf16>
    %188 = vector.shape_cast %187 : vector<1x8x512xbf16> to vector<8x512xbf16>
    %189 = arith.extf %188 : vector<8x512xbf16> to vector<8x512xf32>
    %190 = arith.truncf %181 : vector<8x128xf32> to vector<8x128xbf16>
    %cst_48 = arith.constant dense<0.000000e+00> : vector<8x512xf32>
    %191 = tpu.matmul %190, %3, %cst_48 {dimension_numbers = #tpu.dot_dimension_numbers<[1], [0], [0], [1], [0, 0, 1, 1], [], []>} : vector<8x128xbf16>, vector<128x512xbf16>, vector<8x512xf32> -> vector<8x512xf32>
    %192 = arith.addf %189, %191 : vector<8x512xf32>
    %193 = vector.extract_strided_slice %192 {offsets = [0, 0], sizes = [8, 128], strides = [1, 1]} : vector<8x512xf32> to vector<8x128xf32>
    %194 = arith.negf %193 : vector<8x128xf32>
    %195 = math.exp %194 : vector<8x128xf32>
    %cst_49 = arith.constant 1.000000e+00 : f32
    %196 = vector.broadcast %cst_49 : f32 to vector<8x128xf32>
    %197 = arith.addf %196, %195 : vector<8x128xf32>
    %198 = arith.divf %196, %197 : vector<8x128xf32>
    %199 = vector.extract_strided_slice %192 {offsets = [0, 128], sizes = [8, 128], strides = [1, 1]} : vector<8x512xf32> to vector<8x128xf32>
    %200 = arith.negf %199 : vector<8x128xf32>
    %201 = math.exp %200 : vector<8x128xf32>
    %cst_50 = arith.constant 1.000000e+00 : f32
    %202 = vector.broadcast %cst_50 : f32 to vector<8x128xf32>
    %203 = arith.addf %202, %201 : vector<8x128xf32>
    %204 = arith.divf %202, %203 : vector<8x128xf32>
    %205 = vector.extract_strided_slice %192 {offsets = [0, 256], sizes = [8, 128], strides = [1, 1]} : vector<8x512xf32> to vector<8x128xf32>
    %206 = math.tanh %205 : vector<8x128xf32>
    %207 = vector.extract_strided_slice %192 {offsets = [0, 384], sizes = [8, 128], strides = [1, 1]} : vector<8x512xf32> to vector<8x128xf32>
    %208 = arith.negf %207 : vector<8x128xf32>
    %209 = math.exp %208 : vector<8x128xf32>
    %cst_51 = arith.constant 1.000000e+00 : f32
    %210 = vector.broadcast %cst_51 : f32 to vector<8x128xf32>
    %211 = arith.addf %210, %209 : vector<8x128xf32>
    %212 = arith.divf %210, %211 : vector<8x128xf32>
    %213 = arith.mulf %204, %179 : vector<8x128xf32>
    %214 = arith.mulf %198, %206 : vector<8x128xf32>
    %215 = arith.addf %213, %214 : vector<8x128xf32>
    %216 = math.tanh %215 : vector<8x128xf32>
    %217 = arith.mulf %212, %216 : vector<8x128xf32>
    %218 = arith.index_cast %c5_i32 : i32 to index
    %c0_52 = arith.constant 0 : index
    %c0_53 = arith.constant 0 : index
    %219 = vector.load %arg6[%218, %c0_52, %c0_53] : memref<8x8x128xf32, #tpu.memory_space<vmem>>, vector<1x8x128xf32>
    %220 = vector.shape_cast %219 : vector<1x8x128xf32> to vector<8x128xf32>
    %221 = vector.shape_cast %217 : vector<8x128xf32> to vector<1x8x128xf32>
    tpu.vector_store %arg6[%218, %c0_52, %c0_53], %221 {strides = array<i32>} : memref<8x8x128xf32, #tpu.memory_space<vmem>>, vector<1x8x128xf32>,
    %c6_i32 = arith.constant 6 : i32
    %222 = arith.index_cast %c6_i32 : i32 to index
    %c0_54 = arith.constant 0 : index
    %c0_55 = arith.constant 0 : index
    %223 = vector.load %arg2[%222, %c0_54, %c0_55] : memref<8x8x512xbf16, #tpu.memory_space<vmem>>, vector<1x8x512xbf16>
    %224 = vector.shape_cast %223 : vector<1x8x512xbf16> to vector<8x512xbf16>
    %225 = arith.extf %224 : vector<8x512xbf16> to vector<8x512xf32>
    %226 = arith.truncf %217 : vector<8x128xf32> to vector<8x128xbf16>
    %cst_56 = arith.constant dense<0.000000e+00> : vector<8x512xf32>
    %227 = tpu.matmul %226, %3, %cst_56 {dimension_numbers = #tpu.dot_dimension_numbers<[1], [0], [0], [1], [0, 0, 1, 1], [], []>} : vector<8x128xbf16>, vector<128x512xbf16>, vector<8x512xf32> -> vector<8x512xf32>
    %228 = arith.addf %225, %227 : vector<8x512xf32>
    %229 = vector.extract_strided_slice %228 {offsets = [0, 0], sizes = [8, 128], strides = [1, 1]} : vector<8x512xf32> to vector<8x128xf32>
    %230 = arith.negf %229 : vector<8x128xf32>
    %231 = math.exp %230 : vector<8x128xf32>
    %cst_57 = arith.constant 1.000000e+00 : f32
    %232 = vector.broadcast %cst_57 : f32 to vector<8x128xf32>
    %233 = arith.addf %232, %231 : vector<8x128xf32>
    %234 = arith.divf %232, %233 : vector<8x128xf32>
    %235 = vector.extract_strided_slice %228 {offsets = [0, 128], sizes = [8, 128], strides = [1, 1]} : vector<8x512xf32> to vector<8x128xf32>
    %236 = arith.negf %235 : vector<8x128xf32>
    %237 = math.exp %236 : vector<8x128xf32>
    %cst_58 = arith.constant 1.000000e+00 : f32
    %238 = vector.broadcast %cst_58 : f32 to vector<8x128xf32>
    %239 = arith.addf %238, %237 : vector<8x128xf32>
    %240 = arith.divf %238, %239 : vector<8x128xf32>
    %241 = vector.extract_strided_slice %228 {offsets = [0, 256], sizes = [8, 128], strides = [1, 1]} : vector<8x512xf32> to vector<8x128xf32>
    %242 = math.tanh %241 : vector<8x128xf32>
    %243 = vector.extract_strided_slice %228 {offsets = [0, 384], sizes = [8, 128], strides = [1, 1]} : vector<8x512xf32> to vector<8x128xf32>
    %244 = arith.negf %243 : vector<8x128xf32>
    %245 = math.exp %244 : vector<8x128xf32>
    %cst_59 = arith.constant 1.000000e+00 : f32
    %246 = vector.broadcast %cst_59 : f32 to vector<8x128xf32>
    %247 = arith.addf %246, %245 : vector<8x128xf32>
    %248 = arith.divf %246, %247 : vector<8x128xf32>
    %249 = arith.mulf %240, %215 : vector<8x128xf32>
    %250 = arith.mulf %234, %242 : vector<8x128xf32>
    %251 = arith.addf %249, %250 : vector<8x128xf32>
    %252 = math.tanh %251 : vector<8x128xf32>
    %253 = arith.mulf %248, %252 : vector<8x128xf32>
    %254 = arith.index_cast %c6_i32 : i32 to index
    %c0_60 = arith.constant 0 : index
    %c0_61 = arith.constant 0 : index
    %255 = vector.load %arg6[%254, %c0_60, %c0_61] : memref<8x8x128xf32, #tpu.memory_space<vmem>>, vector<1x8x128xf32>
    %256 = vector.shape_cast %255 : vector<1x8x128xf32> to vector<8x128xf32>
    %257 = vector.shape_cast %253 : vector<8x128xf32> to vector<1x8x128xf32>
    tpu.vector_store %arg6[%254, %c0_60, %c0_61], %257 {strides = array<i32>} : memref<8x8x128xf32, #tpu.memory_space<vmem>>, vector<1x8x128xf32>,
    %c7_i32 = arith.constant 7 : i32
    %258 = arith.index_cast %c7_i32 : i32 to index
    %c0_62 = arith.constant 0 : index
    %c0_63 = arith.constant 0 : index
    %259 = vector.load %arg2[%258, %c0_62, %c0_63] : memref<8x8x512xbf16, #tpu.memory_space<vmem>>, vector<1x8x512xbf16>
    %260 = vector.shape_cast %259 : vector<1x8x512xbf16> to vector<8x512xbf16>
    %261 = arith.extf %260 : vector<8x512xbf16> to vector<8x512xf32>
    %262 = arith.truncf %253 : vector<8x128xf32> to vector<8x128xbf16>
    %cst_64 = arith.constant dense<0.000000e+00> : vector<8x512xf32>
    %263 = tpu.matmul %262, %3, %cst_64 {dimension_numbers = #tpu.dot_dimension_numbers<[1], [0], [0], [1], [0, 0, 1, 1], [], []>} : vector<8x128xbf16>, vector<128x512xbf16>, vector<8x512xf32> -> vector<8x512xf32>
    %264 = arith.addf %261, %263 : vector<8x512xf32>
    %265 = vector.extract_strided_slice %264 {offsets = [0, 0], sizes = [8, 128], strides = [1, 1]} : vector<8x512xf32> to vector<8x128xf32>
    %266 = arith.negf %265 : vector<8x128xf32>
    %267 = math.exp %266 : vector<8x128xf32>
    %cst_65 = arith.constant 1.000000e+00 : f32
    %268 = vector.broadcast %cst_65 : f32 to vector<8x128xf32>
    %269 = arith.addf %268, %267 : vector<8x128xf32>
    %270 = arith.divf %268, %269 : vector<8x128xf32>
    %271 = vector.extract_strided_slice %264 {offsets = [0, 128], sizes = [8, 128], strides = [1, 1]} : vector<8x512xf32> to vector<8x128xf32>
    %272 = arith.negf %271 : vector<8x128xf32>
    %273 = math.exp %272 : vector<8x128xf32>
    %cst_66 = arith.constant 1.000000e+00 : f32
    %274 = vector.broadcast %cst_66 : f32 to vector<8x128xf32>
    %275 = arith.addf %274, %273 : vector<8x128xf32>
    %276 = arith.divf %274, %275 : vector<8x128xf32>
    %277 = vector.extract_strided_slice %264 {offsets = [0, 256], sizes = [8, 128], strides = [1, 1]} : vector<8x512xf32> to vector<8x128xf32>
    %278 = math.tanh %277 : vector<8x128xf32>
    %279 = vector.extract_strided_slice %264 {offsets = [0, 384], sizes = [8, 128], strides = [1, 1]} : vector<8x512xf32> to vector<8x128xf32>
    %280 = arith.negf %279 : vector<8x128xf32>
    %281 = math.exp %280 : vector<8x128xf32>
    %cst_67 = arith.constant 1.000000e+00 : f32
    %282 = vector.broadcast %cst_67 : f32 to vector<8x128xf32>
    %283 = arith.addf %282, %281 : vector<8x128xf32>
    %284 = arith.divf %282, %283 : vector<8x128xf32>
    %285 = arith.mulf %276, %251 : vector<8x128xf32>
    %286 = arith.mulf %270, %278 : vector<8x128xf32>
    %287 = arith.addf %285, %286 : vector<8x128xf32>
    %288 = math.tanh %287 : vector<8x128xf32>
    %289 = arith.mulf %284, %288 : vector<8x128xf32>
    %290 = arith.index_cast %c7_i32 : i32 to index
    %c0_68 = arith.constant 0 : index
    %c0_69 = arith.constant 0 : index
    %291 = vector.load %arg6[%290, %c0_68, %c0_69] : memref<8x8x128xf32, #tpu.memory_space<vmem>>, vector<1x8x128xf32>
    %292 = vector.shape_cast %291 : vector<1x8x128xf32> to vector<8x128xf32>
    %293 = vector.shape_cast %289 : vector<8x128xf32> to vector<1x8x128xf32>
    tpu.vector_store %arg6[%290, %c0_68, %c0_69], %293 {strides = array<i32>} : memref<8x8x128xf32, #tpu.memory_space<vmem>>, vector<1x8x128xf32>,
    %c8_i32 = arith.constant 8 : i32
    %c0_70 = arith.constant 0 : index
    %c0_71 = arith.constant 0 : index
    %294 = vector.load %arg9[%c0_70, %c0_71] : memref<8x128xf32, #tpu.memory_space<vmem>>, vector<8x128xf32>
    tpu.vector_store %arg9[%c0_70, %c0_71], %289 {strides = array<i32>} : memref<8x128xf32, #tpu.memory_space<vmem>>, vector<8x128xf32>,
    %c0_72 = arith.constant 0 : index
    %c0_73 = arith.constant 0 : index
    %295 = vector.load %arg10[%c0_72, %c0_73] : memref<8x128xf32, #tpu.memory_space<vmem>>, vector<8x128xf32>
    tpu.vector_store %arg10[%c0_72, %c0_73], %287 {strides = array<i32>} : memref<8x128xf32, #tpu.memory_space<vmem>>, vector<8x128xf32>,
    %c0_i32_74 = arith.constant 0 : i32
    %296 = arith.cmpi eq, %arg1, %c0_i32_74 : i32
    %297 = arith.extui %296 : i1 to i32
    %c0_i32_75 = arith.constant 0 : i32
    %298 = arith.cmpi ne, %297, %c0_i32_75 : i32
    scf.if %298 {
      %c0_76 = arith.constant 0 : index
      %c0_77 = arith.constant 0 : index
      %299 = vector.load %arg9[%c0_76, %c0_77] : memref<8x128xf32, #tpu.memory_space<vmem>>, vector<8x128xf32>
      %c0_78 = arith.constant 0 : index
      %c0_79 = arith.constant 0 : index
      %c0_80 = arith.constant 0 : index
      %300 = vector.load %arg7[%c0_78, %c0_79, %c0_80] : memref<1x8x128xf32, #tpu.memory_space<vmem>>, vector<1x8x128xf32>
      %301 = vector.shape_cast %300 : vector<1x8x128xf32> to vector<8x128xf32>
      %302 = vector.shape_cast %299 : vector<8x128xf32> to vector<1x8x128xf32>
      tpu.vector_store %arg7[%c0_78, %c0_79, %c0_80], %302 {strides = array<i32>} : memref<1x8x128xf32, #tpu.memory_space<vmem>>, vector<1x8x128xf32>,
      %c0_81 = arith.constant 0 : index
      %c0_82 = arith.constant 0 : index
      %303 = vector.load %arg10[%c0_81, %c0_82] : memref<8x128xf32, #tpu.memory_space<vmem>>, vector<8x128xf32>
      %c0_83 = arith.constant 0 : index
      %c0_84 = arith.constant 0 : index
      %c0_85 = arith.constant 0 : index
      %304 = vector.load %arg8[%c0_83, %c0_84, %c0_85] : memref<1x8x128xf32, #tpu.memory_space<vmem>>, vector<1x8x128xf32>
      %305 = vector.shape_cast %304 : vector<1x8x128xf32> to vector<8x128xf32>
      %306 = vector.shape_cast %303 : vector<8x128xf32> to vector<1x8x128xf32>
      tpu.vector_store %arg8[%c0_83, %c0_84, %c0_85], %306 {strides = array<i32>} : memref<1x8x128xf32, #tpu.memory_space<vmem>>, vector<1x8x128xf32>,
    } else {
    }
    return
  }
  func.func @transform_0(%arg0: i32, %arg1: i32) -> (i32, i32, i32) {
    %c0_i32 = arith.constant 0 : i32
    %c0_i32_0 = arith.constant 0 : i32
    return %arg1, %arg0, %c0_i32 : i32, i32, i32
  }
  func.func @transform_1(%arg0: i32, %arg1: i32) -> (i32, i32, i32) {
    %c0_i32 = arith.constant 0 : i32
    %c0_i32_0 = arith.constant 0 : i32
    %c0_i32_1 = arith.constant 0 : i32
    return %c0_i32, %arg0, %c0_i32_0 : i32, i32, i32
  }
  func.func @transform_2(%arg0: i32, %arg1: i32) -> (i32, i32, i32) {
    %c0_i32 = arith.constant 0 : i32
    %c0_i32_0 = arith.constant 0 : i32
    %c0_i32_1 = arith.constant 0 : i32
    return %c0_i32, %arg0, %c0_i32_0 : i32, i32, i32
  }
  func.func @transform_3(%arg0: i32, %arg1: i32) -> (i32, i32) {
    %c0_i32 = arith.constant 0 : i32
    %c0_i32_0 = arith.constant 0 : i32
    %c0_i32_1 = arith.constant 0 : i32
    return %c0_i32, %c0_i32_0 : i32, i32
  }
  func.func @transform_4(%arg0: i32, %arg1: i32) -> (i32, i32, i32) {
    %c0_i32 = arith.constant 0 : i32
    %c0_i32_0 = arith.constant 0 : i32
    return %arg1, %arg0, %c0_i32 : i32, i32, i32
  }
  func.func @transform_5(%arg0: i32, %arg1: i32) -> (i32, i32, i32) {
    %c0_i32 = arith.constant 0 : i32
    %c0_i32_0 = arith.constant 0 : i32
    %c0_i32_1 = arith.constant 0 : i32
    return %c0_i32, %arg0, %c0_i32_0 : i32, i32, i32
  }
  func.func @transform_6(%arg0: i32, %arg1: i32) -> (i32, i32, i32) {
    %c0_i32 = arith.constant 0 : i32
    %c0_i32_0 = arith.constant 0 : i32
    %c0_i32_1 = arith.constant 0 : i32
    return %c0_i32, %arg0, %c0_i32_0 : i32, i32, i32
  }
}

module attributes {stable_mosaic.version = 11 : i64} {
  func.func @_lstm_kernel(%arg0: i32, %arg1: i32, %arg2: memref<8x8x512xbf16, #tpu.memory_space<vmem>>, %arg3: memref<1x8x128xf32, #tpu.memory_space<vmem>>, %arg4: memref<1x8x128xf32, #tpu.memory_space<vmem>>, %arg5: memref<128x512xbf16, #tpu.memory_space<vmem>>, %arg6: memref<8x8x128xf32, #tpu.memory_space<vmem>>, %arg7: memref<1x8x128xf32, #tpu.memory_space<vmem>>, %arg8: memref<1x8x128xf32, #tpu.memory_space<vmem>>, %arg9: memref<8x128xf32, #tpu.memory_space<vmem>>, %arg10: memref<8x128xf32, #tpu.memory_space<vmem>>) attributes {dimension_semantics = [#tpu.dimension_semantics<parallel>, #tpu.dimension_semantics<arbitrary>], iteration_bounds = array<i64: 1, 1>, scalar_prefetch = 0 : i64, scratch_operands = 2 : i64, tpu.core_type = #tpu.core_type<tc>, window_params = [{transform_indices = @transform_0, window_bounds = array<i64: 8, 8, 512>}, {transform_indices = @transform_1, window_bounds = array<i64: 1, 8, 128>}, {transform_indices = @transform_2, window_bounds = array<i64: 1, 8, 128>}, {pipeline_mode = #tpu.pipeline_mode<synchronous>, transform_indices = @transform_3, window_bounds = array<i64: 128, 512>}, {transform_indices = @transform_4, window_bounds = array<i64: 8, 8, 128>}, {transform_indices = @transform_5, window_bounds = array<i64: 1, 8, 128>}, {transform_indices = @transform_6, window_bounds = array<i64: 1, 8, 128>}]} {
    %c0_i32 = arith.constant 0 : i32
    %0 = arith.cmpi eq, %arg1, %c0_i32 : i32
    %1 = arith.extui %0 : i1 to i32
    %c0_i32_0 = arith.constant 0 : i32
    %2 = arith.cmpi ne, %1, %c0_i32_0 : i32
    scf.if %2 {
      %c0_76 = arith.constant 0 : index
      %c0_77 = arith.constant 0 : index
      %c0_78 = arith.constant 0 : index
      %299 = vector.load %arg3[%c0_76, %c0_77, %c0_78] : memref<1x8x128xf32, #tpu.memory_space<vmem>>, vector<1x8x128xf32>
      %300 = vector.shape_cast %299 : vector<1x8x128xf32> to vector<8x128xf32>
      %c0_79 = arith.constant 0 : index
      %c0_80 = arith.constant 0 : index
      %301 = vector.load %arg9[%c0_79, %c0_80] : memref<8x128xf32, #tpu.memory_space<vmem>>, vector<8x128xf32>
      tpu.vector_store %arg9[%c0_79, %c0_80], %300 {strides = array<i32>} : memref<8x128xf32, #tpu.memory_space<vmem>>, vector<8x128xf32>,
      %c0_81 = arith.constant 0 : index
      %c0_82 = arith.constant 0 : index
      %c0_83 = arith.constant 0 : index
      %302 = vector.load %arg4[%c0_81, %c0_82, %c0_83] : memref<1x8x128xf32, #tpu.memory_space<vmem>>, vector<1x8x128xf32>
      %303 = vector.shape_cast %302 : vector<1x8x128xf32> to vector<8x128xf32>
      %c0_84 = arith.constant 0 : index
      %c0_85 = arith.constant 0 : index
      %304 = vector.load %arg10[%c0_84, %c0_85] : memref<8x128xf32, #tpu.memory_space<vmem>>, vector<8x128xf32>
      tpu.vector_store %arg10[%c0_84, %c0_85], %303 {strides = array<i32>} : memref<8x128xf32, #tpu.memory_space<vmem>>, vector<8x128xf32>,
    } else {
    }
    %c0 = arith.constant 0 : index
    %c0_1 = arith.constant 0 : index
    %3 = vector.load %arg5[%c0, %c0_1] : memref<128x512xbf16, #tpu.memory_space<vmem>>, vector<128x512xbf16>
    %c0_2 = arith.constant 0 : index
    %c0_3 = arith.constant 0 : index
    %4 = vector.load %arg9[%c0_2, %c0_3] : memref<8x128xf32, #tpu.memory_space<vmem>>, vector<8x128xf32>
    %c0_4 = arith.constant 0 : index
    %c0_5 = arith.constant 0 : index
    %5 = vector.load %arg10[%c0_4, %c0_5] : memref<8x128xf32, #tpu.memory_space<vmem>>, vector<8x128xf32>
    %c0_i32_6 = arith.constant 0 : i32
    %6 = arith.index_cast %c0_i32_6 : i32 to index
    %c0_7 = arith.constant 0 : index
    %c0_8 = arith.constant 0 : index
    %7 = vector.load %arg2[%6, %c0_7, %c0_8] : memref<8x8x512xbf16, #tpu.memory_space<vmem>>, vector<1x8x512xbf16>
    %8 = vector.shape_cast %7 : vector<1x8x512xbf16> to vector<8x512xbf16>
    %9 = arith.extf %8 : vector<8x512xbf16> to vector<8x512xf32>
    %10 = arith.truncf %4 : vector<8x128xf32> to vector<8x128xbf16>
    %cst = arith.constant dense<0.000000e+00> : vector<8x512xf32>
    %11 = tpu.matmul %10, %3, %cst {dimension_numbers = #tpu.dot_dimension_numbers<[1], [0], [0], [1], [0, 0, 1, 1], [], []>} : vector<8x128xbf16>, vector<128x512xbf16>, vector<8x512xf32> -> vector<8x512xf32>
    %12 = arith.addf %9, %11 : vector<8x512xf32>
    %13 = vector.extract_strided_slice %12 {offsets = [0, 0], sizes = [8, 128], strides = [1, 1]} : vector<8x512xf32> to vector<8x128xf32>
    %14 = arith.negf %13 : vector<8x128xf32>
    %15 = math.exp %14 : vector<8x128xf32>
    %cst_9 = arith.constant 1.000000e+00 : f32
    %16 = vector.broadcast %cst_9 : f32 to vector<8x128xf32>
    %17 = arith.addf %16, %15 : vector<8x128xf32>
    %18 = arith.divf %16, %17 : vector<8x128xf32>
    %19 = vector.extract_strided_slice %12 {offsets = [0, 128], sizes = [8, 128], strides = [1, 1]} : vector<8x512xf32> to vector<8x128xf32>
    %20 = arith.negf %19 : vector<8x128xf32>
    %21 = math.exp %20 : vector<8x128xf32>
    %cst_10 = arith.constant 1.000000e+00 : f32
    %22 = vector.broadcast %cst_10 : f32 to vector<8x128xf32>
    %23 = arith.addf %22, %21 : vector<8x128xf32>
    %24 = arith.divf %22, %23 : vector<8x128xf32>
    %25 = vector.extract_strided_slice %12 {offsets = [0, 256], sizes = [8, 128], strides = [1, 1]} : vector<8x512xf32> to vector<8x128xf32>
    %26 = math.tanh %25 : vector<8x128xf32>
    %27 = vector.extract_strided_slice %12 {offsets = [0, 384], sizes = [8, 128], strides = [1, 1]} : vector<8x512xf32> to vector<8x128xf32>
    %28 = arith.negf %27 : vector<8x128xf32>
    %29 = math.exp %28 : vector<8x128xf32>
    %cst_11 = arith.constant 1.000000e+00 : f32
    %30 = vector.broadcast %cst_11 : f32 to vector<8x128xf32>
    %31 = arith.addf %30, %29 : vector<8x128xf32>
    %32 = arith.divf %30, %31 : vector<8x128xf32>
    %33 = arith.mulf %24, %5 : vector<8x128xf32>
    %34 = arith.mulf %18, %26 : vector<8x128xf32>
    %35 = arith.addf %33, %34 : vector<8x128xf32>
    %36 = math.tanh %35 : vector<8x128xf32>
    %37 = arith.mulf %32, %36 : vector<8x128xf32>
    %38 = arith.index_cast %c0_i32_6 : i32 to index
    %c0_12 = arith.constant 0 : index
    %c0_13 = arith.constant 0 : index
    %39 = vector.load %arg6[%38, %c0_12, %c0_13] : memref<8x8x128xf32, #tpu.memory_space<vmem>>, vector<1x8x128xf32>
    %40 = vector.shape_cast %39 : vector<1x8x128xf32> to vector<8x128xf32>
    %41 = vector.shape_cast %37 : vector<8x128xf32> to vector<1x8x128xf32>
    tpu.vector_store %arg6[%38, %c0_12, %c0_13], %41 {strides = array<i32>} : memref<8x8x128xf32, #tpu.memory_space<vmem>>, vector<1x8x128xf32>,
    %c1_i32 = arith.constant 1 : i32
    %42 = arith.index_cast %c1_i32 : i32 to index
    %c0_14 = arith.constant 0 : index
    %c0_15 = arith.constant 0 : index
    %43 = vector.load %arg2[%42, %c0_14, %c0_15] : memref<8x8x512xbf16, #tpu.memory_space<vmem>>, vector<1x8x512xbf16>
    %44 = vector.shape_cast %43 : vector<1x8x512xbf16> to vector<8x512xbf16>
    %45 = arith.extf %44 : vector<8x512xbf16> to vector<8x512xf32>
    %46 = arith.truncf %37 : vector<8x128xf32> to vector<8x128xbf16>
    %cst_16 = arith.constant dense<0.000000e+00> : vector<8x512xf32>
    %47 = tpu.matmul %46, %3, %cst_16 {dimension_numbers = #tpu.dot_dimension_numbers<[1], [0], [0], [1], [0, 0, 1, 1], [], []>} : vector<8x128xbf16>, vector<128x512xbf16>, vector<8x512xf32> -> vector<8x512xf32>
    %48 = arith.addf %45, %47 : vector<8x512xf32>
    %49 = vector.extract_strided_slice %48 {offsets = [0, 0], sizes = [8, 128], strides = [1, 1]} : vector<8x512xf32> to vector<8x128xf32>
    %50 = arith.negf %49 : vector<8x128xf32>
    %51 = math.exp %50 : vector<8x128xf32>
    %cst_17 = arith.constant 1.000000e+00 : f32
    %52 = vector.broadcast %cst_17 : f32 to vector<8x128xf32>
    %53 = arith.addf %52, %51 : vector<8x128xf32>
    %54 = arith.divf %52, %53 : vector<8x128xf32>
    %55 = vector.extract_strided_slice %48 {offsets = [0, 128], sizes = [8, 128], strides = [1, 1]} : vector<8x512xf32> to vector<8x128xf32>
    %56 = arith.negf %55 : vector<8x128xf32>
    %57 = math.exp %56 : vector<8x128xf32>
    %cst_18 = arith.constant 1.000000e+00 : f32
    %58 = vector.broadcast %cst_18 : f32 to vector<8x128xf32>
    %59 = arith.addf %58, %57 : vector<8x128xf32>
    %60 = arith.divf %58, %59 : vector<8x128xf32>
    %61 = vector.extract_strided_slice %48 {offsets = [0, 256], sizes = [8, 128], strides = [1, 1]} : vector<8x512xf32> to vector<8x128xf32>
    %62 = math.tanh %61 : vector<8x128xf32>
    %63 = vector.extract_strided_slice %48 {offsets = [0, 384], sizes = [8, 128], strides = [1, 1]} : vector<8x512xf32> to vector<8x128xf32>
    %64 = arith.negf %63 : vector<8x128xf32>
    %65 = math.exp %64 : vector<8x128xf32>
    %cst_19 = arith.constant 1.000000e+00 : f32
    %66 = vector.broadcast %cst_19 : f32 to vector<8x128xf32>
    %67 = arith.addf %66, %65 : vector<8x128xf32>
    %68 = arith.divf %66, %67 : vector<8x128xf32>
    %69 = arith.mulf %60, %35 : vector<8x128xf32>
    %70 = arith.mulf %54, %62 : vector<8x128xf32>
    %71 = arith.addf %69, %70 : vector<8x128xf32>
    %72 = math.tanh %71 : vector<8x128xf32>
    %73 = arith.mulf %68, %72 : vector<8x128xf32>
    %74 = arith.index_cast %c1_i32 : i32 to index
    %c0_20 = arith.constant 0 : index
    %c0_21 = arith.constant 0 : index
    %75 = vector.load %arg6[%74, %c0_20, %c0_21] : memref<8x8x128xf32, #tpu.memory_space<vmem>>, vector<1x8x128xf32>
    %76 = vector.shape_cast %75 : vector<1x8x128xf32> to vector<8x128xf32>
    %77 = vector.shape_cast %73 : vector<8x128xf32> to vector<1x8x128xf32>
    tpu.vector_store %arg6[%74, %c0_20, %c0_21], %77 {strides = array<i32>} : memref<8x8x128xf32, #tpu.memory_space<vmem>>, vector<1x8x128xf32>,
    %c2_i32 = arith.constant 2 : i32
    %78 = arith.index_cast %c2_i32 : i32 to index
    %c0_22 = arith.constant 0 : index
    %c0_23 = arith.constant 0 : index
    %79 = vector.load %arg2[%78, %c0_22, %c0_23] : memref<8x8x512xbf16, #tpu.memory_space<vmem>>, vector<1x8x512xbf16>
    %80 = vector.shape_cast %79 : vector<1x8x512xbf16> to vector<8x512xbf16>
    %81 = arith.extf %80 : vector<8x512xbf16> to vector<8x512xf32>
    %82 = arith.truncf %73 : vector<8x128xf32> to vector<8x128xbf16>
    %cst_24 = arith.constant dense<0.000000e+00> : vector<8x512xf32>
    %83 = tpu.matmul %82, %3, %cst_24 {dimension_numbers = #tpu.dot_dimension_numbers<[1], [0], [0], [1], [0, 0, 1, 1], [], []>} : vector<8x128xbf16>, vector<128x512xbf16>, vector<8x512xf32> -> vector<8x512xf32>
    %84 = arith.addf %81, %83 : vector<8x512xf32>
    %85 = vector.extract_strided_slice %84 {offsets = [0, 0], sizes = [8, 128], strides = [1, 1]} : vector<8x512xf32> to vector<8x128xf32>
    %86 = arith.negf %85 : vector<8x128xf32>
    %87 = math.exp %86 : vector<8x128xf32>
    %cst_25 = arith.constant 1.000000e+00 : f32
    %88 = vector.broadcast %cst_25 : f32 to vector<8x128xf32>
    %89 = arith.addf %88, %87 : vector<8x128xf32>
    %90 = arith.divf %88, %89 : vector<8x128xf32>
    %91 = vector.extract_strided_slice %84 {offsets = [0, 128], sizes = [8, 128], strides = [1, 1]} : vector<8x512xf32> to vector<8x128xf32>
    %92 = arith.negf %91 : vector<8x128xf32>
    %93 = math.exp %92 : vector<8x128xf32>
    %cst_26 = arith.constant 1.000000e+00 : f32
    %94 = vector.broadcast %cst_26 : f32 to vector<8x128xf32>
    %95 = arith.addf %94, %93 : vector<8x128xf32>
    %96 = arith.divf %94, %95 : vector<8x128xf32>
    %97 = vector.extract_strided_slice %84 {offsets = [0, 256], sizes = [8, 128], strides = [1, 1]} : vector<8x512xf32> to vector<8x128xf32>
    %98 = math.tanh %97 : vector<8x128xf32>
    %99 = vector.extract_strided_slice %84 {offsets = [0, 384], sizes = [8, 128], strides = [1, 1]} : vector<8x512xf32> to vector<8x128xf32>
    %100 = arith.negf %99 : vector<8x128xf32>
    %101 = math.exp %100 : vector<8x128xf32>
    %cst_27 = arith.constant 1.000000e+00 : f32
    %102 = vector.broadcast %cst_27 : f32 to vector<8x128xf32>
    %103 = arith.addf %102, %101 : vector<8x128xf32>
    %104 = arith.divf %102, %103 : vector<8x128xf32>
    %105 = arith.mulf %96, %71 : vector<8x128xf32>
    %106 = arith.mulf %90, %98 : vector<8x128xf32>
    %107 = arith.addf %105, %106 : vector<8x128xf32>
    %108 = math.tanh %107 : vector<8x128xf32>
    %109 = arith.mulf %104, %108 : vector<8x128xf32>
    %110 = arith.index_cast %c2_i32 : i32 to index
    %c0_28 = arith.constant 0 : index
    %c0_29 = arith.constant 0 : index
    %111 = vector.load %arg6[%110, %c0_28, %c0_29] : memref<8x8x128xf32, #tpu.memory_space<vmem>>, vector<1x8x128xf32>
    %112 = vector.shape_cast %111 : vector<1x8x128xf32> to vector<8x128xf32>
    %113 = vector.shape_cast %109 : vector<8x128xf32> to vector<1x8x128xf32>
    tpu.vector_store %arg6[%110, %c0_28, %c0_29], %113 {strides = array<i32>} : memref<8x8x128xf32, #tpu.memory_space<vmem>>, vector<1x8x128xf32>,
    %c3_i32 = arith.constant 3 : i32
    %114 = arith.index_cast %c3_i32 : i32 to index
    %c0_30 = arith.constant 0 : index
    %c0_31 = arith.constant 0 : index
    %115 = vector.load %arg2[%114, %c0_30, %c0_31] : memref<8x8x512xbf16, #tpu.memory_space<vmem>>, vector<1x8x512xbf16>
    %116 = vector.shape_cast %115 : vector<1x8x512xbf16> to vector<8x512xbf16>
    %117 = arith.extf %116 : vector<8x512xbf16> to vector<8x512xf32>
    %118 = arith.truncf %109 : vector<8x128xf32> to vector<8x128xbf16>
    %cst_32 = arith.constant dense<0.000000e+00> : vector<8x512xf32>
    %119 = tpu.matmul %118, %3, %cst_32 {dimension_numbers = #tpu.dot_dimension_numbers<[1], [0], [0], [1], [0, 0, 1, 1], [], []>} : vector<8x128xbf16>, vector<128x512xbf16>, vector<8x512xf32> -> vector<8x512xf32>
    %120 = arith.addf %117, %119 : vector<8x512xf32>
    %121 = vector.extract_strided_slice %120 {offsets = [0, 0], sizes = [8, 128], strides = [1, 1]} : vector<8x512xf32> to vector<8x128xf32>
    %122 = arith.negf %121 : vector<8x128xf32>
    %123 = math.exp %122 : vector<8x128xf32>
    %cst_33 = arith.constant 1.000000e+00 : f32
    %124 = vector.broadcast %cst_33 : f32 to vector<8x128xf32>
    %125 = arith.addf %124, %123 : vector<8x128xf32>
    %126 = arith.divf %124, %125 : vector<8x128xf32>
    %127 = vector.extract_strided_slice %120 {offsets = [0, 128], sizes = [8, 128], strides = [1, 1]} : vector<8x512xf32> to vector<8x128xf32>
    %128 = arith.negf %127 : vector<8x128xf32>
    %129 = math.exp %128 : vector<8x128xf32>
    %cst_34 = arith.constant 1.000000e+00 : f32
    %130 = vector.broadcast %cst_34 : f32 to vector<8x128xf32>
    %131 = arith.addf %130, %129 : vector<8x128xf32>
    %132 = arith.divf %130, %131 : vector<8x128xf32>
    %133 = vector.extract_strided_slice %120 {offsets = [0, 256], sizes = [8, 128], strides = [1, 1]} : vector<8x512xf32> to vector<8x128xf32>
    %134 = math.tanh %133 : vector<8x128xf32>
    %135 = vector.extract_strided_slice %120 {offsets = [0, 384], sizes = [8, 128], strides = [1, 1]} : vector<8x512xf32> to vector<8x128xf32>
    %136 = arith.negf %135 : vector<8x128xf32>
    %137 = math.exp %136 : vector<8x128xf32>
    %cst_35 = arith.constant 1.000000e+00 : f32
    %138 = vector.broadcast %cst_35 : f32 to vector<8x128xf32>
    %139 = arith.addf %138, %137 : vector<8x128xf32>
    %140 = arith.divf %138, %139 : vector<8x128xf32>
    %141 = arith.mulf %132, %107 : vector<8x128xf32>
    %142 = arith.mulf %126, %134 : vector<8x128xf32>
    %143 = arith.addf %141, %142 : vector<8x128xf32>
    %144 = math.tanh %143 : vector<8x128xf32>
    %145 = arith.mulf %140, %144 : vector<8x128xf32>
    %146 = arith.index_cast %c3_i32 : i32 to index
    %c0_36 = arith.constant 0 : index
    %c0_37 = arith.constant 0 : index
    %147 = vector.load %arg6[%146, %c0_36, %c0_37] : memref<8x8x128xf32, #tpu.memory_space<vmem>>, vector<1x8x128xf32>
    %148 = vector.shape_cast %147 : vector<1x8x128xf32> to vector<8x128xf32>
    %149 = vector.shape_cast %145 : vector<8x128xf32> to vector<1x8x128xf32>
    tpu.vector_store %arg6[%146, %c0_36, %c0_37], %149 {strides = array<i32>} : memref<8x8x128xf32, #tpu.memory_space<vmem>>, vector<1x8x128xf32>,
    %c4_i32 = arith.constant 4 : i32
    %150 = arith.index_cast %c4_i32 : i32 to index
    %c0_38 = arith.constant 0 : index
    %c0_39 = arith.constant 0 : index
    %151 = vector.load %arg2[%150, %c0_38, %c0_39] : memref<8x8x512xbf16, #tpu.memory_space<vmem>>, vector<1x8x512xbf16>
    %152 = vector.shape_cast %151 : vector<1x8x512xbf16> to vector<8x512xbf16>
    %153 = arith.extf %152 : vector<8x512xbf16> to vector<8x512xf32>
    %154 = arith.truncf %145 : vector<8x128xf32> to vector<8x128xbf16>
    %cst_40 = arith.constant dense<0.000000e+00> : vector<8x512xf32>
    %155 = tpu.matmul %154, %3, %cst_40 {dimension_numbers = #tpu.dot_dimension_numbers<[1], [0], [0], [1], [0, 0, 1, 1], [], []>} : vector<8x128xbf16>, vector<128x512xbf16>, vector<8x512xf32> -> vector<8x512xf32>
    %156 = arith.addf %153, %155 : vector<8x512xf32>
    %157 = vector.extract_strided_slice %156 {offsets = [0, 0], sizes = [8, 128], strides = [1, 1]} : vector<8x512xf32> to vector<8x128xf32>
    %158 = arith.negf %157 : vector<8x128xf32>
    %159 = math.exp %158 : vector<8x128xf32>
    %cst_41 = arith.constant 1.000000e+00 : f32
    %160 = vector.broadcast %cst_41 : f32 to vector<8x128xf32>
    %161 = arith.addf %160, %159 : vector<8x128xf32>
    %162 = arith.divf %160, %161 : vector<8x128xf32>
    %163 = vector.extract_strided_slice %156 {offsets = [0, 128], sizes = [8, 128], strides = [1, 1]} : vector<8x512xf32> to vector<8x128xf32>
    %164 = arith.negf %163 : vector<8x128xf32>
    %165 = math.exp %164 : vector<8x128xf32>
    %cst_42 = arith.constant 1.000000e+00 : f32
    %166 = vector.broadcast %cst_42 : f32 to vector<8x128xf32>
    %167 = arith.addf %166, %165 : vector<8x128xf32>
    %168 = arith.divf %166, %167 : vector<8x128xf32>
    %169 = vector.extract_strided_slice %156 {offsets = [0, 256], sizes = [8, 128], strides = [1, 1]} : vector<8x512xf32> to vector<8x128xf32>
    %170 = math.tanh %169 : vector<8x128xf32>
    %171 = vector.extract_strided_slice %156 {offsets = [0, 384], sizes = [8, 128], strides = [1, 1]} : vector<8x512xf32> to vector<8x128xf32>
    %172 = arith.negf %171 : vector<8x128xf32>
    %173 = math.exp %172 : vector<8x128xf32>
    %cst_43 = arith.constant 1.000000e+00 : f32
    %174 = vector.broadcast %cst_43 : f32 to vector<8x128xf32>
    %175 = arith.addf %174, %173 : vector<8x128xf32>
    %176 = arith.divf %174, %175 : vector<8x128xf32>
    %177 = arith.mulf %168, %143 : vector<8x128xf32>
    %178 = arith.mulf %162, %170 : vector<8x128xf32>
    %179 = arith.addf %177, %178 : vector<8x128xf32>
    %180 = math.tanh %179 : vector<8x128xf32>
    %181 = arith.mulf %176, %180 : vector<8x128xf32>
    %182 = arith.index_cast %c4_i32 : i32 to index
    %c0_44 = arith.constant 0 : index
    %c0_45 = arith.constant 0 : index
    %183 = vector.load %arg6[%182, %c0_44, %c0_45] : memref<8x8x128xf32, #tpu.memory_space<vmem>>, vector<1x8x128xf32>
    %184 = vector.shape_cast %183 : vector<1x8x128xf32> to vector<8x128xf32>
    %185 = vector.shape_cast %181 : vector<8x128xf32> to vector<1x8x128xf32>
    tpu.vector_store %arg6[%182, %c0_44, %c0_45], %185 {strides = array<i32>} : memref<8x8x128xf32, #tpu.memory_space<vmem>>, vector<1x8x128xf32>,
    %c5_i32 = arith.constant 5 : i32
    %186 = arith.index_cast %c5_i32 : i32 to index
    %c0_46 = arith.constant 0 : index
    %c0_47 = arith.constant 0 : index
    %187 = vector.load %arg2[%186, %c0_46, %c0_47] : memref<8x8x512xbf16, #tpu.memory_space<vmem>>, vector<1x8x512xbf16>
    %188 = vector.shape_cast %187 : vector<1x8x512xbf16> to vector<8x512xbf16>
    %189 = arith.extf %188 : vector<8x512xbf16> to vector<8x512xf32>
    %190 = arith.truncf %181 : vector<8x128xf32> to vector<8x128xbf16>
    %cst_48 = arith.constant dense<0.000000e+00> : vector<8x512xf32>
    %191 = tpu.matmul %190, %3, %cst_48 {dimension_numbers = #tpu.dot_dimension_numbers<[1], [0], [0], [1], [0, 0, 1, 1], [], []>} : vector<8x128xbf16>, vector<128x512xbf16>, vector<8x512xf32> -> vector<8x512xf32>
    %192 = arith.addf %189, %191 : vector<8x512xf32>
    %193 = vector.extract_strided_slice %192 {offsets = [0, 0], sizes = [8, 128], strides = [1, 1]} : vector<8x512xf32> to vector<8x128xf32>
    %194 = arith.negf %193 : vector<8x128xf32>
    %195 = math.exp %194 : vector<8x128xf32>
    %cst_49 = arith.constant 1.000000e+00 : f32
    %196 = vector.broadcast %cst_49 : f32 to vector<8x128xf32>
    %197 = arith.addf %196, %195 : vector<8x128xf32>
    %198 = arith.divf %196, %197 : vector<8x128xf32>
    %199 = vector.extract_strided_slice %192 {offsets = [0, 128], sizes = [8, 128], strides = [1, 1]} : vector<8x512xf32> to vector<8x128xf32>
    %200 = arith.negf %199 : vector<8x128xf32>
    %201 = math.exp %200 : vector<8x128xf32>
    %cst_50 = arith.constant 1.000000e+00 : f32
    %202 = vector.broadcast %cst_50 : f32 to vector<8x128xf32>
    %203 = arith.addf %202, %201 : vector<8x128xf32>
    %204 = arith.divf %202, %203 : vector<8x128xf32>
    %205 = vector.extract_strided_slice %192 {offsets = [0, 256], sizes = [8, 128], strides = [1, 1]} : vector<8x512xf32> to vector<8x128xf32>
    %206 = math.tanh %205 : vector<8x128xf32>
    %207 = vector.extract_strided_slice %192 {offsets = [0, 384], sizes = [8, 128], strides = [1, 1]} : vector<8x512xf32> to vector<8x128xf32>
    %208 = arith.negf %207 : vector<8x128xf32>
    %209 = math.exp %208 : vector<8x128xf32>
    %cst_51 = arith.constant 1.000000e+00 : f32
    %210 = vector.broadcast %cst_51 : f32 to vector<8x128xf32>
    %211 = arith.addf %210, %209 : vector<8x128xf32>
    %212 = arith.divf %210, %211 : vector<8x128xf32>
    %213 = arith.mulf %204, %179 : vector<8x128xf32>
    %214 = arith.mulf %198, %206 : vector<8x128xf32>
    %215 = arith.addf %213, %214 : vector<8x128xf32>
    %216 = math.tanh %215 : vector<8x128xf32>
    %217 = arith.mulf %212, %216 : vector<8x128xf32>
    %218 = arith.index_cast %c5_i32 : i32 to index
    %c0_52 = arith.constant 0 : index
    %c0_53 = arith.constant 0 : index
    %219 = vector.load %arg6[%218, %c0_52, %c0_53] : memref<8x8x128xf32, #tpu.memory_space<vmem>>, vector<1x8x128xf32>
    %220 = vector.shape_cast %219 : vector<1x8x128xf32> to vector<8x128xf32>
    %221 = vector.shape_cast %217 : vector<8x128xf32> to vector<1x8x128xf32>
    tpu.vector_store %arg6[%218, %c0_52, %c0_53], %221 {strides = array<i32>} : memref<8x8x128xf32, #tpu.memory_space<vmem>>, vector<1x8x128xf32>,
    %c6_i32 = arith.constant 6 : i32
    %222 = arith.index_cast %c6_i32 : i32 to index
    %c0_54 = arith.constant 0 : index
    %c0_55 = arith.constant 0 : index
    %223 = vector.load %arg2[%222, %c0_54, %c0_55] : memref<8x8x512xbf16, #tpu.memory_space<vmem>>, vector<1x8x512xbf16>
    %224 = vector.shape_cast %223 : vector<1x8x512xbf16> to vector<8x512xbf16>
    %225 = arith.extf %224 : vector<8x512xbf16> to vector<8x512xf32>
    %226 = arith.truncf %217 : vector<8x128xf32> to vector<8x128xbf16>
    %cst_56 = arith.constant dense<0.000000e+00> : vector<8x512xf32>
    %227 = tpu.matmul %226, %3, %cst_56 {dimension_numbers = #tpu.dot_dimension_numbers<[1], [0], [0], [1], [0, 0, 1, 1], [], []>} : vector<8x128xbf16>, vector<128x512xbf16>, vector<8x512xf32> -> vector<8x512xf32>
    %228 = arith.addf %225, %227 : vector<8x512xf32>
    %229 = vector.extract_strided_slice %228 {offsets = [0, 0], sizes = [8, 128], strides = [1, 1]} : vector<8x512xf32> to vector<8x128xf32>
    %230 = arith.negf %229 : vector<8x128xf32>
    %231 = math.exp %230 : vector<8x128xf32>
    %cst_57 = arith.constant 1.000000e+00 : f32
    %232 = vector.broadcast %cst_57 : f32 to vector<8x128xf32>
    %233 = arith.addf %232, %231 : vector<8x128xf32>
    %234 = arith.divf %232, %233 : vector<8x128xf32>
    %235 = vector.extract_strided_slice %228 {offsets = [0, 128], sizes = [8, 128], strides = [1, 1]} : vector<8x512xf32> to vector<8x128xf32>
    %236 = arith.negf %235 : vector<8x128xf32>
    %237 = math.exp %236 : vector<8x128xf32>
    %cst_58 = arith.constant 1.000000e+00 : f32
    %238 = vector.broadcast %cst_58 : f32 to vector<8x128xf32>
    %239 = arith.addf %238, %237 : vector<8x128xf32>
    %240 = arith.divf %238, %239 : vector<8x128xf32>
    %241 = vector.extract_strided_slice %228 {offsets = [0, 256], sizes = [8, 128], strides = [1, 1]} : vector<8x512xf32> to vector<8x128xf32>
    %242 = math.tanh %241 : vector<8x128xf32>
    %243 = vector.extract_strided_slice %228 {offsets = [0, 384], sizes = [8, 128], strides = [1, 1]} : vector<8x512xf32> to vector<8x128xf32>
    %244 = arith.negf %243 : vector<8x128xf32>
    %245 = math.exp %244 : vector<8x128xf32>
    %cst_59 = arith.constant 1.000000e+00 : f32
    %246 = vector.broadcast %cst_59 : f32 to vector<8x128xf32>
    %247 = arith.addf %246, %245 : vector<8x128xf32>
    %248 = arith.divf %246, %247 : vector<8x128xf32>
    %249 = arith.mulf %240, %215 : vector<8x128xf32>
    %250 = arith.mulf %234, %242 : vector<8x128xf32>
    %251 = arith.addf %249, %250 : vector<8x128xf32>
    %252 = math.tanh %251 : vector<8x128xf32>
    %253 = arith.mulf %248, %252 : vector<8x128xf32>
    %254 = arith.index_cast %c6_i32 : i32 to index
    %c0_60 = arith.constant 0 : index
    %c0_61 = arith.constant 0 : index
    %255 = vector.load %arg6[%254, %c0_60, %c0_61] : memref<8x8x128xf32, #tpu.memory_space<vmem>>, vector<1x8x128xf32>
    %256 = vector.shape_cast %255 : vector<1x8x128xf32> to vector<8x128xf32>
    %257 = vector.shape_cast %253 : vector<8x128xf32> to vector<1x8x128xf32>
    tpu.vector_store %arg6[%254, %c0_60, %c0_61], %257 {strides = array<i32>} : memref<8x8x128xf32, #tpu.memory_space<vmem>>, vector<1x8x128xf32>,
    %c7_i32 = arith.constant 7 : i32
    %258 = arith.index_cast %c7_i32 : i32 to index
    %c0_62 = arith.constant 0 : index
    %c0_63 = arith.constant 0 : index
    %259 = vector.load %arg2[%258, %c0_62, %c0_63] : memref<8x8x512xbf16, #tpu.memory_space<vmem>>, vector<1x8x512xbf16>
    %260 = vector.shape_cast %259 : vector<1x8x512xbf16> to vector<8x512xbf16>
    %261 = arith.extf %260 : vector<8x512xbf16> to vector<8x512xf32>
    %262 = arith.truncf %253 : vector<8x128xf32> to vector<8x128xbf16>
    %cst_64 = arith.constant dense<0.000000e+00> : vector<8x512xf32>
    %263 = tpu.matmul %262, %3, %cst_64 {dimension_numbers = #tpu.dot_dimension_numbers<[1], [0], [0], [1], [0, 0, 1, 1], [], []>} : vector<8x128xbf16>, vector<128x512xbf16>, vector<8x512xf32> -> vector<8x512xf32>
    %264 = arith.addf %261, %263 : vector<8x512xf32>
    %265 = vector.extract_strided_slice %264 {offsets = [0, 0], sizes = [8, 128], strides = [1, 1]} : vector<8x512xf32> to vector<8x128xf32>
    %266 = arith.negf %265 : vector<8x128xf32>
    %267 = math.exp %266 : vector<8x128xf32>
    %cst_65 = arith.constant 1.000000e+00 : f32
    %268 = vector.broadcast %cst_65 : f32 to vector<8x128xf32>
    %269 = arith.addf %268, %267 : vector<8x128xf32>
    %270 = arith.divf %268, %269 : vector<8x128xf32>
    %271 = vector.extract_strided_slice %264 {offsets = [0, 128], sizes = [8, 128], strides = [1, 1]} : vector<8x512xf32> to vector<8x128xf32>
    %272 = arith.negf %271 : vector<8x128xf32>
    %273 = math.exp %272 : vector<8x128xf32>
    %cst_66 = arith.constant 1.000000e+00 : f32
    %274 = vector.broadcast %cst_66 : f32 to vector<8x128xf32>
    %275 = arith.addf %274, %273 : vector<8x128xf32>
    %276 = arith.divf %274, %275 : vector<8x128xf32>
    %277 = vector.extract_strided_slice %264 {offsets = [0, 256], sizes = [8, 128], strides = [1, 1]} : vector<8x512xf32> to vector<8x128xf32>
    %278 = math.tanh %277 : vector<8x128xf32>
    %279 = vector.extract_strided_slice %264 {offsets = [0, 384], sizes = [8, 128], strides = [1, 1]} : vector<8x512xf32> to vector<8x128xf32>
    %280 = arith.negf %279 : vector<8x128xf32>
    %281 = math.exp %280 : vector<8x128xf32>
    %cst_67 = arith.constant 1.000000e+00 : f32
    %282 = vector.broadcast %cst_67 : f32 to vector<8x128xf32>
    %283 = arith.addf %282, %281 : vector<8x128xf32>
    %284 = arith.divf %282, %283 : vector<8x128xf32>
    %285 = arith.mulf %276, %251 : vector<8x128xf32>
    %286 = arith.mulf %270, %278 : vector<8x128xf32>
    %287 = arith.addf %285, %286 : vector<8x128xf32>
    %288 = math.tanh %287 : vector<8x128xf32>
    %289 = arith.mulf %284, %288 : vector<8x128xf32>
    %290 = arith.index_cast %c7_i32 : i32 to index
    %c0_68 = arith.constant 0 : index
    %c0_69 = arith.constant 0 : index
    %291 = vector.load %arg6[%290, %c0_68, %c0_69] : memref<8x8x128xf32, #tpu.memory_space<vmem>>, vector<1x8x128xf32>
    %292 = vector.shape_cast %291 : vector<1x8x128xf32> to vector<8x128xf32>
    %293 = vector.shape_cast %289 : vector<8x128xf32> to vector<1x8x128xf32>
    tpu.vector_store %arg6[%290, %c0_68, %c0_69], %293 {strides = array<i32>} : memref<8x8x128xf32, #tpu.memory_space<vmem>>, vector<1x8x128xf32>,
    %c8_i32 = arith.constant 8 : i32
    %c0_70 = arith.constant 0 : index
    %c0_71 = arith.constant 0 : index
    %294 = vector.load %arg9[%c0_70, %c0_71] : memref<8x128xf32, #tpu.memory_space<vmem>>, vector<8x128xf32>
    tpu.vector_store %arg9[%c0_70, %c0_71], %289 {strides = array<i32>} : memref<8x128xf32, #tpu.memory_space<vmem>>, vector<8x128xf32>,
    %c0_72 = arith.constant 0 : index
    %c0_73 = arith.constant 0 : index
    %295 = vector.load %arg10[%c0_72, %c0_73] : memref<8x128xf32, #tpu.memory_space<vmem>>, vector<8x128xf32>
    tpu.vector_store %arg10[%c0_72, %c0_73], %287 {strides = array<i32>} : memref<8x128xf32, #tpu.memory_space<vmem>>, vector<8x128xf32>,
    %c0_i32_74 = arith.constant 0 : i32
    %296 = arith.cmpi eq, %arg1, %c0_i32_74 : i32
    %297 = arith.extui %296 : i1 to i32
    %c0_i32_75 = arith.constant 0 : i32
    %298 = arith.cmpi ne, %297, %c0_i32_75 : i32
    scf.if %298 {
      %c0_76 = arith.constant 0 : index
      %c0_77 = arith.constant 0 : index
      %299 = vector.load %arg9[%c0_76, %c0_77] : memref<8x128xf32, #tpu.memory_space<vmem>>, vector<8x128xf32>
      %c0_78 = arith.constant 0 : index
      %c0_79 = arith.constant 0 : index
      %c0_80 = arith.constant 0 : index
      %300 = vector.load %arg7[%c0_78, %c0_79, %c0_80] : memref<1x8x128xf32, #tpu.memory_space<vmem>>, vector<1x8x128xf32>
      %301 = vector.shape_cast %300 : vector<1x8x128xf32> to vector<8x128xf32>
      %302 = vector.shape_cast %299 : vector<8x128xf32> to vector<1x8x128xf32>
      tpu.vector_store %arg7[%c0_78, %c0_79, %c0_80], %302 {strides = array<i32>} : memref<1x8x128xf32, #tpu.memory_space<vmem>>, vector<1x8x128xf32>,
      %c0_81 = arith.constant 0 : index
      %c0_82 = arith.constant 0 : index
      %303 = vector.load %arg10[%c0_81, %c0_82] : memref<8x128xf32, #tpu.memory_space<vmem>>, vector<8x128xf32>
      %c0_83 = arith.constant 0 : index
      %c0_84 = arith.constant 0 : index
      %c0_85 = arith.constant 0 : index
      %304 = vector.load %arg8[%c0_83, %c0_84, %c0_85] : memref<1x8x128xf32, #tpu.memory_space<vmem>>, vector<1x8x128xf32>
      %305 = vector.shape_cast %304 : vector<1x8x128xf32> to vector<8x128xf32>
      %306 = vector.shape_cast %303 : vector<8x128xf32> to vector<1x8x128xf32>
      tpu.vector_store %arg8[%c0_83, %c0_84, %c0_85], %306 {strides = array<i32>} : memref<1x8x128xf32, #tpu.memory_space<vmem>>, vector<1x8x128xf32>,
    } else {
    }
    return
  }
  func.func @transform_0(%arg0: i32, %arg1: i32) -> (i32, i32, i32) {
    %c0_i32 = arith.constant 0 : i32
    %c0_i32_0 = arith.constant 0 : i32
    return %arg1, %arg0, %c0_i32 : i32, i32, i32
  }
  func.func @transform_1(%arg0: i32, %arg1: i32) -> (i32, i32, i32) {
    %c0_i32 = arith.constant 0 : i32
    %c0_i32_0 = arith.constant 0 : i32
    %c0_i32_1 = arith.constant 0 : i32
    return %c0_i32, %arg0, %c0_i32_0 : i32, i32, i32
  }
  func.func @transform_2(%arg0: i32, %arg1: i32) -> (i32, i32, i32) {
    %c0_i32 = arith.constant 0 : i32
    %c0_i32_0 = arith.constant 0 : i32
    %c0_i32_1 = arith.constant 0 : i32
    return %c0_i32, %arg0, %c0_i32_0 : i32, i32, i32
  }
  func.func @transform_3(%arg0: i32, %arg1: i32) -> (i32, i32) {
    %c0_i32 = arith.constant 0 : i32
    %c0_i32_0 = arith.constant 0 : i32
    %c0_i32_1 = arith.constant 0 : i32
    return %c0_i32, %c0_i32_0 : i32, i32
  }
  func.func @transform_4(%arg0: i32, %arg1: i32) -> (i32, i32, i32) {
    %c0_i32 = arith.constant 0 : i32
    %c0_i32_0 = arith.constant 0 : i32
    return %arg1, %arg0, %c0_i32 : i32, i32, i32
  }
  func.func @transform_5(%arg0: i32, %arg1: i32) -> (i32, i32, i32) {
    %c0_i32 = arith.constant 0 : i32
    %c0_i32_0 = arith.constant 0 : i32
    %c0_i32_1 = arith.constant 0 : i32
    return %c0_i32, %arg0, %c0_i32_0 : i32, i32, i32
  }
  func.func @transform_6(%arg0: i32, %arg1: i32) -> (i32, i32, i32) {
    %c0_i32 = arith.constant 0 : i32
    %c0_i32_0 = arith.constant 0 : i32
    %c0_i32_1 = arith.constant 0 : i32
    return %c0_i32, %arg0, %c0_i32_0 : i32, i32, i32
  }
}

</mosaic_0001>

<bundles_post_ra>
// kernel: tpu_custom_call.1
= control target key start
LH: loop header
LB: loop body
LE: loop exit
PB: predicated region body
PF: predicated region fallthrough
CT: control target
= control target key end

     0   :  { %12 = vsyncpa [#allocation5], 0  ;;  %s2222_s0 = inlined_call_operand.hbm [shape: bf16[8,8,512], index: 0, kind: input, shape index: {}]   ;;  %s2223_s1 = inlined_call_operand.hbm [shape: f32[1,8,128], index: 1, kind: input, shape index: {}]   ;;  %s2224_s2 = inlined_call_operand.hbm [shape: f32[1,8,128], index: 2, kind: input, shape index: {}]   ;;  %s2225_s3 = inlined_call_operand.hbm [shape: bf16[128,512], index: 3, kind: input, shape index: {}]   ;;  %s2226_s4 = inlined_call_operand.hbm [shape: f32[8,8,128], index: 4, kind: output, shape index: {0}]   ;;  %s2227_s5 = inlined_call_operand.hbm [shape: f32[1,8,128], index: 5, kind: output, shape index: {1}]   ;;  %s2228_s6 = inlined_call_operand.hbm [shape: f32[1,8,128], index: 6, kind: output, shape index: {2}]  }
   0x1   :  { %13 = vsyncpa [#allocation8], 0 }
   0x2   :  { %14 = vsyncpa [#allocation11], 0 }
   0x3   :  { %15 = vsyncpa [#allocation6], 0 }
   0x4   :  { %16 = vsyncpa [#allocation14], 0  ;;  %s1729_s21 = smov [#allocation7]   ;;  %s1730_s23 = smov [#allocation4]  }
   0x5   :  { %s35_s22 = sshll.u32 %s1729_s21, 4  ;;  %s22_s24 = sshll.u32 %s1730_s23, 4  ;;  %s36_s22 = int_to_ptr.vmem [resolvable:$true] %s35_s22  ;;  %s1776_s24 = int_to_ptr.vmem [resolvable:$true] %s22_s24 }
   0x6   :  { %s1565_s27 = scalar_lea.hbm %s2223_s1, 128 }
   0x7   :  { %p1566_p0 = scmp.ne.s32.totalorder %s2223_s1, %s1565_s27  ;;  %p1569_p1 = scmp.lt.u32.totalorder %s1565_s27, %s2223_s1 }
   0x9   :  { %p1571_p2 = pnand %p1569_p1, %p1566_p0 }
   0xb   :  { %1574 = shalt.err (!%p1571_p2)
}
   0xc   :  { %s1575_s8 = scalar_lea.vmem %s36_s22, 128  ;;  %p1580_p4 = scmp.lt.s32.totalorder %s36_s22, %s36_s22 }
   0xd   :  { %p1576_p3 = scmp.ne.s32.totalorder %s36_s22, %s1575_s8  ;;  %p1581_p5 = scmp.lt.s32.totalorder %s1575_s8, %s1575_s8 }
   0xf   :  { %p1582_p6 = por %p1581_p5, %p1580_p4 }
  0x11   :  { %p1583_p7 = pnand %p1582_p6, %p1576_p3 }
  0x13   :  { %1586 = shalt.err (!%p1583_p7)
}
  0x14   :  { %38 = dma.hbm_to_vmem [thread:$0]  %s2223_s1, 128, %s36_s22, [#allocation8]  }
  0x15   :  { %s1587_s13 = scalar_lea.hbm %s2222_s0, 2048 }
  0x16   :  { %p1588_p8 = scmp.ne.s32.totalorder %s2222_s0, %s1587_s13  ;;  %p1591_p9 = scmp.lt.u32.totalorder %s1587_s13, %s2222_s0 }
  0x18   :  { %p1593_p10 = pnand %p1591_p9, %p1588_p8 }
  0x1a   :  { %1596 = shalt.err (!%p1593_p10)
}
  0x1b   :  { %s1597_s18 = scalar_lea.vmem %s1776_s24, 2048  ;;  %p1602_p12 = scmp.lt.s32.totalorder %s1776_s24, %s1776_s24 }
  0x1c   :  { %p1598_p11 = scmp.ne.s32.totalorder %s1776_s24, %s1597_s18  ;;  %p1603_p13 = scmp.lt.s32.totalorder %s1597_s18, %s1597_s18 }
  0x1e   :  { %p1604_p0 = por %p1603_p13, %p1602_p12 }
  0x20   :  { %p1605_p1 = pnand %p1604_p0, %p1598_p11 }
  0x22   :  { %1608 = shalt.err (!%p1605_p1)
}
  0x23   :  { %s1731_s1 = smov 256   ;;  %s1732_s19 = smov 16  }
  0x24   :  { %28 = dma.hbm_to_vmem [thread:$0]  %s2222_s0, 2048, %s1776_s24, [#allocation5], %s1731_s1, %s1731_s1, %s1732_s19  }
  0x25   :  { %s1733_s22 = smov [#allocation9]   ;;  %s1734_s25 = smov [#allocation10]  }
  0x26   :  { %s45_s23 = sshll.u32 %s1733_s22, 4  ;;  %s54_s26 = sshll.u32 %s1734_s25, 4  ;;  %s46_s23 = int_to_ptr.vmem [resolvable:$true] %s45_s23  ;;  %s1810_s26 = int_to_ptr.vmem [resolvable:$true] %s54_s26 }
  0x27   :  { %s1609_s29 = scalar_lea.hbm %s2224_s2, 128 }
  0x28   :  { %p1610_p2 = scmp.ne.s32.totalorder %s2224_s2, %s1609_s29  ;;  %p1613_p3 = scmp.lt.u32.totalorder %s1609_s29, %s2224_s2 }
  0x2a   :  { %p1615_p4 = pnand %p1613_p3, %p1610_p2 }
  0x2c   :  { %1618 = shalt.err (!%p1615_p4)
}
  0x2d   :  { %s1619_s0 = scalar_lea.vmem %s46_s23, 128  ;;  %p1624_p6 = scmp.lt.s32.totalorder %s46_s23, %s46_s23 }
  0x2e   :  { %p1620_p5 = scmp.ne.s32.totalorder %s46_s23, %s1619_s0  ;;  %p1625_p7 = scmp.lt.s32.totalorder %s1619_s0, %s1619_s0 }
  0x30   :  { %p1626_p8 = por %p1625_p7, %p1624_p6 }
  0x32   :  { %p1627_p9 = pnand %p1626_p8, %p1620_p5 }
  0x34   :  { %1630 = shalt.err (!%p1627_p9)
}
  0x35   :  { %48 = dma.hbm_to_vmem [thread:$0]  %s2224_s2, 128, %s46_s23, [#allocation8]  }
  0x36   :  { %s1631_s13 = scalar_lea.hbm %s2225_s3, 4096 }
  0x37   :  { %p1632_p10 = scmp.ne.s32.totalorder %s2225_s3, %s1631_s13  ;;  %p1635_p11 = scmp.lt.u32.totalorder %s1631_s13, %s2225_s3 }
  0x39   :  { %p1637_p12 = pnand %p1635_p11, %p1632_p10 }
  0x3b   :  { %1640 = shalt.err (!%p1637_p12)
}
  0x3c   :  { %s1641_s18 = scalar_lea.vmem %s1810_s26, 4096  ;;  %p1646_p0 = scmp.lt.s32.totalorder %s1810_s26, %s1810_s26 }
  0x3d   :  { %p1642_p13 = scmp.ne.s32.totalorder %s1810_s26, %s1641_s18  ;;  %p1647_p1 = scmp.lt.s32.totalorder %s1641_s18, %s1641_s18 }
  0x3f   :  { %p1648_p2 = por %p1647_p1, %p1646_p0 }
  0x41   :  { %p1649_p3 = pnand %p1648_p2, %p1642_p13 }
  0x43   :  { %1652 = shalt.err (!%p1649_p3)
}
  0x44   :  { %60 = dma.hbm_to_vmem [thread:$0]  %s2225_s3, 4096, %s1810_s26, [#allocation11], %s1731_s1, %s1731_s1, %s1732_s19  }
  0x45   :  { %1719 = dma.done.wait [#allocation5], 2048  }
  0x46   :  { %1720 = vsyncadd [#allocation5], 4294965248 }
  0x47   :  { %1721 = dma.done.wait [#allocation8], 256  }
  0x48   :  { %1722 = vsyncadd [#allocation8], 4294967040 }
  0x49   :  { %1723 = dma.done.wait [#allocation11], 4096  }
  0x4a   :  { %1724 = vsyncadd [#allocation11], 4294963200  ;;  %v1735_v0 = vmov 0   ;;  %v1846_v1 = vld [vmem:[#allocation10 + $0x4] ss:$16 sps:$4 sm:$0xff]   ;;  %v117_v39 = vld [vmem:[#allocation4 + $0x8] sm:$0xff] }
  0x4b   :  { %315 = vmatprep.mubr.bf16.mxu0 %v1735_v0  ;;  %356 = vmatprep.mubr.bf16.mxu1 %v1735_v0  ;;  %v1848_v2 = vld [vmem:[#allocation10] ss:$16 sps:$4 sm:$0xff]   ;;  %v1851_v3 = vld [vmem:[#allocation10 + $0x24] ss:$16 sps:$4 sm:$0xff]   ;;  %v1859_v6 = vld [vmem:[#allocation10 + $0xc] ss:$16 sps:$4 sm:$0xff]   ;;  %v121_v46 = vunpack.c.h.bf16 %v117_v39  ;;  %v120_v52 = vunpack.c.l.bf16 %v117_v39 }
  0x4c   :  { %283 = vmatprep.subr.bf16.mxu0 %v1846_v1  ;;  %v1854_v4 = vld [vmem:[#allocation10 + $0x20] ss:$16 sps:$4 sm:$0xff]   ;;  %v1857_v5 = vld [vmem:[#allocation10 + $0x44] ss:$16 sps:$4 sm:$0xff]   ;;  %v1861_v7 = vld [vmem:[#allocation10 + $0x8] ss:$16 sps:$4 sm:$0xff]   ;;  %324 = vmatprep.subr.bf16.mxu1 %v1859_v6 }
  0x4d   :  { %284 = vmatpush1.bf16.msra.mxu0 %v1848_v2  ;;  %v1864_v8 = vld [vmem:[#allocation10 + $0x40] ss:$16 sps:$4 sm:$0xff]   ;;  %v1868_v9 = vld [vmem:[#allocation10 + $0x64] ss:$16 sps:$4 sm:$0xff]   ;;  %325 = vmatpush1.bf16.msra.mxu1 %v1861_v7  ;;  %v1871_v10 = vld [vmem:[#allocation10 + $0x2c] ss:$16 sps:$4 sm:$0xff]  }
  0x4e   :  { %285 = vmatprep.subr.bf16.mxu0 %v1851_v3  ;;  %v1873_v11 = vld [vmem:[#allocation10 + $0x28] ss:$16 sps:$4 sm:$0xff]   ;;  %326 = vmatprep.subr.bf16.mxu1 %v1871_v10  ;;  %v1877_v12 = vld [vmem:[#allocation10 + $0x60] ss:$16 sps:$4 sm:$0xff]   ;;  %v1879_v13 = vld [vmem:[#allocation10 + $0x84] ss:$16 sps:$4 sm:$0xff]  }
  0x4f   :  { %v1881_v14 = vld [vmem:[#allocation10 + $0x4c] ss:$16 sps:$4 sm:$0xff]   ;;  %v1885_v15 = vld [vmem:[#allocation10 + $0x48] ss:$16 sps:$4 sm:$0xff]   ;;  %v1891_v17 = vld [vmem:[#allocation10 + $0x80] ss:$16 sps:$4 sm:$0xff]  }
  0x50   :  { %v1888_v16 = vld [vmem:[#allocation10 + $0x6c] ss:$16 sps:$4 sm:$0xff]   ;;  %v1894_v18 = vld [vmem:[#allocation10 + $0xa4] ss:$16 sps:$4 sm:$0xff]   ;;  %v1897_v19 = vld [vmem:[#allocation10 + $0x68] ss:$16 sps:$4 sm:$0xff]  }
  0x51   :  { %286 = vmatpush1.bf16.msra.mxu0 %v1854_v4  ;;  %327 = vmatpush1.bf16.msra.mxu1 %v1873_v11  ;;  %v1900_v20 = vld [vmem:[#allocation10 + $0x8c] ss:$16 sps:$4 sm:$0xff]   ;;  %v1902_v21 = vld [vmem:[#allocation10 + $0xa0] ss:$16 sps:$4 sm:$0xff]   ;;  %v1905_v22 = vld [vmem:[#allocation10 + $0xc4] ss:$16 sps:$4 sm:$0xff]  }
  0x52   :  { %287 = vmatprep.subr.bf16.mxu0 %v1857_v5  ;;  %328 = vmatprep.subr.bf16.mxu1 %v1881_v14  ;;  %v1909_v23 = vld [vmem:[#allocation10 + $0x88] ss:$16 sps:$4 sm:$0xff]   ;;  %v1912_v24 = vld [vmem:[#allocation10 + $0xac] ss:$16 sps:$4 sm:$0xff]   ;;  %v1915_v25 = vld [vmem:[#allocation10 + $0xc0] ss:$16 sps:$4 sm:$0xff]  }
  0x53   :  { %v1918_v26 = vld [vmem:[#allocation10 + $0xe4] ss:$16 sps:$4 sm:$0xff]   ;;  %v1921_v27 = vld [vmem:[#allocation10 + $0xa8] ss:$16 sps:$4 sm:$0xff]   ;;  %v1924_v28 = vld [vmem:[#allocation10 + $0xcc] ss:$16 sps:$4 sm:$0xff]  }
  0x54   :  { %v1927_v29 = vld [vmem:[#allocation10 + $0xe0] ss:$16 sps:$4 sm:$0xff]   ;;  %v1931_v31 = vld [vmem:[#allocation10 + $0xc8] ss:$16 sps:$4 sm:$0xff]   ;;  %v1934_v32 = vld [vmem:[#allocation10 + $0xec] ss:$16 sps:$4 sm:$0xff]  }
  0x55   :  { %288 = vmatpush1.bf16.msra.mxu0 %v1864_v8  ;;  %329 = vmatpush1.bf16.msra.mxu1 %v1885_v15  ;;  %v78_v30 = vld [vmem:[#allocation7] sm:$0xff]  ;;  %v1938_v34 = vld [vmem:[#allocation10 + $0xe8] ss:$16 sps:$4 sm:$0xff]   ;;  %s1736_s3 = smov [#allocation13]   ;;  %s1737_s19 = smov [#allocation12]  }
  0x56   :  { %289 = vmatprep.subr.bf16.mxu0 %v1868_v9  ;;  %330 = vmatprep.subr.bf16.mxu1 %v1888_v16  ;;  %v122_v33 = vpack.c.bf16 %v78_v30, %v78_v30  ;;  %v116_v35 = vld [vmem:[#allocation4] sm:$0xff]  ;;  %v80_v62 = vld [vmem:[#allocation9] sm:$0xff]  ;;  %s1261_s1 = sshll.u32 %s1736_s3, 4  ;;  %s1248_s21 = sshll.u32 %s1737_s19, 4  ;;  %s1262_s1 = int_to_ptr.vmem [resolvable:$true] %s1261_s1  ;;  %s2172_s21 = int_to_ptr.vmem [resolvable:$true] %s1248_s21 }
  0x57   :  { %v118_v36 = vunpack.c.l.bf16 %v116_v35  ;;  %v119_v37 = vunpack.c.h.bf16 %v116_v35  ;;  %s1738_s22 = smov [#allocation15]   ;;  %s1653_s25 = scalar_lea.vmem %s1262_s1, 128 }
  0x58   :  { %s1271_s23 = sshll.u32 %s1738_s22, 4  ;;  %p1654_p4 = scmp.ne.s32.totalorder %s1262_s1, %s1653_s25  ;;  %s2174_s23 = int_to_ptr.vmem [resolvable:$true] %s1271_s23 }
  0x59   :  { %290 = vmatpush1.bf16.msra.mxu0 %v1877_v12  ;;  %331 = vmatpush1.bf16.msra.mxu1 %v1897_v19  ;;  %p1658_p5 = scmp.lt.s32.totalorder %s1262_s1, %s1262_s1  ;;  %p1659_p6 = scmp.lt.s32.totalorder %s1653_s25, %s1653_s25 }
  0x5a   :  { %291 = vmatprep.subr.bf16.mxu0 %v1879_v13  ;;  %332 = vmatprep.subr.bf16.mxu1 %v1900_v20 }
  0x5b   :  { %p1660_p7 = por %p1659_p6, %p1658_p5 }
  0x5d   :  { %292 = vmatpush1.bf16.msra.mxu0 %v1891_v17  ;;  %333 = vmatpush1.bf16.msra.mxu1 %v1909_v23  ;;  %p1661_p8 = pnand %p1660_p7, %p1654_p4 }
  0x5e   :  { %293 = vmatprep.subr.bf16.mxu0 %v1894_v18  ;;  %334 = vmatprep.subr.bf16.mxu1 %v1912_v24 }
  0x61   :  { %294 = vmatpush1.bf16.msra.mxu0 %v1902_v21  ;;  %335 = vmatpush1.bf16.msra.mxu1 %v1921_v27 }
  0x62   :  { %295 = vmatprep.subr.bf16.mxu0 %v1905_v22  ;;  %336 = vmatprep.subr.bf16.mxu1 %v1924_v28 }
  0x65   :  { %296 = vmatpush1.bf16.msra.mxu0 %v1915_v25  ;;  %337 = vmatpush1.bf16.msra.mxu1 %v1931_v31 }
  0x66   :  { %297 = vmatprep.subr.bf16.mxu0 %v1918_v26  ;;  %338 = vmatprep.subr.bf16.mxu1 %v1934_v32 }
  0x69   :  { %298 = vmatpush1.bf16.msra.mxu0 %v1927_v29  ;;  %339 = vmatpush1.bf16.msra.mxu1 %v1938_v34 }
  0x6a   :  { %402 = vmatprep.subr.bf16.mxu0 %v1846_v1  ;;  %443 = vmatprep.subr.bf16.mxu1 %v1859_v6 }
  0x6c   :  { %316 = vmatmul.mubr.bf16.vlgmr.msra.gmra.mrb[0].mxu0 %v122_v33  ;;  %357 = vmatmul.mubr.bf16.vlgmr.msra.gmra.mrb[0].mxu1 %v122_v33 }
  0x6d   :  { %403 = vmatpush1.bf16.msra.mxu0 %v1848_v2  ;;  %434 = vmatprep.mubr.bf16.mxu0 %v1735_v0 }
  0x6e   :  { %404 = vmatprep.subr.bf16.mxu0 %v1851_v3  ;;  %444 = vmatpush1.bf16.msra.mxu1 %v1861_v7 }
  0x6f   :  { %445 = vmatprep.subr.bf16.mxu1 %v1871_v10  ;;  %475 = vmatprep.mubr.bf16.mxu1 %v1735_v0 }
  0x71   :  { %405 = vmatpush1.bf16.msra.mxu0 %v1854_v4 }
  0x72   :  { %406 = vmatprep.subr.bf16.mxu0 %v1857_v5  ;;  %446 = vmatpush1.bf16.msra.mxu1 %v1873_v11 }
  0x73   :  { %447 = vmatprep.subr.bf16.mxu1 %v1881_v14 }
  0x75   :  { %407 = vmatpush1.bf16.msra.mxu0 %v1864_v8 }
  0x76   :  { %408 = vmatprep.subr.bf16.mxu0 %v1868_v9  ;;  %448 = vmatpush1.bf16.msra.mxu1 %v1885_v15 }
  0x77   :  { %449 = vmatprep.subr.bf16.mxu1 %v1888_v16 }
  0x79   :  { %409 = vmatpush1.bf16.msra.mxu0 %v1877_v12 }
  0x7a   :  { %410 = vmatprep.subr.bf16.mxu0 %v1879_v13  ;;  %450 = vmatpush1.bf16.msra.mxu1 %v1897_v19 }
  0x7b   :  { %451 = vmatprep.subr.bf16.mxu1 %v1900_v20 }
  0x7d   :  { %411 = vmatpush1.bf16.msra.mxu0 %v1891_v17 }
  0x7e   :  { %412 = vmatprep.subr.bf16.mxu0 %v1894_v18  ;;  %452 = vmatpush1.bf16.msra.mxu1 %v1909_v23 }
  0x7f   :  { %453 = vmatprep.subr.bf16.mxu1 %v1912_v24 }
  0x81   :  { %413 = vmatpush1.bf16.msra.mxu0 %v1902_v21 }
  0x82   :  { %414 = vmatprep.subr.bf16.mxu0 %v1905_v22  ;;  %454 = vmatpush1.bf16.msra.mxu1 %v1921_v27 }
  0x83   :  { %455 = vmatprep.subr.bf16.mxu1 %v1924_v28 }
  0x85   :  { %415 = vmatpush1.bf16.msra.mxu0 %v1915_v25 }
  0x86   :  { %416 = vmatprep.subr.bf16.mxu0 %v1918_v26  ;;  %456 = vmatpush1.bf16.msra.mxu1 %v1931_v31 }
  0x87   :  { %457 = vmatprep.subr.bf16.mxu1 %v1934_v32 }
  0x89   :  { %417 = vmatpush1.bf16.msra.mxu0 %v1927_v29 }
  0x8a   :  { %522 = vmatprep.subr.bf16.mxu0 %v1846_v1  ;;  %458 = vmatpush1.bf16.msra.mxu1 %v1938_v34 }
  0x8b   :  { %563 = vmatprep.subr.bf16.mxu1 %v1859_v6 }
 0x13f   :  { %v317_v38 = vpop.f32.mrb[0].mxu0  ;;  %v358_v48 = vpop.f32.mrb[0].mxu1 }
 0x140   :  { %v365_v40 = vadd.f32 %v317_v38, %v118_v36  ;;  %v319_v41 = vpop.f32.mrb[1].mxu0  ;;  %v360_v49 = vpop.f32.mrb[1].mxu1  ;;  %v367_v55 = vadd.f32 %v358_v48, %v120_v52  ;;  %v396_v48 = vld [vmem:[#allocation4 + $0x18] sm:$0xff] }
 0x141   :  { %v366_v42 = vadd.f32 %v319_v41, %v119_v37  ;;  %v321_v43 = vpop.f32.mrb[2].mxu0  ;;  %v368_v50 = vadd.f32 %v360_v49, %v121_v46  ;;  %v362_v51 = vpop.f32.mrb[2].mxu1 }
 0x142   :  { %v1321_v44 = vmul.f32 -1.442695, %v365_v40  ;;  %v322_v45 = vpop.f32.mrb[3].mxu0  ;;  %v363_v53 = vpop.f32.mrb[3].mxu1 }
 0x143   :  { %v1322_v47 = vmul.f32 -1.442695, %v366_v42  ;;  %v1323_v54 = vmul.f32 -1.442695, %v368_v50  ;;  %v395_v42 = vld [vmem:[#allocation4 + $0x10] sm:$0xff] }
 0x144   :  { %1405 = vpow2.f32 %v1321_v44  ;;  %v397_v43 = vunpack.c.l.bf16 %v395_v42  ;;  %v398_v44 = vunpack.c.h.bf16 %v395_v42 }
 0x145   :  { %1407 = vpow2.f32 %v1322_v47 }
 0x146   :  { %1409 = vpow2.f32 %v1323_v54 }
 0x147   :  { %1411 = vtanh.f32 %v367_v55 }
 0x14e   :  { %v1406_v56 = vpop.eup %1405 }
 0x14f   :  { %v1408_v57 = vpop.eup %1407  ;;  %v372_v58 = vadd.f32 1.0, %v1406_v56 }
 0x150   :  { %v378_v59 = vadd.f32 1.0, %v1408_v57  ;;  %v1410_v60 = vpop.eup %1409 }
 0x151   :  { %1413 = vrcp.f32 %v372_v58  ;;  %v1412_v61 = vpop.eup %1411  ;;  %v385_v30 = vadd.f32 1.0, %v1410_v60  ;;  %v400_v58 = vunpack.c.h.bf16 %v396_v48  ;;  %v399_v60 = vunpack.c.l.bf16 %v396_v48 }
 0x152   :  { %1415 = vrcp.f32 %v378_v59 }
 0x153   :  { %1417 = vrcp.f32 %v385_v30 }
 0x15b   :  { %v1414_v63 = vpop.eup %1413 }
 0x15c   :  { %v1416_v33 = vpop.eup %1415  ;;  %v389_v35 = vmul.f32 %v1414_v63, %v1412_v61 }
 0x15d   :  { %v388_v36 = vmul.f32 %v1416_v33, %v80_v62  ;;  %v1418_v38 = vpop.eup %1417 }
 0x15f   :  { %v1978_v37 = vadd.f32 %v389_v35, %v388_v36 }
 0x161   :  { %1419 = vtanh.f32 %v1978_v37 }
 0x16b   :  { %v1420_v39 = vpop.eup %1419 }
 0x16c   :  { %v392_v40 = vmul.f32 %v1420_v39, %v1418_v38 }
 0x16e   :  { %393 = vst [vmem:[#allocation12] sm:$0xff] %v392_v40  ;;  %v401_v41 = vpack.c.bf16 %v392_v40, %v392_v40 }
 0x170   :  { %435 = vmatmul.mubr.bf16.vlgmr.msra.gmra.mrb[4].mxu0 %v401_v41  ;;  %476 = vmatmul.mubr.bf16.vlgmr.msra.gmra.mrb[4].mxu1 %v401_v41 }
 0x171   :  { %523 = vmatpush1.bf16.msra.mxu0 %v1848_v2  ;;  %564 = vmatpush1.bf16.msra.mxu1 %v1861_v7 }
 0x172   :  { %524 = vmatprep.subr.bf16.mxu0 %v1851_v3  ;;  %565 = vmatprep.subr.bf16.mxu1 %v1871_v10 }
 0x173   :  { %554 = vmatprep.mubr.bf16.mxu0 %v1735_v0  ;;  %595 = vmatprep.mubr.bf16.mxu1 %v1735_v0 }
 0x175   :  { %525 = vmatpush1.bf16.msra.mxu0 %v1854_v4  ;;  %566 = vmatpush1.bf16.msra.mxu1 %v1873_v11 }
 0x176   :  { %526 = vmatprep.subr.bf16.mxu0 %v1857_v5  ;;  %567 = vmatprep.subr.bf16.mxu1 %v1881_v14 }
 0x179   :  { %527 = vmatpush1.bf16.msra.mxu0 %v1864_v8  ;;  %568 = vmatpush1.bf16.msra.mxu1 %v1885_v15 }
 0x17a   :  { %528 = vmatprep.subr.bf16.mxu0 %v1868_v9  ;;  %569 = vmatprep.subr.bf16.mxu1 %v1888_v16 }
 0x17d   :  { %529 = vmatpush1.bf16.msra.mxu0 %v1877_v12  ;;  %570 = vmatpush1.bf16.msra.mxu1 %v1897_v19 }
 0x17e   :  { %530 = vmatprep.subr.bf16.mxu0 %v1879_v13  ;;  %571 = vmatprep.subr.bf16.mxu1 %v1900_v20 }
 0x181   :  { %531 = vmatpush1.bf16.msra.mxu0 %v1891_v17  ;;  %572 = vmatpush1.bf16.msra.mxu1 %v1909_v23 }
 0x182   :  { %532 = vmatprep.subr.bf16.mxu0 %v1894_v18  ;;  %573 = vmatprep.subr.bf16.mxu1 %v1912_v24 }
 0x185   :  { %533 = vmatpush1.bf16.msra.mxu0 %v1902_v21  ;;  %574 = vmatpush1.bf16.msra.mxu1 %v1921_v27 }
 0x186   :  { %534 = vmatprep.subr.bf16.mxu0 %v1905_v22  ;;  %575 = vmatprep.subr.bf16.mxu1 %v1924_v28 }
 0x189   :  { %535 = vmatpush1.bf16.msra.mxu0 %v1915_v25  ;;  %576 = vmatpush1.bf16.msra.mxu1 %v1931_v31 }
 0x18a   :  { %536 = vmatprep.subr.bf16.mxu0 %v1918_v26  ;;  %577 = vmatprep.subr.bf16.mxu1 %v1934_v32 }
 0x18d   :  { %537 = vmatpush1.bf16.msra.mxu0 %v1927_v29  ;;  %578 = vmatpush1.bf16.msra.mxu1 %v1938_v34 }
 0x18e   :  { %642 = vmatprep.subr.bf16.mxu0 %v1846_v1  ;;  %683 = vmatprep.subr.bf16.mxu1 %v1859_v6 }
 0x243   :  { %v436_v45 = vpop.f32.mrb[4].mxu0  ;;  %v477_v46 = vpop.f32.mrb[4].mxu1 }
 0x244   :  { %v484_v47 = vadd.f32 %v436_v45, %v397_v43  ;;  %v438_v49 = vpop.f32.mrb[5].mxu0  ;;  %v479_v50 = vpop.f32.mrb[5].mxu1  ;;  %v486_v62 = vadd.f32 %v477_v46, %v399_v60 }
 0x245   :  { %v485_v51 = vadd.f32 %v438_v49, %v398_v44  ;;  %v440_v52 = vpop.f32.mrb[6].mxu0  ;;  %v481_v53 = vpop.f32.mrb[6].mxu1  ;;  %v487_v59 = vadd.f32 %v479_v50, %v400_v58 }
 0x246   :  { %v1324_v54 = vmul.f32 -1.442695, %v484_v47  ;;  %v441_v55 = vpop.f32.mrb[7].mxu0  ;;  %v482_v56 = vpop.f32.mrb[7].mxu1 }
 0x247   :  { %v1325_v57 = vmul.f32 -1.442695, %v485_v51  ;;  %v1326_v61 = vmul.f32 -1.442695, %v487_v59 }
 0x248   :  { %1421 = vpow2.f32 %v1324_v54  ;;  %v516_v54 = vld [vmem:[#allocation4 + $0x28] sm:$0xff] }
 0x249   :  { %1423 = vpow2.f32 %v1325_v57 }
 0x24a   :  { %1425 = vpow2.f32 %v1326_v61 }
 0x24b   :  { %1427 = vtanh.f32 %v486_v62 }
 0x252   :  { %v1422_v63 = vpop.eup %1421 }
 0x253   :  { %v1424_v30 = vpop.eup %1423  ;;  %v491_v33 = vadd.f32 1.0, %v1422_v63 }
 0x254   :  { %v497_v35 = vadd.f32 1.0, %v1424_v30  ;;  %v1426_v36 = vpop.eup %1425  ;;  %v520_v30 = vunpack.c.h.bf16 %v516_v54 }
 0x255   :  { %1429 = vrcp.f32 %v491_v33  ;;  %v1428_v38 = vpop.eup %1427  ;;  %v504_v42 = vadd.f32 1.0, %v1426_v36 }
 0x256   :  { %1431 = vrcp.f32 %v497_v35  ;;  %v519_v35 = vunpack.c.l.bf16 %v516_v54 }
 0x257   :  { %1433 = vrcp.f32 %v504_v42 }
 0x25f   :  { %v1430_v39 = vpop.eup %1429 }
 0x260   :  { %v1432_v40 = vpop.eup %1431  ;;  %v508_v41 = vmul.f32 %v1430_v39, %v1428_v38 }
 0x261   :  { %v507_v43 = vmul.f32 %v1432_v40, %v1978_v37  ;;  %v1434_v45 = vpop.eup %1433  ;;  %v515_v37 = vld [vmem:[#allocation4 + $0x20] sm:$0xff] }
 0x262   :  { %v517_v49 = vunpack.c.l.bf16 %v515_v37  ;;  %v518_v50 = vunpack.c.h.bf16 %v515_v37 }
 0x263   :  { %v2016_v44 = vadd.f32 %v508_v41, %v507_v43 }
 0x265   :  { %1435 = vtanh.f32 %v2016_v44 }
 0x26f   :  { %v1436_v46 = vpop.eup %1435 }
 0x270   :  { %v511_v47 = vmul.f32 %v1436_v46, %v1434_v45 }
 0x272   :  { %513 = vst [vmem:[#allocation12 + $0x8] sm:$0xff] %v511_v47  ;;  %v521_v48 = vpack.c.bf16 %v511_v47, %v511_v47 }
 0x274   :  { %555 = vmatmul.mubr.bf16.vlgmr.msra.gmra.mrb[8].mxu0 %v521_v48  ;;  %596 = vmatmul.mubr.bf16.vlgmr.msra.gmra.mrb[8].mxu1 %v521_v48 }
 0x275   :  { %643 = vmatpush1.bf16.msra.mxu0 %v1848_v2  ;;  %684 = vmatpush1.bf16.msra.mxu1 %v1861_v7 }
 0x276   :  { %644 = vmatprep.subr.bf16.mxu0 %v1851_v3  ;;  %685 = vmatprep.subr.bf16.mxu1 %v1871_v10 }
 0x277   :  { %674 = vmatprep.mubr.bf16.mxu0 %v1735_v0  ;;  %715 = vmatprep.mubr.bf16.mxu1 %v1735_v0 }
 0x279   :  { %645 = vmatpush1.bf16.msra.mxu0 %v1854_v4  ;;  %686 = vmatpush1.bf16.msra.mxu1 %v1873_v11 }
 0x27a   :  { %646 = vmatprep.subr.bf16.mxu0 %v1857_v5  ;;  %687 = vmatprep.subr.bf16.mxu1 %v1881_v14 }
 0x27d   :  { %647 = vmatpush1.bf16.msra.mxu0 %v1864_v8  ;;  %688 = vmatpush1.bf16.msra.mxu1 %v1885_v15 }
 0x27e   :  { %648 = vmatprep.subr.bf16.mxu0 %v1868_v9  ;;  %689 = vmatprep.subr.bf16.mxu1 %v1888_v16 }
 0x281   :  { %649 = vmatpush1.bf16.msra.mxu0 %v1877_v12  ;;  %690 = vmatpush1.bf16.msra.mxu1 %v1897_v19 }
 0x282   :  { %650 = vmatprep.subr.bf16.mxu0 %v1879_v13  ;;  %691 = vmatprep.subr.bf16.mxu1 %v1900_v20 }
 0x285   :  { %651 = vmatpush1.bf16.msra.mxu0 %v1891_v17  ;;  %692 = vmatpush1.bf16.msra.mxu1 %v1909_v23 }
 0x286   :  { %652 = vmatprep.subr.bf16.mxu0 %v1894_v18  ;;  %693 = vmatprep.subr.bf16.mxu1 %v1912_v24 }
 0x289   :  { %653 = vmatpush1.bf16.msra.mxu0 %v1902_v21  ;;  %694 = vmatpush1.bf16.msra.mxu1 %v1921_v27 }
 0x28a   :  { %654 = vmatprep.subr.bf16.mxu0 %v1905_v22  ;;  %695 = vmatprep.subr.bf16.mxu1 %v1924_v28 }
 0x28d   :  { %655 = vmatpush1.bf16.msra.mxu0 %v1915_v25  ;;  %696 = vmatpush1.bf16.msra.mxu1 %v1931_v31 }
 0x28e   :  { %656 = vmatprep.subr.bf16.mxu0 %v1918_v26  ;;  %697 = vmatprep.subr.bf16.mxu1 %v1934_v32 }
 0x291   :  { %657 = vmatpush1.bf16.msra.mxu0 %v1927_v29  ;;  %698 = vmatpush1.bf16.msra.mxu1 %v1938_v34 }
 0x292   :  { %762 = vmatprep.subr.bf16.mxu0 %v1846_v1  ;;  %803 = vmatprep.subr.bf16.mxu1 %v1859_v6 }
 0x347   :  { %v556_v51 = vpop.f32.mrb[8].mxu0  ;;  %v597_v52 = vpop.f32.mrb[8].mxu1 }
 0x348   :  { %v604_v53 = vadd.f32 %v556_v51, %v517_v49  ;;  %v558_v55 = vpop.f32.mrb[9].mxu0  ;;  %v599_v56 = vpop.f32.mrb[9].mxu1  ;;  %v606_v38 = vadd.f32 %v597_v52, %v519_v35 }
 0x349   :  { %v605_v57 = vadd.f32 %v558_v55, %v518_v50  ;;  %v560_v58 = vpop.f32.mrb[10].mxu0  ;;  %v601_v59 = vpop.f32.mrb[10].mxu1  ;;  %v607_v33 = vadd.f32 %v599_v56, %v520_v30 }
 0x34a   :  { %v1327_v60 = vmul.f32 -1.442695, %v604_v53  ;;  %v561_v61 = vpop.f32.mrb[11].mxu0  ;;  %v602_v62 = vpop.f32.mrb[11].mxu1 }
 0x34b   :  { %v1328_v63 = vmul.f32 -1.442695, %v605_v57  ;;  %v1329_v36 = vmul.f32 -1.442695, %v607_v33 }
 0x34c   :  { %1437 = vpow2.f32 %v1327_v60  ;;  %v636_v60 = vld [vmem:[#allocation4 + $0x38] sm:$0xff] }
 0x34d   :  { %1439 = vpow2.f32 %v1328_v63 }
 0x34e   :  { %1441 = vpow2.f32 %v1329_v36 }
 0x34f   :  { %1443 = vtanh.f32 %v606_v38 }
 0x356   :  { %v1438_v39 = vpop.eup %1437 }
 0x357   :  { %v1440_v40 = vpop.eup %1439  ;;  %v611_v41 = vadd.f32 1.0, %v1438_v39 }
 0x358   :  { %v617_v42 = vadd.f32 1.0, %v1440_v40  ;;  %v1442_v43 = vpop.eup %1441  ;;  %v640_v40 = vunpack.c.h.bf16 %v636_v60 }
 0x359   :  { %1445 = vrcp.f32 %v611_v41  ;;  %v1444_v45 = vpop.eup %1443  ;;  %v624_v37 = vadd.f32 1.0, %v1442_v43 }
 0x35a   :  { %1447 = vrcp.f32 %v617_v42  ;;  %v639_v42 = vunpack.c.l.bf16 %v636_v60 }
 0x35b   :  { %1449 = vrcp.f32 %v624_v37 }
 0x363   :  { %v1446_v46 = vpop.eup %1445 }
 0x364   :  { %v1448_v47 = vpop.eup %1447  ;;  %v628_v48 = vmul.f32 %v1446_v46, %v1444_v45 }
 0x365   :  { %v627_v49 = vmul.f32 %v1448_v47, %v2016_v44  ;;  %v1450_v51 = vpop.eup %1449  ;;  %v635_v44 = vld [vmem:[#allocation4 + $0x30] sm:$0xff] }
 0x366   :  { %v637_v55 = vunpack.c.l.bf16 %v635_v44  ;;  %v638_v56 = vunpack.c.h.bf16 %v635_v44 }
 0x367   :  { %v2054_v50 = vadd.f32 %v628_v48, %v627_v49 }
 0x369   :  { %1451 = vtanh.f32 %v2054_v50 }
 0x373   :  { %v1452_v52 = vpop.eup %1451 }
 0x374   :  { %v631_v53 = vmul.f32 %v1452_v52, %v1450_v51 }
 0x376   :  { %633 = vst [vmem:[#allocation12 + $0x10] sm:$0xff] %v631_v53  ;;  %v641_v54 = vpack.c.bf16 %v631_v53, %v631_v53 }
 0x378   :  { %675 = vmatmul.mubr.bf16.vlgmr.msra.gmra.mrb[12].mxu0 %v641_v54  ;;  %716 = vmatmul.mubr.bf16.vlgmr.msra.gmra.mrb[12].mxu1 %v641_v54 }
 0x379   :  { %763 = vmatpush1.bf16.msra.mxu0 %v1848_v2  ;;  %804 = vmatpush1.bf16.msra.mxu1 %v1861_v7 }
 0x37a   :  { %764 = vmatprep.subr.bf16.mxu0 %v1851_v3  ;;  %805 = vmatprep.subr.bf16.mxu1 %v1871_v10 }
 0x37b   :  { %794 = vmatprep.mubr.bf16.mxu0 %v1735_v0  ;;  %835 = vmatprep.mubr.bf16.mxu1 %v1735_v0 }
 0x37d   :  { %765 = vmatpush1.bf16.msra.mxu0 %v1854_v4  ;;  %806 = vmatpush1.bf16.msra.mxu1 %v1873_v11 }
 0x37e   :  { %766 = vmatprep.subr.bf16.mxu0 %v1857_v5  ;;  %807 = vmatprep.subr.bf16.mxu1 %v1881_v14 }
 0x381   :  { %767 = vmatpush1.bf16.msra.mxu0 %v1864_v8  ;;  %808 = vmatpush1.bf16.msra.mxu1 %v1885_v15 }
 0x382   :  { %768 = vmatprep.subr.bf16.mxu0 %v1868_v9  ;;  %809 = vmatprep.subr.bf16.mxu1 %v1888_v16 }
 0x385   :  { %769 = vmatpush1.bf16.msra.mxu0 %v1877_v12  ;;  %810 = vmatpush1.bf16.msra.mxu1 %v1897_v19 }
 0x386   :  { %770 = vmatprep.subr.bf16.mxu0 %v1879_v13  ;;  %811 = vmatprep.subr.bf16.mxu1 %v1900_v20 }
 0x389   :  { %771 = vmatpush1.bf16.msra.mxu0 %v1891_v17  ;;  %812 = vmatpush1.bf16.msra.mxu1 %v1909_v23 }
 0x38a   :  { %772 = vmatprep.subr.bf16.mxu0 %v1894_v18  ;;  %813 = vmatprep.subr.bf16.mxu1 %v1912_v24 }
 0x38d   :  { %773 = vmatpush1.bf16.msra.mxu0 %v1902_v21  ;;  %814 = vmatpush1.bf16.msra.mxu1 %v1921_v27 }
 0x38e   :  { %774 = vmatprep.subr.bf16.mxu0 %v1905_v22  ;;  %815 = vmatprep.subr.bf16.mxu1 %v1924_v28 }
 0x391   :  { %775 = vmatpush1.bf16.msra.mxu0 %v1915_v25  ;;  %816 = vmatpush1.bf16.msra.mxu1 %v1931_v31 }
 0x392   :  { %776 = vmatprep.subr.bf16.mxu0 %v1918_v26  ;;  %817 = vmatprep.subr.bf16.mxu1 %v1934_v32 }
 0x395   :  { %777 = vmatpush1.bf16.msra.mxu0 %v1927_v29  ;;  %818 = vmatpush1.bf16.msra.mxu1 %v1938_v34 }
 0x396   :  { %882 = vmatprep.subr.bf16.mxu0 %v1846_v1  ;;  %923 = vmatprep.subr.bf16.mxu1 %v1859_v6 }
 0x44b   :  { %v676_v57 = vpop.f32.mrb[12].mxu0  ;;  %v717_v58 = vpop.f32.mrb[12].mxu1 }
 0x44c   :  { %v724_v59 = vadd.f32 %v676_v57, %v637_v55  ;;  %v678_v61 = vpop.f32.mrb[13].mxu0  ;;  %v719_v62 = vpop.f32.mrb[13].mxu1  ;;  %v726_v45 = vadd.f32 %v717_v58, %v639_v42 }
 0x44d   :  { %v725_v63 = vadd.f32 %v678_v61, %v638_v56  ;;  %v680_v30 = vpop.f32.mrb[14].mxu0  ;;  %v721_v33 = vpop.f32.mrb[14].mxu1  ;;  %v727_v41 = vadd.f32 %v719_v62, %v640_v40 }
 0x44e   :  { %v1330_v35 = vmul.f32 -1.442695, %v724_v59  ;;  %v681_v36 = vpop.f32.mrb[15].mxu0  ;;  %v722_v38 = vpop.f32.mrb[15].mxu1 }
 0x44f   :  { %v1331_v39 = vmul.f32 -1.442695, %v725_v63  ;;  %v1332_v43 = vmul.f32 -1.442695, %v727_v41 }
 0x450   :  { %1453 = vpow2.f32 %v1330_v35  ;;  %v756_v35 = vld [vmem:[#allocation4 + $0x48] sm:$0xff] }
 0x451   :  { %1455 = vpow2.f32 %v1331_v39 }
 0x452   :  { %1457 = vpow2.f32 %v1332_v43 }
 0x453   :  { %1459 = vtanh.f32 %v726_v45 }
 0x45a   :  { %v1454_v46 = vpop.eup %1453 }
 0x45b   :  { %v1456_v47 = vpop.eup %1455  ;;  %v731_v48 = vadd.f32 1.0, %v1454_v46 }
 0x45c   :  { %v737_v37 = vadd.f32 1.0, %v1456_v47  ;;  %v1458_v49 = vpop.eup %1457  ;;  %v760_v47 = vunpack.c.h.bf16 %v756_v35 }
 0x45d   :  { %1461 = vrcp.f32 %v731_v48  ;;  %v1460_v51 = vpop.eup %1459  ;;  %v744_v44 = vadd.f32 1.0, %v1458_v49 }
 0x45e   :  { %1463 = vrcp.f32 %v737_v37 }
 0x45f   :  { %1465 = vrcp.f32 %v744_v44 }
 0x467   :  { %v1462_v52 = vpop.eup %1461 }
 0x468   :  { %v1464_v53 = vpop.eup %1463  ;;  %v748_v54 = vmul.f32 %v1462_v52, %v1460_v51 }
 0x469   :  { %v747_v55 = vmul.f32 %v1464_v53, %v2054_v50  ;;  %v1466_v57 = vpop.eup %1465  ;;  %v755_v50 = vld [vmem:[#allocation4 + $0x40] sm:$0xff] }
 0x46a   :  { %v757_v61 = vunpack.c.l.bf16 %v755_v50  ;;  %v758_v62 = vunpack.c.h.bf16 %v755_v50 }
 0x46b   :  { %v2092_v56 = vadd.f32 %v748_v54, %v747_v55 }
 0x46d   :  { %1467 = vtanh.f32 %v2092_v56 }
 0x477   :  { %v1468_v58 = vpop.eup %1467 }
 0x478   :  { %v751_v59 = vmul.f32 %v1468_v58, %v1466_v57 }
 0x47a   :  { %753 = vst [vmem:[#allocation12 + $0x18] sm:$0xff] %v751_v59  ;;  %v761_v60 = vpack.c.bf16 %v751_v59, %v751_v59 }
 0x47c   :  { %795 = vmatmul.mubr.bf16.vlgmr.msra.gmra.mrb[16].mxu0 %v761_v60  ;;  %836 = vmatmul.mubr.bf16.vlgmr.msra.gmra.mrb[16].mxu1 %v761_v60 }
 0x47d   :  { %883 = vmatpush1.bf16.msra.mxu0 %v1848_v2  ;;  %924 = vmatpush1.bf16.msra.mxu1 %v1861_v7 }
 0x47e   :  { %884 = vmatprep.subr.bf16.mxu0 %v1851_v3  ;;  %925 = vmatprep.subr.bf16.mxu1 %v1871_v10 }
 0x47f   :  { %914 = vmatprep.mubr.bf16.mxu0 %v1735_v0  ;;  %955 = vmatprep.mubr.bf16.mxu1 %v1735_v0 }
 0x481   :  { %885 = vmatpush1.bf16.msra.mxu0 %v1854_v4  ;;  %926 = vmatpush1.bf16.msra.mxu1 %v1873_v11 }
 0x482   :  { %886 = vmatprep.subr.bf16.mxu0 %v1857_v5  ;;  %927 = vmatprep.subr.bf16.mxu1 %v1881_v14 }
 0x485   :  { %887 = vmatpush1.bf16.msra.mxu0 %v1864_v8  ;;  %928 = vmatpush1.bf16.msra.mxu1 %v1885_v15 }
 0x486   :  { %888 = vmatprep.subr.bf16.mxu0 %v1868_v9  ;;  %929 = vmatprep.subr.bf16.mxu1 %v1888_v16 }
 0x489   :  { %889 = vmatpush1.bf16.msra.mxu0 %v1877_v12  ;;  %930 = vmatpush1.bf16.msra.mxu1 %v1897_v19 }
 0x48a   :  { %890 = vmatprep.subr.bf16.mxu0 %v1879_v13  ;;  %931 = vmatprep.subr.bf16.mxu1 %v1900_v20 }
 0x48d   :  { %891 = vmatpush1.bf16.msra.mxu0 %v1891_v17  ;;  %932 = vmatpush1.bf16.msra.mxu1 %v1909_v23 }
 0x48e   :  { %892 = vmatprep.subr.bf16.mxu0 %v1894_v18  ;;  %933 = vmatprep.subr.bf16.mxu1 %v1912_v24 }
 0x491   :  { %893 = vmatpush1.bf16.msra.mxu0 %v1902_v21  ;;  %934 = vmatpush1.bf16.msra.mxu1 %v1921_v27 }
 0x492   :  { %894 = vmatprep.subr.bf16.mxu0 %v1905_v22  ;;  %935 = vmatprep.subr.bf16.mxu1 %v1924_v28 }
 0x495   :  { %895 = vmatpush1.bf16.msra.mxu0 %v1915_v25  ;;  %936 = vmatpush1.bf16.msra.mxu1 %v1931_v31 }
 0x496   :  { %896 = vmatprep.subr.bf16.mxu0 %v1918_v26  ;;  %937 = vmatprep.subr.bf16.mxu1 %v1934_v32 }
 0x499   :  { %897 = vmatpush1.bf16.msra.mxu0 %v1927_v29  ;;  %938 = vmatpush1.bf16.msra.mxu1 %v1938_v34 }
 0x49a   :  { %1002 = vmatprep.subr.bf16.mxu0 %v1846_v1  ;;  %1043 = vmatprep.subr.bf16.mxu1 %v1859_v6  ;;  %v759_v6 = vunpack.c.l.bf16 %v756_v35 }
 0x54f   :  { %v796_v63 = vpop.f32.mrb[16].mxu0  ;;  %v837_v30 = vpop.f32.mrb[16].mxu1 }
 0x550   :  { %v844_v33 = vadd.f32 %v796_v63, %v757_v61  ;;  %v798_v36 = vpop.f32.mrb[17].mxu0  ;;  %v839_v38 = vpop.f32.mrb[17].mxu1  ;;  %v846_v37 = vadd.f32 %v837_v30, %v759_v6  ;;  %v1540_v6 = vld [vmem:[#allocation10 + $0x28] ss:$16 sps:$4 sm:$0xff]  }
 0x551   :  { %v845_v39 = vadd.f32 %v798_v36, %v758_v62  ;;  %v800_v40 = vpop.f32.mrb[18].mxu0  ;;  %v841_v41 = vpop.f32.mrb[18].mxu1  ;;  %v847_v1 = vadd.f32 %v839_v38, %v760_v47  ;;  %v1538_v47 = vld [vmem:[#allocation10 + $0x2c] ss:$16 sps:$4 sm:$0xff]  }
 0x552   :  { %v1333_v42 = vmul.f32 -1.442695, %v844_v33  ;;  %v801_v43 = vpop.f32.mrb[19].mxu0  ;;  %v842_v45 = vpop.f32.mrb[19].mxu1 }
 0x553   :  { %v1334_v46 = vmul.f32 -1.442695, %v845_v39  ;;  %v1335_v48 = vmul.f32 -1.442695, %v847_v1  ;;  %v1535_v43 = vld [vmem:[#allocation10] ss:$16 sps:$4 sm:$0xff]  }
 0x554   :  { %1469 = vpow2.f32 %v1333_v42  ;;  %v1536_v45 = vld [vmem:[#allocation10 + $0x8] ss:$16 sps:$4 sm:$0xff]   ;;  %v1539_v1 = vld [vmem:[#allocation10 + $0x20] ss:$16 sps:$4 sm:$0xff]  }
 0x555   :  { %1471 = vpow2.f32 %v1334_v46  ;;  %v1537_v46 = vld [vmem:[#allocation10 + $0x24] ss:$16 sps:$4 sm:$0xff]  }
 0x556   :  { %1473 = vpow2.f32 %v1335_v48  ;;  %v1541_v48 = vld [vmem:[#allocation10 + $0x44] ss:$16 sps:$4 sm:$0xff]  }
 0x557   :  { %1475 = vtanh.f32 %v846_v37  ;;  %v1542_v37 = vld [vmem:[#allocation10 + $0x4c] ss:$16 sps:$4 sm:$0xff]  }
 0x55e   :  { %v1470_v49 = vpop.eup %1469 }
 0x55f   :  { %v1472_v51 = vpop.eup %1471  ;;  %v851_v52 = vadd.f32 1.0, %v1470_v49  ;;  %v1543_v49 = vld [vmem:[#allocation10 + $0x40] ss:$16 sps:$4 sm:$0xff]  }
 0x560   :  { %v857_v53 = vadd.f32 1.0, %v1472_v51  ;;  %v1474_v54 = vpop.eup %1473  ;;  %v1544_v51 = vld [vmem:[#allocation10 + $0x48] ss:$16 sps:$4 sm:$0xff]  }
 0x561   :  { %1477 = vrcp.f32 %v851_v52  ;;  %v1476_v44 = vpop.eup %1475  ;;  %v864_v59 = vadd.f32 1.0, %v1474_v54  ;;  %v1545_v52 = vld [vmem:[#allocation10 + $0x64] ss:$16 sps:$4 sm:$0xff]   ;;  %v1547_v54 = vld [vmem:[#allocation10 + $0x60] ss:$16 sps:$4 sm:$0xff]  }
 0x562   :  { %1479 = vrcp.f32 %v857_v53  ;;  %v1546_v53 = vld [vmem:[#allocation10 + $0x6c] ss:$16 sps:$4 sm:$0xff]  }
 0x563   :  { %1481 = vrcp.f32 %v864_v59  ;;  %v1553_v59 = vld [vmem:[#allocation10 + $0xa4] ss:$16 sps:$4 sm:$0xff]  }
 0x56b   :  { %v1478_v55 = vpop.eup %1477 }
 0x56c   :  { %v1480_v57 = vpop.eup %1479  ;;  %v868_v58 = vmul.f32 %v1478_v55, %v1476_v44  ;;  %v1548_v44 = vld [vmem:[#allocation10 + $0x68] ss:$16 sps:$4 sm:$0xff]   ;;  %v1550_v55 = vld [vmem:[#allocation10 + $0x8c] ss:$16 sps:$4 sm:$0xff]  }
 0x56d   :  { %v867_v60 = vmul.f32 %v1480_v57, %v2092_v56  ;;  %v1482_v61 = vpop.eup %1481  ;;  %v1551_v57 = vld [vmem:[#allocation10 + $0x80] ss:$16 sps:$4 sm:$0xff]  }
 0x56f   :  { %v2130_v50 = vadd.f32 %v868_v58, %v867_v60  ;;  %v1552_v58 = vld [vmem:[#allocation10 + $0x88] ss:$16 sps:$4 sm:$0xff]   ;;  %v1554_v60 = vld [vmem:[#allocation10 + $0xac] ss:$16 sps:$4 sm:$0xff]  }
 0x571   :  { %1483 = vtanh.f32 %v2130_v50 }
 0x57b   :  { %v1484_v62 = vpop.eup %1483 }
 0x57c   :  { %v871_v63 = vmul.f32 %v1484_v62, %v1482_v61  ;;  %v1556_v61 = vld [vmem:[#allocation10 + $0xa8] ss:$16 sps:$4 sm:$0xff]   ;;  %v1557_v62 = vld [vmem:[#allocation10 + $0xc4] ss:$16 sps:$4 sm:$0xff]  }
 0x57e   :  { %873 = vst [vmem:[#allocation12 + $0x20] sm:$0xff] %v871_v63  ;;  %v881_v30 = vpack.c.bf16 %v871_v63, %v871_v63  ;;  %v1558_v63 = vld [vmem:[#allocation10 + $0xcc] ss:$16 sps:$4 sm:$0xff]  }
 0x580   :  { %915 = vmatmul.mubr.bf16.vlgmr.msra.gmra.mrb[20].mxu0 %v881_v30  ;;  %956 = vmatmul.mubr.bf16.vlgmr.msra.gmra.mrb[20].mxu1 %v881_v30  ;;  %v1559_v30 = vld [vmem:[#allocation10 + $0xc0] ss:$16 sps:$4 sm:$0xff]  }
 0x581   :  { %1003 = vmatpush1.bf16.msra.mxu0 %v1848_v2  ;;  %1044 = vmatpush1.bf16.msra.mxu1 %v1861_v7  ;;  %v1533_v2 = vld [vmem:[#allocation10 + $0x4] ss:$16 sps:$4 sm:$0xff]  }
 0x582   :  { %1004 = vmatprep.subr.bf16.mxu0 %v1851_v3  ;;  %1045 = vmatprep.subr.bf16.mxu1 %v1871_v10  ;;  %v1534_v3 = vld [vmem:[#allocation10 + $0xc] ss:$16 sps:$4 sm:$0xff]  }
 0x583   :  { %1034 = vmatprep.mubr.bf16.mxu0 %v1735_v0  ;;  %1075 = vmatprep.mubr.bf16.mxu1 %v1735_v0 }
 0x585   :  { %1005 = vmatpush1.bf16.msra.mxu0 %v1854_v4  ;;  %1046 = vmatpush1.bf16.msra.mxu1 %v1873_v11  ;;  %v875_v4 = vld [vmem:[#allocation4 + $0x50] sm:$0xff]  ;;  %v876_v11 = vld [vmem:[#allocation4 + $0x58] sm:$0xff] }
 0x586   :  { %1006 = vmatprep.subr.bf16.mxu0 %v1857_v5  ;;  %1047 = vmatprep.subr.bf16.mxu1 %v1881_v14  ;;  %v877_v5 = vunpack.c.l.bf16 %v875_v4  ;;  %v878_v7 = vunpack.c.h.bf16 %v875_v4  ;;  %v1562_v4 = vld [vmem:[#allocation10 + $0xec] ss:$16 sps:$4 sm:$0xff]  }
 0x589   :  { %1007 = vmatpush1.bf16.msra.mxu0 %v1864_v8  ;;  %1048 = vmatpush1.bf16.msra.mxu1 %v1885_v15 }
 0x58a   :  { %1008 = vmatprep.subr.bf16.mxu0 %v1868_v9  ;;  %1049 = vmatprep.subr.bf16.mxu1 %v1888_v16 }
 0x58d   :  { %1009 = vmatpush1.bf16.msra.mxu0 %v1877_v12  ;;  %1050 = vmatpush1.bf16.msra.mxu1 %v1897_v19 }
 0x58e   :  { %1010 = vmatprep.subr.bf16.mxu0 %v1879_v13  ;;  %1051 = vmatprep.subr.bf16.mxu1 %v1900_v20 }
 0x591   :  { %1011 = vmatpush1.bf16.msra.mxu0 %v1891_v17  ;;  %1052 = vmatpush1.bf16.msra.mxu1 %v1909_v23  ;;  %v879_v23 = vunpack.c.l.bf16 %v876_v11 }
 0x592   :  { %1012 = vmatprep.subr.bf16.mxu0 %v1894_v18  ;;  %1053 = vmatprep.subr.bf16.mxu1 %v1912_v24 }
 0x595   :  { %1013 = vmatpush1.bf16.msra.mxu0 %v1902_v21  ;;  %1054 = vmatpush1.bf16.msra.mxu1 %v1921_v27  ;;  %v880_v21 = vunpack.c.h.bf16 %v876_v11 }
 0x596   :  { %1014 = vmatprep.subr.bf16.mxu0 %v1905_v22  ;;  %1055 = vmatprep.subr.bf16.mxu1 %v1924_v28 }
 0x599   :  { %1015 = vmatpush1.bf16.msra.mxu0 %v1915_v25  ;;  %1056 = vmatpush1.bf16.msra.mxu1 %v1931_v31 }
 0x59a   :  { %1016 = vmatprep.subr.bf16.mxu0 %v1918_v26  ;;  %1057 = vmatprep.subr.bf16.mxu1 %v1934_v32 }
 0x59d   :  { %1017 = vmatpush1.bf16.msra.mxu0 %v1927_v29  ;;  %1058 = vmatpush1.bf16.msra.mxu1 %v1938_v34 }
 0x59e   :  { %1122 = vmatprep.subr.bf16.mxu0 %v1533_v2  ;;  %1163 = vmatprep.subr.bf16.mxu1 %v1534_v3  ;;  %v1560_v2 = vld [vmem:[#allocation10 + $0xc8] ss:$16 sps:$4 sm:$0xff]   ;;  %v1561_v3 = vld [vmem:[#allocation10 + $0xe4] ss:$16 sps:$4 sm:$0xff]  }
 0x653   :  { %v916_v8 = vpop.f32.mrb[20].mxu0  ;;  %v957_v9 = vpop.f32.mrb[20].mxu1 }
 0x654   :  { %v964_v10 = vadd.f32 %v916_v8, %v877_v5  ;;  %v918_v12 = vpop.f32.mrb[21].mxu0  ;;  %v959_v13 = vpop.f32.mrb[21].mxu1  ;;  %v966_v25 = vadd.f32 %v957_v9, %v879_v23  ;;  %v1563_v5 = vld [vmem:[#allocation10 + $0xe0] ss:$16 sps:$4 sm:$0xff]  }
 0x655   :  { %v965_v14 = vadd.f32 %v918_v12, %v878_v7  ;;  %v920_v15 = vpop.f32.mrb[22].mxu0  ;;  %v961_v16 = vpop.f32.mrb[22].mxu1  ;;  %v967_v22 = vadd.f32 %v959_v13, %v880_v21  ;;  %v1564_v7 = vld [vmem:[#allocation10 + $0xe8] ss:$16 sps:$4 sm:$0xff]   ;;  %v995_v8 = vld [vmem:[#allocation4 + $0x60] sm:$0xff] }
 0x656   :  { %v1336_v17 = vmul.f32 -1.442695, %v964_v10  ;;  %v921_v18 = vpop.f32.mrb[23].mxu0  ;;  %v962_v19 = vpop.f32.mrb[23].mxu1  ;;  %v997_v9 = vunpack.c.l.bf16 %v995_v8  ;;  %v998_v10 = vunpack.c.h.bf16 %v995_v8 }
 0x657   :  { %v1337_v20 = vmul.f32 -1.442695, %v965_v14  ;;  %v1338_v24 = vmul.f32 -1.442695, %v967_v22  ;;  %v996_v14 = vld [vmem:[#allocation4 + $0x68] sm:$0xff] }
 0x658   :  { %1485 = vpow2.f32 %v1336_v17 }
 0x659   :  { %1487 = vpow2.f32 %v1337_v20 }
 0x65a   :  { %1489 = vpow2.f32 %v1338_v24  ;;  %v1000_v24 = vunpack.c.h.bf16 %v996_v14 }
 0x65b   :  { %1491 = vtanh.f32 %v966_v25 }
 0x662   :  { %v1486_v26 = vpop.eup %1485 }
 0x663   :  { %v1488_v27 = vpop.eup %1487  ;;  %v971_v28 = vadd.f32 1.0, %v1486_v26  ;;  %v999_v26 = vunpack.c.l.bf16 %v996_v14 }
 0x664   :  { %v977_v29 = vadd.f32 1.0, %v1488_v27  ;;  %v1490_v31 = vpop.eup %1489 }
 0x665   :  { %1493 = vrcp.f32 %v971_v28  ;;  %v1492_v32 = vpop.eup %1491  ;;  %v984_v35 = vadd.f32 1.0, %v1490_v31 }
 0x666   :  { %1495 = vrcp.f32 %v977_v29 }
 0x667   :  { %1497 = vrcp.f32 %v984_v35 }
 0x66f   :  { %v1494_v34 = vpop.eup %1493 }
 0x670   :  { %v1496_v56 = vpop.eup %1495  ;;  %v988_v33 = vmul.f32 %v1494_v34, %v1492_v32 }
 0x671   :  { %v987_v36 = vmul.f32 %v1496_v56, %v2130_v50  ;;  %v1498_v39 = vpop.eup %1497  ;;  %v1555_v50 = vld [vmem:[#allocation10 + $0xa0] ss:$16 sps:$4 sm:$0xff]  }
 0x673   :  { %v2166_v38 = vadd.f32 %v988_v33, %v987_v36 }
 0x675   :  { %1499 = vtanh.f32 %v2166_v38 }
 0x67f   :  { %v1500_v40 = vpop.eup %1499 }
 0x680   :  { %v991_v41 = vmul.f32 %v1500_v40, %v1498_v39 }
 0x682   :  { %993 = vst [vmem:[#allocation12 + $0x28] sm:$0xff] %v991_v41  ;;  %v1001_v42 = vpack.c.bf16 %v991_v41, %v991_v41 }
 0x684   :  { %1035 = vmatmul.mubr.bf16.vlgmr.msra.gmra.mrb[24].mxu0 %v1001_v42  ;;  %1076 = vmatmul.mubr.bf16.vlgmr.msra.gmra.mrb[24].mxu1 %v1001_v42 }
 0x685   :  { %1123 = vmatpush1.bf16.msra.mxu0 %v1535_v43  ;;  %1164 = vmatpush1.bf16.msra.mxu1 %v1536_v45 }
 0x686   :  { %1124 = vmatprep.subr.bf16.mxu0 %v1537_v46  ;;  %1165 = vmatprep.subr.bf16.mxu1 %v1538_v47 }
 0x687   :  { %1154 = vmatprep.mubr.bf16.mxu0 %v1735_v0  ;;  %1195 = vmatprep.mubr.bf16.mxu1 %v1735_v0  ;;  %v1549_v0 = vld [vmem:[#allocation10 + $0x84] ss:$16 sps:$4 sm:$0xff]  }
 0x689   :  { %1125 = vmatpush1.bf16.msra.mxu0 %v1539_v1  ;;  %1166 = vmatpush1.bf16.msra.mxu1 %v1540_v6  ;;  %v1115_v1 = vld [vmem:[#allocation4 + $0x70] sm:$0xff] }
 0x68a   :  { %1126 = vmatprep.subr.bf16.mxu0 %v1541_v48  ;;  %1167 = vmatprep.subr.bf16.mxu1 %v1542_v37  ;;  %v1117_v6 = vunpack.c.l.bf16 %v1115_v1  ;;  %v1118_v48 = vunpack.c.h.bf16 %v1115_v1 }
 0x68d   :  { %1127 = vmatpush1.bf16.msra.mxu0 %v1543_v49  ;;  %1168 = vmatpush1.bf16.msra.mxu1 %v1544_v51 }
 0x68e   :  { %1128 = vmatprep.subr.bf16.mxu0 %v1545_v52  ;;  %1169 = vmatprep.subr.bf16.mxu1 %v1546_v53  ;;  %v1116_v52 = vld [vmem:[#allocation4 + $0x78] sm:$0xff] }
 0x691   :  { %1129 = vmatpush1.bf16.msra.mxu0 %v1547_v54  ;;  %1170 = vmatpush1.bf16.msra.mxu1 %v1548_v44 }
 0x692   :  { %1130 = vmatprep.subr.bf16.mxu0 %v1549_v0  ;;  %1171 = vmatprep.subr.bf16.mxu1 %v1550_v55 }
 0x695   :  { %1131 = vmatpush1.bf16.msra.mxu0 %v1551_v57  ;;  %1172 = vmatpush1.bf16.msra.mxu1 %v1552_v58 }
 0x696   :  { %1132 = vmatprep.subr.bf16.mxu0 %v1553_v59  ;;  %1173 = vmatprep.subr.bf16.mxu1 %v1554_v60  ;;  %v1120_v60 = vunpack.c.h.bf16 %v1116_v52 }
 0x699   :  { %1133 = vmatpush1.bf16.msra.mxu0 %v1555_v50  ;;  %1174 = vmatpush1.bf16.msra.mxu1 %v1556_v61  ;;  %v1119_v61 = vunpack.c.l.bf16 %v1116_v52 }
 0x69a   :  { %1134 = vmatprep.subr.bf16.mxu0 %v1557_v62  ;;  %1175 = vmatprep.subr.bf16.mxu1 %v1558_v63 }
 0x69d   :  { %1135 = vmatpush1.bf16.msra.mxu0 %v1559_v30  ;;  %1176 = vmatpush1.bf16.msra.mxu1 %v1560_v2 }
 0x69e   :  { %1136 = vmatprep.subr.bf16.mxu0 %v1561_v3  ;;  %1177 = vmatprep.subr.bf16.mxu1 %v1562_v4 }
 0x6a1   :  { %1137 = vmatpush1.bf16.msra.mxu0 %v1563_v5  ;;  %1178 = vmatpush1.bf16.msra.mxu1 %v1564_v7 }
 0x757   :  { %v1036_v11 = vpop.f32.mrb[24].mxu0  ;;  %v1077_v12 = vpop.f32.mrb[24].mxu1 }
 0x758   :  { %v1084_v13 = vadd.f32 %v1036_v11, %v997_v9  ;;  %v1038_v15 = vpop.f32.mrb[25].mxu0  ;;  %v1079_v16 = vpop.f32.mrb[25].mxu1  ;;  %v1086_v28 = vadd.f32 %v1077_v12, %v999_v26 }
 0x759   :  { %v1085_v17 = vadd.f32 %v1038_v15, %v998_v10  ;;  %v1040_v18 = vpop.f32.mrb[26].mxu0  ;;  %v1081_v19 = vpop.f32.mrb[26].mxu1  ;;  %v1087_v25 = vadd.f32 %v1079_v16, %v1000_v24 }
 0x75a   :  { %v1339_v20 = vmul.f32 -1.442695, %v1084_v13  ;;  %v1041_v21 = vpop.f32.mrb[27].mxu0  ;;  %v1082_v22 = vpop.f32.mrb[27].mxu1 }
 0x75b   :  { %v1340_v23 = vmul.f32 -1.442695, %v1085_v17  ;;  %v1341_v27 = vmul.f32 -1.442695, %v1087_v25 }
 0x75c   :  { %1501 = vpow2.f32 %v1339_v20 }
 0x75d   :  { %1503 = vpow2.f32 %v1340_v23 }
 0x75e   :  { %1505 = vpow2.f32 %v1341_v27 }
 0x75f   :  { %1507 = vtanh.f32 %v1086_v28 }
 0x766   :  { %v1502_v29 = vpop.eup %1501 }
 0x767   :  { %v1504_v31 = vpop.eup %1503  ;;  %v1091_v32 = vadd.f32 1.0, %v1502_v29 }
 0x768   :  { %v1097_v34 = vadd.f32 1.0, %v1504_v31  ;;  %v1506_v56 = vpop.eup %1505 }
 0x769   :  { %1509 = vrcp.f32 %v1091_v32  ;;  %v1508_v33 = vpop.eup %1507  ;;  %v1104_v40 = vadd.f32 1.0, %v1506_v56 }
 0x76a   :  { %1511 = vrcp.f32 %v1097_v34 }
 0x76b   :  { %1513 = vrcp.f32 %v1104_v40 }
 0x773   :  { %v1510_v35 = vpop.eup %1509 }
 0x774   :  { %v1512_v36 = vpop.eup %1511  ;;  %v1108_v39 = vmul.f32 %v1510_v35, %v1508_v33 }
 0x775   :  { %v1107_v41 = vmul.f32 %v1512_v36, %v2166_v38  ;;  %v1514_v43 = vpop.eup %1513 }
 0x777   :  { %v1109_v42 = vadd.f32 %v1108_v39, %v1107_v41 }
 0x779   :  { %1515 = vtanh.f32 %v1109_v42 }
 0x783   :  { %v1516_v45 = vpop.eup %1515 }
 0x784   :  { %v1111_v46 = vmul.f32 %v1516_v45, %v1514_v43 }
 0x786   :  { %1113 = vst [vmem:[#allocation12 + $0x30] sm:$0xff] %v1111_v46  ;;  %v1121_v47 = vpack.c.bf16 %v1111_v46, %v1111_v46 }
 0x788   :  { %1155 = vmatmul.mubr.bf16.vlgmr.msra.gmra.mrb[28].mxu0 %v1121_v47  ;;  %1196 = vmatmul.mubr.bf16.vlgmr.msra.gmra.mrb[28].mxu1 %v1121_v47 }
 0x85b   :  { %v1156_v37 = vpop.f32.mrb[28].mxu0  ;;  %v1197_v49 = vpop.f32.mrb[28].mxu1 }
 0x85c   :  { %v1204_v51 = vadd.f32 %v1156_v37, %v1117_v6  ;;  %v1158_v53 = vpop.f32.mrb[29].mxu0  ;;  %v1199_v54 = vpop.f32.mrb[29].mxu1  ;;  %v1206_v63 = vadd.f32 %v1197_v49, %v1119_v61 }
 0x85d   :  { %v1205_v38 = vadd.f32 %v1158_v53, %v1118_v48  ;;  %v1160_v44 = vpop.f32.mrb[30].mxu0  ;;  %v1201_v0 = vpop.f32.mrb[30].mxu1  ;;  %v1207_v50 = vadd.f32 %v1199_v54, %v1120_v60 }
 0x85e   :  { %v1342_v55 = vmul.f32 -1.442695, %v1204_v51  ;;  %v1161_v57 = vpop.f32.mrb[31].mxu0  ;;  %v1202_v58 = vpop.f32.mrb[31].mxu1 }
 0x85f   :  { %v1343_v59 = vmul.f32 -1.442695, %v1205_v38  ;;  %v1344_v62 = vmul.f32 -1.442695, %v1207_v50 }
 0x860   :  { %1517 = vpow2.f32 %v1342_v55 }
 0x861   :  { %1519 = vpow2.f32 %v1343_v59 }
 0x862   :  { %1521 = vpow2.f32 %v1344_v62 }
 0x863   :  { %1523 = vtanh.f32 %v1206_v63 }
 0x86a   :  { %v1518_v30 = vpop.eup %1517 }
 0x86b   :  { %v1520_v2 = vpop.eup %1519  ;;  %v1211_v3 = vadd.f32 1.0, %v1518_v30 }
 0x86c   :  { %v1217_v4 = vadd.f32 1.0, %v1520_v2  ;;  %v1522_v5 = vpop.eup %1521 }
 0x86d   :  { %1525 = vrcp.f32 %v1211_v3  ;;  %v1524_v7 = vpop.eup %1523  ;;  %v1224_v11 = vadd.f32 1.0, %v1522_v5 }
 0x86e   :  { %1527 = vrcp.f32 %v1217_v4 }
 0x86f   :  { %1529 = vrcp.f32 %v1224_v11 }
 0x877   :  { %v1526_v8 = vpop.eup %1525 }
 0x878   :  { %v1528_v9 = vpop.eup %1527  ;;  %v1228_v10 = vmul.f32 %v1526_v8, %v1524_v7 }
 0x879   :  { %v1227_v12 = vmul.f32 %v1528_v9, %v1109_v42  ;;  %v1530_v14 = vpop.eup %1529 }
 0x87b   :  { %v1229_v13 = vadd.f32 %v1228_v10, %v1227_v12 }
 0x87d   :  { %1531 = vtanh.f32 %v1229_v13  ;;  %1242 = vst [vmem:[#allocation15] sm:$0xff] %v1229_v13 }
 0x887   :  { %v1532_v15 = vpop.eup %1531 }
 0x888   :  { %v1231_v16 = vmul.f32 %v1532_v15, %v1530_v14 }
 0x88a   :  { %1233 = vst [vmem:[#allocation12 + $0x38] sm:$0xff] %v1231_v16  ;;  %1240 = vst [vmem:[#allocation13] sm:$0xff] %v1231_v16 }
 0x88b   :  { %1664 = shalt.err (!%p1661_p8)
}
 0x88c   :  { %s1665_s28 = scalar_lea.hbm %s2227_s5, 128 }
 0x88d   :  { %p1666_p9 = scmp.ne.s32.totalorder %s2227_s5, %s1665_s28  ;;  %p1669_p10 = scmp.lt.u32.totalorder %s1665_s28, %s2227_s5 }
 0x88f   :  { %p1671_p11 = pnand %p1669_p10, %p1666_p9 }
 0x891   :  { %1674 = shalt.err (!%p1671_p11)
}
 0x892   :  { %1264 = dma.vmem_to_hbm [thread:$0]  %s1262_s1, 128, %s2227_s5, [#allocation14]  }
 0x893   :  { %s1675_s24 = scalar_lea.vmem %s2172_s21, 1024  ;;  %p1680_p13 = scmp.lt.s32.totalorder %s2172_s21, %s2172_s21 }
 0x894   :  { %p1676_p12 = scmp.ne.s32.totalorder %s2172_s21, %s1675_s24  ;;  %p1681_p0 = scmp.lt.s32.totalorder %s1675_s24, %s1675_s24 }
 0x896   :  { %p1682_p1 = por %p1681_p0, %p1680_p13 }
 0x898   :  { %p1683_p2 = pnand %p1682_p1, %p1676_p12 }
 0x89a   :  { %1686 = shalt.err (!%p1683_p2)
}
 0x89b   :  { %s1687_s12 = scalar_lea.hbm %s2226_s4, 1024 }
 0x89c   :  { %p1688_p3 = scmp.ne.s32.totalorder %s2226_s4, %s1687_s12  ;;  %p1691_p4 = scmp.lt.u32.totalorder %s1687_s12, %s2226_s4 }
 0x89e   :  { %p1693_p5 = pnand %p1691_p4, %p1688_p3 }
 0x8a0   :  { %1696 = shalt.err (!%p1693_p5)
}
 0x8a1   :  { %s1739_s5 = smov 128   ;;  %s1740_s17 = smov 8  }
 0x8a2   :  { %1254 = dma.vmem_to_hbm [thread:$0]  %s2172_s21, 1024, %s2226_s4, [#allocation6], %s1739_s5, %s1739_s5, %s1740_s17  }
 0x8a3   :  { %s1697_s20 = scalar_lea.vmem %s2174_s23, 128  ;;  %p1702_p7 = scmp.lt.s32.totalorder %s2174_s23, %s2174_s23 }
 0x8a4   :  { %p1698_p6 = scmp.ne.s32.totalorder %s2174_s23, %s1697_s20  ;;  %p1703_p8 = scmp.lt.s32.totalorder %s1697_s20, %s1697_s20 }
 0x8a6   :  { %p1704_p9 = por %p1703_p8, %p1702_p7 }
 0x8a8   :  { %p1705_p10 = pnand %p1704_p9, %p1698_p6 }
 0x8aa   :  { %1708 = shalt.err (!%p1705_p10)
}
 0x8ab   :  { %s1709_s19 = scalar_lea.hbm %s2228_s6, 128 }
 0x8ac   :  { %p1710_p11 = scmp.ne.s32.totalorder %s2228_s6, %s1709_s19  ;;  %p1713_p12 = scmp.lt.u32.totalorder %s1709_s19, %s2228_s6 }
 0x8ae   :  { %p1715_p13 = pnand %p1713_p12, %p1710_p11 }
 0x8b0   :  { %1718 = shalt.err (!%p1715_p13)
}
 0x8b1   :  { %1274 = dma.vmem_to_hbm [thread:$0]  %s2174_s23, 128, %s2228_s6, [#allocation14]  }
 0x8b2   :  { %1725 = dma.done.wait [#allocation6], 1024  }
 0x8b3   :  { %1726 = vsyncadd [#allocation6], 4294966272 }
 0x8b4   :  { %1727 = dma.done.wait [#allocation14], 256  }
 0x8b5   :  { %1728 = vsyncadd [#allocation14], 4294967040 }
 0x8b6   :  { %1284 = vsyncpa [#allocation5], 1 }
 0x8b7   :  { %1285 = vsyncpa [#allocation8], 1 }
 0x8b8   :  { %1286 = vsyncpa [#allocation11], 1 }
 0x8b9   :  { %1287 = vsyncpa [#allocation6], 1 }
 0x8ba   :  { %1288 = vsyncpa [#allocation14], 1 }

// kernel: tpu_custom_call.1
= control target key start
LH: loop header
LB: loop body
LE: loop exit
PB: predicated region body
PF: predicated region fallthrough
CT: control target
= control target key end

     0   :  { %12 = vsyncpa [#allocation5], 0  ;;  %s2222_s0 = inlined_call_operand.hbm [shape: bf16[8,8,512], index: 0, kind: input, shape index: {}]   ;;  %s2223_s1 = inlined_call_operand.hbm [shape: f32[1,8,128], index: 1, kind: input, shape index: {}]   ;;  %s2224_s2 = inlined_call_operand.hbm [shape: f32[1,8,128], index: 2, kind: input, shape index: {}]   ;;  %s2225_s3 = inlined_call_operand.hbm [shape: bf16[128,512], index: 3, kind: input, shape index: {}]   ;;  %s2226_s4 = inlined_call_operand.hbm [shape: f32[8,8,128], index: 4, kind: output, shape index: {0}]   ;;  %s2227_s5 = inlined_call_operand.hbm [shape: f32[1,8,128], index: 5, kind: output, shape index: {1}]   ;;  %s2228_s6 = inlined_call_operand.hbm [shape: f32[1,8,128], index: 6, kind: output, shape index: {2}]  }
   0x1   :  { %13 = vsyncpa [#allocation8], 0 }
   0x2   :  { %14 = vsyncpa [#allocation11], 0 }
   0x3   :  { %15 = vsyncpa [#allocation6], 0 }
   0x4   :  { %16 = vsyncpa [#allocation14], 0  ;;  %s1729_s21 = smov [#allocation7]   ;;  %s1730_s23 = smov [#allocation4]  }
   0x5   :  { %s35_s22 = sshll.u32 %s1729_s21, 4  ;;  %s22_s24 = sshll.u32 %s1730_s23, 4  ;;  %s36_s22 = int_to_ptr.vmem [resolvable:$true] %s35_s22  ;;  %s1776_s24 = int_to_ptr.vmem [resolvable:$true] %s22_s24 }
   0x6   :  { %s1565_s27 = scalar_lea.hbm %s2223_s1, 128 }
   0x7   :  { %p1566_p0 = scmp.ne.s32.totalorder %s2223_s1, %s1565_s27  ;;  %p1569_p1 = scmp.lt.u32.totalorder %s1565_s27, %s2223_s1 }
   0x9   :  { %p1571_p2 = pnand %p1569_p1, %p1566_p0 }
   0xb   :  { %1574 = shalt.err (!%p1571_p2)
}
   0xc   :  { %s1575_s8 = scalar_lea.vmem %s36_s22, 128  ;;  %p1580_p4 = scmp.lt.s32.totalorder %s36_s22, %s36_s22 }
   0xd   :  { %p1576_p3 = scmp.ne.s32.totalorder %s36_s22, %s1575_s8  ;;  %p1581_p5 = scmp.lt.s32.totalorder %s1575_s8, %s1575_s8 }
   0xf   :  { %p1582_p6 = por %p1581_p5, %p1580_p4 }
  0x11   :  { %p1583_p7 = pnand %p1582_p6, %p1576_p3 }
  0x13   :  { %1586 = shalt.err (!%p1583_p7)
}
  0x14   :  { %38 = dma.hbm_to_vmem [thread:$0]  %s2223_s1, 128, %s36_s22, [#allocation8]  }
  0x15   :  { %s1587_s13 = scalar_lea.hbm %s2222_s0, 2048 }
  0x16   :  { %p1588_p8 = scmp.ne.s32.totalorder %s2222_s0, %s1587_s13  ;;  %p1591_p9 = scmp.lt.u32.totalorder %s1587_s13, %s2222_s0 }
  0x18   :  { %p1593_p10 = pnand %p1591_p9, %p1588_p8 }
  0x1a   :  { %1596 = shalt.err (!%p1593_p10)
}
  0x1b   :  { %s1597_s18 = scalar_lea.vmem %s1776_s24, 2048  ;;  %p1602_p12 = scmp.lt.s32.totalorder %s1776_s24, %s1776_s24 }
  0x1c   :  { %p1598_p11 = scmp.ne.s32.totalorder %s1776_s24, %s1597_s18  ;;  %p1603_p13 = scmp.lt.s32.totalorder %s1597_s18, %s1597_s18 }
  0x1e   :  { %p1604_p0 = por %p1603_p13, %p1602_p12 }
  0x20   :  { %p1605_p1 = pnand %p1604_p0, %p1598_p11 }
  0x22   :  { %1608 = shalt.err (!%p1605_p1)
}
  0x23   :  { %s1731_s1 = smov 256   ;;  %s1732_s19 = smov 16  }
  0x24   :  { %28 = dma.hbm_to_vmem [thread:$0]  %s2222_s0, 2048, %s1776_s24, [#allocation5], %s1731_s1, %s1731_s1, %s1732_s19  }
  0x25   :  { %s1733_s22 = smov [#allocation9]   ;;  %s1734_s25 = smov [#allocation10]  }
  0x26   :  { %s45_s23 = sshll.u32 %s1733_s22, 4  ;;  %s54_s26 = sshll.u32 %s1734_s25, 4  ;;  %s46_s23 = int_to_ptr.vmem [resolvable:$true] %s45_s23  ;;  %s1810_s26 = int_to_ptr.vmem [resolvable:$true] %s54_s26 }
  0x27   :  { %s1609_s29 = scalar_lea.hbm %s2224_s2, 128 }
  0x28   :  { %p1610_p2 = scmp.ne.s32.totalorder %s2224_s2, %s1609_s29  ;;  %p1613_p3 = scmp.lt.u32.totalorder %s1609_s29, %s2224_s2 }
  0x2a   :  { %p1615_p4 = pnand %p1613_p3, %p1610_p2 }
  0x2c   :  { %1618 = shalt.err (!%p1615_p4)
}
  0x2d   :  { %s1619_s0 = scalar_lea.vmem %s46_s23, 128  ;;  %p1624_p6 = scmp.lt.s32.totalorder %s46_s23, %s46_s23 }
  0x2e   :  { %p1620_p5 = scmp.ne.s32.totalorder %s46_s23, %s1619_s0  ;;  %p1625_p7 = scmp.lt.s32.totalorder %s1619_s0, %s1619_s0 }
  0x30   :  { %p1626_p8 = por %p1625_p7, %p1624_p6 }
  0x32   :  { %p1627_p9 = pnand %p1626_p8, %p1620_p5 }
  0x34   :  { %1630 = shalt.err (!%p1627_p9)
}
  0x35   :  { %48 = dma.hbm_to_vmem [thread:$0]  %s2224_s2, 128, %s46_s23, [#allocation8]  }
  0x36   :  { %s1631_s13 = scalar_lea.hbm %s2225_s3, 4096 }
  0x37   :  { %p1632_p10 = scmp.ne.s32.totalorder %s2225_s3, %s1631_s13  ;;  %p1635_p11 = scmp.lt.u32.totalorder %s1631_s13, %s2225_s3 }
  0x39   :  { %p1637_p12 = pnand %p1635_p11, %p1632_p10 }
  0x3b   :  { %1640 = shalt.err (!%p1637_p12)
}
  0x3c   :  { %s1641_s18 = scalar_lea.vmem %s1810_s26, 4096  ;;  %p1646_p0 = scmp.lt.s32.totalorder %s1810_s26, %s1810_s26 }
  0x3d   :  { %p1642_p13 = scmp.ne.s32.totalorder %s1810_s26, %s1641_s18  ;;  %p1647_p1 = scmp.lt.s32.totalorder %s1641_s18, %s1641_s18 }
  0x3f   :  { %p1648_p2 = por %p1647_p1, %p1646_p0 }
  0x41   :  { %p1649_p3 = pnand %p1648_p2, %p1642_p13 }
  0x43   :  { %1652 = shalt.err (!%p1649_p3)
}
  0x44   :  { %60 = dma.hbm_to_vmem [thread:$0]  %s2225_s3, 4096, %s1810_s26, [#allocation11], %s1731_s1, %s1731_s1, %s1732_s19  }
  0x45   :  { %1719 = dma.done.wait [#allocation5], 2048  }
  0x46   :  { %1720 = vsyncadd [#allocation5], 4294965248 }
  0x47   :  { %1721 = dma.done.wait [#allocation8], 256  }
  0x48   :  { %1722 = vsyncadd [#allocation8], 4294967040 }
  0x49   :  { %1723 = dma.done.wait [#allocation11], 4096  }
  0x4a   :  { %1724 = vsyncadd [#allocation11], 4294963200  ;;  %v1735_v0 = vmov 0   ;;  %v1846_v1 = vld [vmem:[#allocation10 + $0x4] ss:$16 sps:$4 sm:$0xff]   ;;  %v117_v39 = vld [vmem:[#allocation4 + $0x8] sm:$0xff] }
  0x4b   :  { %315 = vmatprep.mubr.bf16.mxu0 %v1735_v0  ;;  %356 = vmatprep.mubr.bf16.mxu1 %v1735_v0  ;;  %v1848_v2 = vld [vmem:[#allocation10] ss:$16 sps:$4 sm:$0xff]   ;;  %v1851_v3 = vld [vmem:[#allocation10 + $0x24] ss:$16 sps:$4 sm:$0xff]   ;;  %v1859_v6 = vld [vmem:[#allocation10 + $0xc] ss:$16 sps:$4 sm:$0xff]   ;;  %v121_v46 = vunpack.c.h.bf16 %v117_v39  ;;  %v120_v52 = vunpack.c.l.bf16 %v117_v39 }
  0x4c   :  { %283 = vmatprep.subr.bf16.mxu0 %v1846_v1  ;;  %v1854_v4 = vld [vmem:[#allocation10 + $0x20] ss:$16 sps:$4 sm:$0xff]   ;;  %v1857_v5 = vld [vmem:[#allocation10 + $0x44] ss:$16 sps:$4 sm:$0xff]   ;;  %v1861_v7 = vld [vmem:[#allocation10 + $0x8] ss:$16 sps:$4 sm:$0xff]   ;;  %324 = vmatprep.subr.bf16.mxu1 %v1859_v6 }
  0x4d   :  { %284 = vmatpush1.bf16.msra.mxu0 %v1848_v2  ;;  %v1864_v8 = vld [vmem:[#allocation10 + $0x40] ss:$16 sps:$4 sm:$0xff]   ;;  %v1868_v9 = vld [vmem:[#allocation10 + $0x64] ss:$16 sps:$4 sm:$0xff]   ;;  %325 = vmatpush1.bf16.msra.mxu1 %v1861_v7  ;;  %v1871_v10 = vld [vmem:[#allocation10 + $0x2c] ss:$16 sps:$4 sm:$0xff]  }
  0x4e   :  { %285 = vmatprep.subr.bf16.mxu0 %v1851_v3  ;;  %v1873_v11 = vld [vmem:[#allocation10 + $0x28] ss:$16 sps:$4 sm:$0xff]   ;;  %326 = vmatprep.subr.bf16.mxu1 %v1871_v10  ;;  %v1877_v12 = vld [vmem:[#allocation10 + $0x60] ss:$16 sps:$4 sm:$0xff]   ;;  %v1879_v13 = vld [vmem:[#allocation10 + $0x84] ss:$16 sps:$4 sm:$0xff]  }
  0x4f   :  { %v1881_v14 = vld [vmem:[#allocation10 + $0x4c] ss:$16 sps:$4 sm:$0xff]   ;;  %v1885_v15 = vld [vmem:[#allocation10 + $0x48] ss:$16 sps:$4 sm:$0xff]   ;;  %v1891_v17 = vld [vmem:[#allocation10 + $0x80] ss:$16 sps:$4 sm:$0xff]  }
  0x50   :  { %v1888_v16 = vld [vmem:[#allocation10 + $0x6c] ss:$16 sps:$4 sm:$0xff]   ;;  %v1894_v18 = vld [vmem:[#allocation10 + $0xa4] ss:$16 sps:$4 sm:$0xff]   ;;  %v1897_v19 = vld [vmem:[#allocation10 + $0x68] ss:$16 sps:$4 sm:$0xff]  }
  0x51   :  { %286 = vmatpush1.bf16.msra.mxu0 %v1854_v4  ;;  %327 = vmatpush1.bf16.msra.mxu1 %v1873_v11  ;;  %v1900_v20 = vld [vmem:[#allocation10 + $0x8c] ss:$16 sps:$4 sm:$0xff]   ;;  %v1902_v21 = vld [vmem:[#allocation10 + $0xa0] ss:$16 sps:$4 sm:$0xff]   ;;  %v1905_v22 = vld [vmem:[#allocation10 + $0xc4] ss:$16 sps:$4 sm:$0xff]  }
  0x52   :  { %287 = vmatprep.subr.bf16.mxu0 %v1857_v5  ;;  %328 = vmatprep.subr.bf16.mxu1 %v1881_v14  ;;  %v1909_v23 = vld [vmem:[#allocation10 + $0x88] ss:$16 sps:$4 sm:$0xff]   ;;  %v1912_v24 = vld [vmem:[#allocation10 + $0xac] ss:$16 sps:$4 sm:$0xff]   ;;  %v1915_v25 = vld [vmem:[#allocation10 + $0xc0] ss:$16 sps:$4 sm:$0xff]  }
  0x53   :  { %v1918_v26 = vld [vmem:[#allocation10 + $0xe4] ss:$16 sps:$4 sm:$0xff]   ;;  %v1921_v27 = vld [vmem:[#allocation10 + $0xa8] ss:$16 sps:$4 sm:$0xff]   ;;  %v1924_v28 = vld [vmem:[#allocation10 + $0xcc] ss:$16 sps:$4 sm:$0xff]  }
  0x54   :  { %v1927_v29 = vld [vmem:[#allocation10 + $0xe0] ss:$16 sps:$4 sm:$0xff]   ;;  %v1931_v31 = vld [vmem:[#allocation10 + $0xc8] ss:$16 sps:$4 sm:$0xff]   ;;  %v1934_v32 = vld [vmem:[#allocation10 + $0xec] ss:$16 sps:$4 sm:$0xff]  }
  0x55   :  { %288 = vmatpush1.bf16.msra.mxu0 %v1864_v8  ;;  %329 = vmatpush1.bf16.msra.mxu1 %v1885_v15  ;;  %v78_v30 = vld [vmem:[#allocation7] sm:$0xff]  ;;  %v1938_v34 = vld [vmem:[#allocation10 + $0xe8] ss:$16 sps:$4 sm:$0xff]   ;;  %s1736_s3 = smov [#allocation13]   ;;  %s1737_s19 = smov [#allocation12]  }
  0x56   :  { %289 = vmatprep.subr.bf16.mxu0 %v1868_v9  ;;  %330 = vmatprep.subr.bf16.mxu1 %v1888_v16  ;;  %v122_v33 = vpack.c.bf16 %v78_v30, %v78_v30  ;;  %v116_v35 = vld [vmem:[#allocation4] sm:$0xff]  ;;  %v80_v62 = vld [vmem:[#allocation9] sm:$0xff]  ;;  %s1261_s1 = sshll.u32 %s1736_s3, 4  ;;  %s1248_s21 = sshll.u32 %s1737_s19, 4  ;;  %s1262_s1 = int_to_ptr.vmem [resolvable:$true] %s1261_s1  ;;  %s2172_s21 = int_to_ptr.vmem [resolvable:$true] %s1248_s21 }
  0x57   :  { %v118_v36 = vunpack.c.l.bf16 %v116_v35  ;;  %v119_v37 = vunpack.c.h.bf16 %v116_v35  ;;  %s1738_s22 = smov [#allocation15]   ;;  %s1653_s25 = scalar_lea.vmem %s1262_s1, 128 }
  0x58   :  { %s1271_s23 = sshll.u32 %s1738_s22, 4  ;;  %p1654_p4 = scmp.ne.s32.totalorder %s1262_s1, %s1653_s25  ;;  %s2174_s23 = int_to_ptr.vmem [resolvable:$true] %s1271_s23 }
  0x59   :  { %290 = vmatpush1.bf16.msra.mxu0 %v1877_v12  ;;  %331 = vmatpush1.bf16.msra.mxu1 %v1897_v19  ;;  %p1658_p5 = scmp.lt.s32.totalorder %s1262_s1, %s1262_s1  ;;  %p1659_p6 = scmp.lt.s32.totalorder %s1653_s25, %s1653_s25 }
  0x5a   :  { %291 = vmatprep.subr.bf16.mxu0 %v1879_v13  ;;  %332 = vmatprep.subr.bf16.mxu1 %v1900_v20 }
  0x5b   :  { %p1660_p7 = por %p1659_p6, %p1658_p5 }
  0x5d   :  { %292 = vmatpush1.bf16.msra.mxu0 %v1891_v17  ;;  %333 = vmatpush1.bf16.msra.mxu1 %v1909_v23  ;;  %p1661_p8 = pnand %p1660_p7, %p1654_p4 }
  0x5e   :  { %293 = vmatprep.subr.bf16.mxu0 %v1894_v18  ;;  %334 = vmatprep.subr.bf16.mxu1 %v1912_v24 }
  0x61   :  { %294 = vmatpush1.bf16.msra.mxu0 %v1902_v21  ;;  %335 = vmatpush1.bf16.msra.mxu1 %v1921_v27 }
  0x62   :  { %295 = vmatprep.subr.bf16.mxu0 %v1905_v22  ;;  %336 = vmatprep.subr.bf16.mxu1 %v1924_v28 }
  0x65   :  { %296 = vmatpush1.bf16.msra.mxu0 %v1915_v25  ;;  %337 = vmatpush1.bf16.msra.mxu1 %v1931_v31 }
  0x66   :  { %297 = vmatprep.subr.bf16.mxu0 %v1918_v26  ;;  %338 = vmatprep.subr.bf16.mxu1 %v1934_v32 }
  0x69   :  { %298 = vmatpush1.bf16.msra.mxu0 %v1927_v29  ;;  %339 = vmatpush1.bf16.msra.mxu1 %v1938_v34 }
  0x6a   :  { %402 = vmatprep.subr.bf16.mxu0 %v1846_v1  ;;  %443 = vmatprep.subr.bf16.mxu1 %v1859_v6 }
  0x6c   :  { %316 = vmatmul.mubr.bf16.vlgmr.msra.gmra.mrb[0].mxu0 %v122_v33  ;;  %357 = vmatmul.mubr.bf16.vlgmr.msra.gmra.mrb[0].mxu1 %v122_v33 }
  0x6d   :  { %403 = vmatpush1.bf16.msra.mxu0 %v1848_v2  ;;  %434 = vmatprep.mubr.bf16.mxu0 %v1735_v0 }
  0x6e   :  { %404 = vmatprep.subr.bf16.mxu0 %v1851_v3  ;;  %444 = vmatpush1.bf16.msra.mxu1 %v1861_v7 }
  0x6f   :  { %445 = vmatprep.subr.bf16.mxu1 %v1871_v10  ;;  %475 = vmatprep.mubr.bf16.mxu1 %v1735_v0 }
  0x71   :  { %405 = vmatpush1.bf16.msra.mxu0 %v1854_v4 }
  0x72   :  { %406 = vmatprep.subr.bf16.mxu0 %v1857_v5  ;;  %446 = vmatpush1.bf16.msra.mxu1 %v1873_v11 }
  0x73   :  { %447 = vmatprep.subr.bf16.mxu1 %v1881_v14 }
  0x75   :  { %407 = vmatpush1.bf16.msra.mxu0 %v1864_v8 }
  0x76   :  { %408 = vmatprep.subr.bf16.mxu0 %v1868_v9  ;;  %448 = vmatpush1.bf16.msra.mxu1 %v1885_v15 }
  0x77   :  { %449 = vmatprep.subr.bf16.mxu1 %v1888_v16 }
  0x79   :  { %409 = vmatpush1.bf16.msra.mxu0 %v1877_v12 }
  0x7a   :  { %410 = vmatprep.subr.bf16.mxu0 %v1879_v13  ;;  %450 = vmatpush1.bf16.msra.mxu1 %v1897_v19 }
  0x7b   :  { %451 = vmatprep.subr.bf16.mxu1 %v1900_v20 }
  0x7d   :  { %411 = vmatpush1.bf16.msra.mxu0 %v1891_v17 }
  0x7e   :  { %412 = vmatprep.subr.bf16.mxu0 %v1894_v18  ;;  %452 = vmatpush1.bf16.msra.mxu1 %v1909_v23 }
  0x7f   :  { %453 = vmatprep.subr.bf16.mxu1 %v1912_v24 }
  0x81   :  { %413 = vmatpush1.bf16.msra.mxu0 %v1902_v21 }
  0x82   :  { %414 = vmatprep.subr.bf16.mxu0 %v1905_v22  ;;  %454 = vmatpush1.bf16.msra.mxu1 %v1921_v27 }
  0x83   :  { %455 = vmatprep.subr.bf16.mxu1 %v1924_v28 }
  0x85   :  { %415 = vmatpush1.bf16.msra.mxu0 %v1915_v25 }
  0x86   :  { %416 = vmatprep.subr.bf16.mxu0 %v1918_v26  ;;  %456 = vmatpush1.bf16.msra.mxu1 %v1931_v31 }
  0x87   :  { %457 = vmatprep.subr.bf16.mxu1 %v1934_v32 }
  0x89   :  { %417 = vmatpush1.bf16.msra.mxu0 %v1927_v29 }
  0x8a   :  { %522 = vmatprep.subr.bf16.mxu0 %v1846_v1  ;;  %458 = vmatpush1.bf16.msra.mxu1 %v1938_v34 }
  0x8b   :  { %563 = vmatprep.subr.bf16.mxu1 %v1859_v6 }
 0x13f   :  { %v317_v38 = vpop.f32.mrb[0].mxu0  ;;  %v358_v48 = vpop.f32.mrb[0].mxu1 }
 0x140   :  { %v365_v40 = vadd.f32 %v317_v38, %v118_v36  ;;  %v319_v41 = vpop.f32.mrb[1].mxu0  ;;  %v360_v49 = vpop.f32.mrb[1].mxu1  ;;  %v367_v55 = vadd.f32 %v358_v48, %v120_v52  ;;  %v396_v48 = vld [vmem:[#allocation4 + $0x18] sm:$0xff] }
 0x141   :  { %v366_v42 = vadd.f32 %v319_v41, %v119_v37  ;;  %v321_v43 = vpop.f32.mrb[2].mxu0  ;;  %v368_v50 = vadd.f32 %v360_v49, %v121_v46  ;;  %v362_v51 = vpop.f32.mrb[2].mxu1 }
 0x142   :  { %v1321_v44 = vmul.f32 -1.442695, %v365_v40  ;;  %v322_v45 = vpop.f32.mrb[3].mxu0  ;;  %v363_v53 = vpop.f32.mrb[3].mxu1 }
 0x143   :  { %v1322_v47 = vmul.f32 -1.442695, %v366_v42  ;;  %v1323_v54 = vmul.f32 -1.442695, %v368_v50  ;;  %v395_v42 = vld [vmem:[#allocation4 + $0x10] sm:$0xff] }
 0x144   :  { %1405 = vpow2.f32 %v1321_v44  ;;  %v397_v43 = vunpack.c.l.bf16 %v395_v42  ;;  %v398_v44 = vunpack.c.h.bf16 %v395_v42 }
 0x145   :  { %1407 = vpow2.f32 %v1322_v47 }
 0x146   :  { %1409 = vpow2.f32 %v1323_v54 }
 0x147   :  { %1411 = vtanh.f32 %v367_v55 }
 0x14e   :  { %v1406_v56 = vpop.eup %1405 }
 0x14f   :  { %v1408_v57 = vpop.eup %1407  ;;  %v372_v58 = vadd.f32 1.0, %v1406_v56 }
 0x150   :  { %v378_v59 = vadd.f32 1.0, %v1408_v57  ;;  %v1410_v60 = vpop.eup %1409 }
 0x151   :  { %1413 = vrcp.f32 %v372_v58  ;;  %v1412_v61 = vpop.eup %1411  ;;  %v385_v30 = vadd.f32 1.0, %v1410_v60  ;;  %v400_v58 = vunpack.c.h.bf16 %v396_v48  ;;  %v399_v60 = vunpack.c.l.bf16 %v396_v48 }
 0x152   :  { %1415 = vrcp.f32 %v378_v59 }
 0x153   :  { %1417 = vrcp.f32 %v385_v30 }
 0x15b   :  { %v1414_v63 = vpop.eup %1413 }
 0x15c   :  { %v1416_v33 = vpop.eup %1415  ;;  %v389_v35 = vmul.f32 %v1414_v63, %v1412_v61 }
 0x15d   :  { %v388_v36 = vmul.f32 %v1416_v33, %v80_v62  ;;  %v1418_v38 = vpop.eup %1417 }
 0x15f   :  { %v1978_v37 = vadd.f32 %v389_v35, %v388_v36 }
 0x161   :  { %1419 = vtanh.f32 %v1978_v37 }
 0x16b   :  { %v1420_v39 = vpop.eup %1419 }
 0x16c   :  { %v392_v40 = vmul.f32 %v1420_v39, %v1418_v38 }
 0x16e   :  { %393 = vst [vmem:[#allocation12] sm:$0xff] %v392_v40  ;;  %v401_v41 = vpack.c.bf16 %v392_v40, %v392_v40 }
 0x170   :  { %435 = vmatmul.mubr.bf16.vlgmr.msra.gmra.mrb[4].mxu0 %v401_v41  ;;  %476 = vmatmul.mubr.bf16.vlgmr.msra.gmra.mrb[4].mxu1 %v401_v41 }
 0x171   :  { %523 = vmatpush1.bf16.msra.mxu0 %v1848_v2  ;;  %564 = vmatpush1.bf16.msra.mxu1 %v1861_v7 }
 0x172   :  { %524 = vmatprep.subr.bf16.mxu0 %v1851_v3  ;;  %565 = vmatprep.subr.bf16.mxu1 %v1871_v10 }
 0x173   :  { %554 = vmatprep.mubr.bf16.mxu0 %v1735_v0  ;;  %595 = vmatprep.mubr.bf16.mxu1 %v1735_v0 }
 0x175   :  { %525 = vmatpush1.bf16.msra.mxu0 %v1854_v4  ;;  %566 = vmatpush1.bf16.msra.mxu1 %v1873_v11 }
 0x176   :  { %526 = vmatprep.subr.bf16.mxu0 %v1857_v5  ;;  %567 = vmatprep.subr.bf16.mxu1 %v1881_v14 }
 0x179   :  { %527 = vmatpush1.bf16.msra.mxu0 %v1864_v8  ;;  %568 = vmatpush1.bf16.msra.mxu1 %v1885_v15 }
 0x17a   :  { %528 = vmatprep.subr.bf16.mxu0 %v1868_v9  ;;  %569 = vmatprep.subr.bf16.mxu1 %v1888_v16 }
 0x17d   :  { %529 = vmatpush1.bf16.msra.mxu0 %v1877_v12  ;;  %570 = vmatpush1.bf16.msra.mxu1 %v1897_v19 }
 0x17e   :  { %530 = vmatprep.subr.bf16.mxu0 %v1879_v13  ;;  %571 = vmatprep.subr.bf16.mxu1 %v1900_v20 }
 0x181   :  { %531 = vmatpush1.bf16.msra.mxu0 %v1891_v17  ;;  %572 = vmatpush1.bf16.msra.mxu1 %v1909_v23 }
 0x182   :  { %532 = vmatprep.subr.bf16.mxu0 %v1894_v18  ;;  %573 = vmatprep.subr.bf16.mxu1 %v1912_v24 }
 0x185   :  { %533 = vmatpush1.bf16.msra.mxu0 %v1902_v21  ;;  %574 = vmatpush1.bf16.msra.mxu1 %v1921_v27 }
 0x186   :  { %534 = vmatprep.subr.bf16.mxu0 %v1905_v22  ;;  %575 = vmatprep.subr.bf16.mxu1 %v1924_v28 }
 0x189   :  { %535 = vmatpush1.bf16.msra.mxu0 %v1915_v25  ;;  %576 = vmatpush1.bf16.msra.mxu1 %v1931_v31 }
 0x18a   :  { %536 = vmatprep.subr.bf16.mxu0 %v1918_v26  ;;  %577 = vmatprep.subr.bf16.mxu1 %v1934_v32 }
 0x18d   :  { %537 = vmatpush1.bf16.msra.mxu0 %v1927_v29  ;;  %578 = vmatpush1.bf16.msra.mxu1 %v1938_v34 }
 0x18e   :  { %642 = vmatprep.subr.bf16.mxu0 %v1846_v1  ;;  %683 = vmatprep.subr.bf16.mxu1 %v1859_v6 }
 0x243   :  { %v436_v45 = vpop.f32.mrb[4].mxu0  ;;  %v477_v46 = vpop.f32.mrb[4].mxu1 }
 0x244   :  { %v484_v47 = vadd.f32 %v436_v45, %v397_v43  ;;  %v438_v49 = vpop.f32.mrb[5].mxu0  ;;  %v479_v50 = vpop.f32.mrb[5].mxu1  ;;  %v486_v62 = vadd.f32 %v477_v46, %v399_v60 }
 0x245   :  { %v485_v51 = vadd.f32 %v438_v49, %v398_v44  ;;  %v440_v52 = vpop.f32.mrb[6].mxu0  ;;  %v481_v53 = vpop.f32.mrb[6].mxu1  ;;  %v487_v59 = vadd.f32 %v479_v50, %v400_v58 }
 0x246   :  { %v1324_v54 = vmul.f32 -1.442695, %v484_v47  ;;  %v441_v55 = vpop.f32.mrb[7].mxu0  ;;  %v482_v56 = vpop.f32.mrb[7].mxu1 }
 0x247   :  { %v1325_v57 = vmul.f32 -1.442695, %v485_v51  ;;  %v1326_v61 = vmul.f32 -1.442695, %v487_v59 }
 0x248   :  { %1421 = vpow2.f32 %v1324_v54  ;;  %v516_v54 = vld [vmem:[#allocation4 + $0x28] sm:$0xff] }
 0x249   :  { %1423 = vpow2.f32 %v1325_v57 }
 0x24a   :  { %1425 = vpow2.f32 %v1326_v61 }
 0x24b   :  { %1427 = vtanh.f32 %v486_v62 }
 0x252   :  { %v1422_v63 = vpop.eup %1421 }
 0x253   :  { %v1424_v30 = vpop.eup %1423  ;;  %v491_v33 = vadd.f32 1.0, %v1422_v63 }
 0x254   :  { %v497_v35 = vadd.f32 1.0, %v1424_v30  ;;  %v1426_v36 = vpop.eup %1425  ;;  %v520_v30 = vunpack.c.h.bf16 %v516_v54 }
 0x255   :  { %1429 = vrcp.f32 %v491_v33  ;;  %v1428_v38 = vpop.eup %1427  ;;  %v504_v42 = vadd.f32 1.0, %v1426_v36 }
 0x256   :  { %1431 = vrcp.f32 %v497_v35  ;;  %v519_v35 = vunpack.c.l.bf16 %v516_v54 }
 0x257   :  { %1433 = vrcp.f32 %v504_v42 }
 0x25f   :  { %v1430_v39 = vpop.eup %1429 }
 0x260   :  { %v1432_v40 = vpop.eup %1431  ;;  %v508_v41 = vmul.f32 %v1430_v39, %v1428_v38 }
 0x261   :  { %v507_v43 = vmul.f32 %v1432_v40, %v1978_v37  ;;  %v1434_v45 = vpop.eup %1433  ;;  %v515_v37 = vld [vmem:[#allocation4 + $0x20] sm:$0xff] }
 0x262   :  { %v517_v49 = vunpack.c.l.bf16 %v515_v37  ;;  %v518_v50 = vunpack.c.h.bf16 %v515_v37 }
 0x263   :  { %v2016_v44 = vadd.f32 %v508_v41, %v507_v43 }
 0x265   :  { %1435 = vtanh.f32 %v2016_v44 }
 0x26f   :  { %v1436_v46 = vpop.eup %1435 }
 0x270   :  { %v511_v47 = vmul.f32 %v1436_v46, %v1434_v45 }
 0x272   :  { %513 = vst [vmem:[#allocation12 + $0x8] sm:$0xff] %v511_v47  ;;  %v521_v48 = vpack.c.bf16 %v511_v47, %v511_v47 }
 0x274   :  { %555 = vmatmul.mubr.bf16.vlgmr.msra.gmra.mrb[8].mxu0 %v521_v48  ;;  %596 = vmatmul.mubr.bf16.vlgmr.msra.gmra.mrb[8].mxu1 %v521_v48 }
 0x275   :  { %643 = vmatpush1.bf16.msra.mxu0 %v1848_v2  ;;  %684 = vmatpush1.bf16.msra.mxu1 %v1861_v7 }
 0x276   :  { %644 = vmatprep.subr.bf16.mxu0 %v1851_v3  ;;  %685 = vmatprep.subr.bf16.mxu1 %v1871_v10 }
 0x277   :  { %674 = vmatprep.mubr.bf16.mxu0 %v1735_v0  ;;  %715 = vmatprep.mubr.bf16.mxu1 %v1735_v0 }
 0x279   :  { %645 = vmatpush1.bf16.msra.mxu0 %v1854_v4  ;;  %686 = vmatpush1.bf16.msra.mxu1 %v1873_v11 }
 0x27a   :  { %646 = vmatprep.subr.bf16.mxu0 %v1857_v5  ;;  %687 = vmatprep.subr.bf16.mxu1 %v1881_v14 }
 0x27d   :  { %647 = vmatpush1.bf16.msra.mxu0 %v1864_v8  ;;  %688 = vmatpush1.bf16.msra.mxu1 %v1885_v15 }
 0x27e   :  { %648 = vmatprep.subr.bf16.mxu0 %v1868_v9  ;;  %689 = vmatprep.subr.bf16.mxu1 %v1888_v16 }
 0x281   :  { %649 = vmatpush1.bf16.msra.mxu0 %v1877_v12  ;;  %690 = vmatpush1.bf16.msra.mxu1 %v1897_v19 }
 0x282   :  { %650 = vmatprep.subr.bf16.mxu0 %v1879_v13  ;;  %691 = vmatprep.subr.bf16.mxu1 %v1900_v20 }
 0x285   :  { %651 = vmatpush1.bf16.msra.mxu0 %v1891_v17  ;;  %692 = vmatpush1.bf16.msra.mxu1 %v1909_v23 }
 0x286   :  { %652 = vmatprep.subr.bf16.mxu0 %v1894_v18  ;;  %693 = vmatprep.subr.bf16.mxu1 %v1912_v24 }
 0x289   :  { %653 = vmatpush1.bf16.msra.mxu0 %v1902_v21  ;;  %694 = vmatpush1.bf16.msra.mxu1 %v1921_v27 }
 0x28a   :  { %654 = vmatprep.subr.bf16.mxu0 %v1905_v22  ;;  %695 = vmatprep.subr.bf16.mxu1 %v1924_v28 }
 0x28d   :  { %655 = vmatpush1.bf16.msra.mxu0 %v1915_v25  ;;  %696 = vmatpush1.bf16.msra.mxu1 %v1931_v31 }
 0x28e   :  { %656 = vmatprep.subr.bf16.mxu0 %v1918_v26  ;;  %697 = vmatprep.subr.bf16.mxu1 %v1934_v32 }
 0x291   :  { %657 = vmatpush1.bf16.msra.mxu0 %v1927_v29  ;;  %698 = vmatpush1.bf16.msra.mxu1 %v1938_v34 }
 0x292   :  { %762 = vmatprep.subr.bf16.mxu0 %v1846_v1  ;;  %803 = vmatprep.subr.bf16.mxu1 %v1859_v6 }
 0x347   :  { %v556_v51 = vpop.f32.mrb[8].mxu0  ;;  %v597_v52 = vpop.f32.mrb[8].mxu1 }
 0x348   :  { %v604_v53 = vadd.f32 %v556_v51, %v517_v49  ;;  %v558_v55 = vpop.f32.mrb[9].mxu0  ;;  %v599_v56 = vpop.f32.mrb[9].mxu1  ;;  %v606_v38 = vadd.f32 %v597_v52, %v519_v35 }
 0x349   :  { %v605_v57 = vadd.f32 %v558_v55, %v518_v50  ;;  %v560_v58 = vpop.f32.mrb[10].mxu0  ;;  %v601_v59 = vpop.f32.mrb[10].mxu1  ;;  %v607_v33 = vadd.f32 %v599_v56, %v520_v30 }
 0x34a   :  { %v1327_v60 = vmul.f32 -1.442695, %v604_v53  ;;  %v561_v61 = vpop.f32.mrb[11].mxu0  ;;  %v602_v62 = vpop.f32.mrb[11].mxu1 }
 0x34b   :  { %v1328_v63 = vmul.f32 -1.442695, %v605_v57  ;;  %v1329_v36 = vmul.f32 -1.442695, %v607_v33 }
 0x34c   :  { %1437 = vpow2.f32 %v1327_v60  ;;  %v636_v60 = vld [vmem:[#allocation4 + $0x38] sm:$0xff] }
 0x34d   :  { %1439 = vpow2.f32 %v1328_v63 }
 0x34e   :  { %1441 = vpow2.f32 %v1329_v36 }
 0x34f   :  { %1443 = vtanh.f32 %v606_v38 }
 0x356   :  { %v1438_v39 = vpop.eup %1437 }
 0x357   :  { %v1440_v40 = vpop.eup %1439  ;;  %v611_v41 = vadd.f32 1.0, %v1438_v39 }
 0x358   :  { %v617_v42 = vadd.f32 1.0, %v1440_v40  ;;  %v1442_v43 = vpop.eup %1441  ;;  %v640_v40 = vunpack.c.h.bf16 %v636_v60 }
 0x359   :  { %1445 = vrcp.f32 %v611_v41  ;;  %v1444_v45 = vpop.eup %1443  ;;  %v624_v37 = vadd.f32 1.0, %v1442_v43 }
 0x35a   :  { %1447 = vrcp.f32 %v617_v42  ;;  %v639_v42 = vunpack.c.l.bf16 %v636_v60 }
 0x35b   :  { %1449 = vrcp.f32 %v624_v37 }
 0x363   :  { %v1446_v46 = vpop.eup %1445 }
 0x364   :  { %v1448_v47 = vpop.eup %1447  ;;  %v628_v48 = vmul.f32 %v1446_v46, %v1444_v45 }
 0x365   :  { %v627_v49 = vmul.f32 %v1448_v47, %v2016_v44  ;;  %v1450_v51 = vpop.eup %1449  ;;  %v635_v44 = vld [vmem:[#allocation4 + $0x30] sm:$0xff] }
 0x366   :  { %v637_v55 = vunpack.c.l.bf16 %v635_v44  ;;  %v638_v56 = vunpack.c.h.bf16 %v635_v44 }
 0x367   :  { %v2054_v50 = vadd.f32 %v628_v48, %v627_v49 }
 0x369   :  { %1451 = vtanh.f32 %v2054_v50 }
 0x373   :  { %v1452_v52 = vpop.eup %1451 }
 0x374   :  { %v631_v53 = vmul.f32 %v1452_v52, %v1450_v51 }
 0x376   :  { %633 = vst [vmem:[#allocation12 + $0x10] sm:$0xff] %v631_v53  ;;  %v641_v54 = vpack.c.bf16 %v631_v53, %v631_v53 }
 0x378   :  { %675 = vmatmul.mubr.bf16.vlgmr.msra.gmra.mrb[12].mxu0 %v641_v54  ;;  %716 = vmatmul.mubr.bf16.vlgmr.msra.gmra.mrb[12].mxu1 %v641_v54 }
 0x379   :  { %763 = vmatpush1.bf16.msra.mxu0 %v1848_v2  ;;  %804 = vmatpush1.bf16.msra.mxu1 %v1861_v7 }
 0x37a   :  { %764 = vmatprep.subr.bf16.mxu0 %v1851_v3  ;;  %805 = vmatprep.subr.bf16.mxu1 %v1871_v10 }
 0x37b   :  { %794 = vmatprep.mubr.bf16.mxu0 %v1735_v0  ;;  %835 = vmatprep.mubr.bf16.mxu1 %v1735_v0 }
 0x37d   :  { %765 = vmatpush1.bf16.msra.mxu0 %v1854_v4  ;;  %806 = vmatpush1.bf16.msra.mxu1 %v1873_v11 }
 0x37e   :  { %766 = vmatprep.subr.bf16.mxu0 %v1857_v5  ;;  %807 = vmatprep.subr.bf16.mxu1 %v1881_v14 }
 0x381   :  { %767 = vmatpush1.bf16.msra.mxu0 %v1864_v8  ;;  %808 = vmatpush1.bf16.msra.mxu1 %v1885_v15 }
 0x382   :  { %768 = vmatprep.subr.bf16.mxu0 %v1868_v9  ;;  %809 = vmatprep.subr.bf16.mxu1 %v1888_v16 }
 0x385   :  { %769 = vmatpush1.bf16.msra.mxu0 %v1877_v12  ;;  %810 = vmatpush1.bf16.msra.mxu1 %v1897_v19 }
 0x386   :  { %770 = vmatprep.subr.bf16.mxu0 %v1879_v13  ;;  %811 = vmatprep.subr.bf16.mxu1 %v1900_v20 }
 0x389   :  { %771 = vmatpush1.bf16.msra.mxu0 %v1891_v17  ;;  %812 = vmatpush1.bf16.msra.mxu1 %v1909_v23 }
 0x38a   :  { %772 = vmatprep.subr.bf16.mxu0 %v1894_v18  ;;  %813 = vmatprep.subr.bf16.mxu1 %v1912_v24 }
 0x38d   :  { %773 = vmatpush1.bf16.msra.mxu0 %v1902_v21  ;;  %814 = vmatpush1.bf16.msra.mxu1 %v1921_v27 }
 0x38e   :  { %774 = vmatprep.subr.bf16.mxu0 %v1905_v22  ;;  %815 = vmatprep.subr.bf16.mxu1 %v1924_v28 }
 0x391   :  { %775 = vmatpush1.bf16.msra.mxu0 %v1915_v25  ;;  %816 = vmatpush1.bf16.msra.mxu1 %v1931_v31 }
 0x392   :  { %776 = vmatprep.subr.bf16.mxu0 %v1918_v26  ;;  %817 = vmatprep.subr.bf16.mxu1 %v1934_v32 }
 0x395   :  { %777 = vmatpush1.bf16.msra.mxu0 %v1927_v29  ;;  %818 = vmatpush1.bf16.msra.mxu1 %v1938_v34 }
 0x396   :  { %882 = vmatprep.subr.bf16.mxu0 %v1846_v1  ;;  %923 = vmatprep.subr.bf16.mxu1 %v1859_v6 }
 0x44b   :  { %v676_v57 = vpop.f32.mrb[12].mxu0  ;;  %v717_v58 = vpop.f32.mrb[12].mxu1 }
 0x44c   :  { %v724_v59 = vadd.f32 %v676_v57, %v637_v55  ;;  %v678_v61 = vpop.f32.mrb[13].mxu0  ;;  %v719_v62 = vpop.f32.mrb[13].mxu1  ;;  %v726_v45 = vadd.f32 %v717_v58, %v639_v42 }
 0x44d   :  { %v725_v63 = vadd.f32 %v678_v61, %v638_v56  ;;  %v680_v30 = vpop.f32.mrb[14].mxu0  ;;  %v721_v33 = vpop.f32.mrb[14].mxu1  ;;  %v727_v41 = vadd.f32 %v719_v62, %v640_v40 }
 0x44e   :  { %v1330_v35 = vmul.f32 -1.442695, %v724_v59  ;;  %v681_v36 = vpop.f32.mrb[15].mxu0  ;;  %v722_v38 = vpop.f32.mrb[15].mxu1 }
 0x44f   :  { %v1331_v39 = vmul.f32 -1.442695, %v725_v63  ;;  %v1332_v43 = vmul.f32 -1.442695, %v727_v41 }
 0x450   :  { %1453 = vpow2.f32 %v1330_v35  ;;  %v756_v35 = vld [vmem:[#allocation4 + $0x48] sm:$0xff] }
 0x451   :  { %1455 = vpow2.f32 %v1331_v39 }
 0x452   :  { %1457 = vpow2.f32 %v1332_v43 }
 0x453   :  { %1459 = vtanh.f32 %v726_v45 }
 0x45a   :  { %v1454_v46 = vpop.eup %1453 }
 0x45b   :  { %v1456_v47 = vpop.eup %1455  ;;  %v731_v48 = vadd.f32 1.0, %v1454_v46 }
 0x45c   :  { %v737_v37 = vadd.f32 1.0, %v1456_v47  ;;  %v1458_v49 = vpop.eup %1457  ;;  %v760_v47 = vunpack.c.h.bf16 %v756_v35 }
 0x45d   :  { %1461 = vrcp.f32 %v731_v48  ;;  %v1460_v51 = vpop.eup %1459  ;;  %v744_v44 = vadd.f32 1.0, %v1458_v49 }
 0x45e   :  { %1463 = vrcp.f32 %v737_v37 }
 0x45f   :  { %1465 = vrcp.f32 %v744_v44 }
 0x467   :  { %v1462_v52 = vpop.eup %1461 }
 0x468   :  { %v1464_v53 = vpop.eup %1463  ;;  %v748_v54 = vmul.f32 %v1462_v52, %v1460_v51 }
 0x469   :  { %v747_v55 = vmul.f32 %v1464_v53, %v2054_v50  ;;  %v1466_v57 = vpop.eup %1465  ;;  %v755_v50 = vld [vmem:[#allocation4 + $0x40] sm:$0xff] }
 0x46a   :  { %v757_v61 = vunpack.c.l.bf16 %v755_v50  ;;  %v758_v62 = vunpack.c.h.bf16 %v755_v50 }
 0x46b   :  { %v2092_v56 = vadd.f32 %v748_v54, %v747_v55 }
 0x46d   :  { %1467 = vtanh.f32 %v2092_v56 }
 0x477   :  { %v1468_v58 = vpop.eup %1467 }
 0x478   :  { %v751_v59 = vmul.f32 %v1468_v58, %v1466_v57 }
 0x47a   :  { %753 = vst [vmem:[#allocation12 + $0x18] sm:$0xff] %v751_v59  ;;  %v761_v60 = vpack.c.bf16 %v751_v59, %v751_v59 }
 0x47c   :  { %795 = vmatmul.mubr.bf16.vlgmr.msra.gmra.mrb[16].mxu0 %v761_v60  ;;  %836 = vmatmul.mubr.bf16.vlgmr.msra.gmra.mrb[16].mxu1 %v761_v60 }
 0x47d   :  { %883 = vmatpush1.bf16.msra.mxu0 %v1848_v2  ;;  %924 = vmatpush1.bf16.msra.mxu1 %v1861_v7 }
 0x47e   :  { %884 = vmatprep.subr.bf16.mxu0 %v1851_v3  ;;  %925 = vmatprep.subr.bf16.mxu1 %v1871_v10 }
 0x47f   :  { %914 = vmatprep.mubr.bf16.mxu0 %v1735_v0  ;;  %955 = vmatprep.mubr.bf16.mxu1 %v1735_v0 }
 0x481   :  { %885 = vmatpush1.bf16.msra.mxu0 %v1854_v4  ;;  %926 = vmatpush1.bf16.msra.mxu1 %v1873_v11 }
 0x482   :  { %886 = vmatprep.subr.bf16.mxu0 %v1857_v5  ;;  %927 = vmatprep.subr.bf16.mxu1 %v1881_v14 }
 0x485   :  { %887 = vmatpush1.bf16.msra.mxu0 %v1864_v8  ;;  %928 = vmatpush1.bf16.msra.mxu1 %v1885_v15 }
 0x486   :  { %888 = vmatprep.subr.bf16.mxu0 %v1868_v9  ;;  %929 = vmatprep.subr.bf16.mxu1 %v1888_v16 }
 0x489   :  { %889 = vmatpush1.bf16.msra.mxu0 %v1877_v12  ;;  %930 = vmatpush1.bf16.msra.mxu1 %v1897_v19 }
 0x48a   :  { %890 = vmatprep.subr.bf16.mxu0 %v1879_v13  ;;  %931 = vmatprep.subr.bf16.mxu1 %v1900_v20 }
 0x48d   :  { %891 = vmatpush1.bf16.msra.mxu0 %v1891_v17  ;;  %932 = vmatpush1.bf16.msra.mxu1 %v1909_v23 }
 0x48e   :  { %892 = vmatprep.subr.bf16.mxu0 %v1894_v18  ;;  %933 = vmatprep.subr.bf16.mxu1 %v1912_v24 }
 0x491   :  { %893 = vmatpush1.bf16.msra.mxu0 %v1902_v21  ;;  %934 = vmatpush1.bf16.msra.mxu1 %v1921_v27 }
 0x492   :  { %894 = vmatprep.subr.bf16.mxu0 %v1905_v22  ;;  %935 = vmatprep.subr.bf16.mxu1 %v1924_v28 }
 0x495   :  { %895 = vmatpush1.bf16.msra.mxu0 %v1915_v25  ;;  %936 = vmatpush1.bf16.msra.mxu1 %v1931_v31 }
 0x496   :  { %896 = vmatprep.subr.bf16.mxu0 %v1918_v26  ;;  %937 = vmatprep.subr.bf16.mxu1 %v1934_v32 }
 0x499   :  { %897 = vmatpush1.bf16.msra.mxu0 %v1927_v29  ;;  %938 = vmatpush1.bf16.msra.mxu1 %v1938_v34 }
 0x49a   :  { %1002 = vmatprep.subr.bf16.mxu0 %v1846_v1  ;;  %1043 = vmatprep.subr.bf16.mxu1 %v1859_v6  ;;  %v759_v6 = vunpack.c.l.bf16 %v756_v35 }
 0x54f   :  { %v796_v63 = vpop.f32.mrb[16].mxu0  ;;  %v837_v30 = vpop.f32.mrb[16].mxu1 }
 0x550   :  { %v844_v33 = vadd.f32 %v796_v63, %v757_v61  ;;  %v798_v36 = vpop.f32.mrb[17].mxu0  ;;  %v839_v38 = vpop.f32.mrb[17].mxu1  ;;  %v846_v37 = vadd.f32 %v837_v30, %v759_v6  ;;  %v1540_v6 = vld [vmem:[#allocation10 + $0x28] ss:$16 sps:$4 sm:$0xff]  }
 0x551   :  { %v845_v39 = vadd.f32 %v798_v36, %v758_v62  ;;  %v800_v40 = vpop.f32.mrb[18].mxu0  ;;  %v841_v41 = vpop.f32.mrb[18].mxu1  ;;  %v847_v1 = vadd.f32 %v839_v38, %v760_v47  ;;  %v1538_v47 = vld [vmem:[#allocation10 + $0x2c] ss:$16 sps:$4 sm:$0xff]  }
 0x552   :  { %v1333_v42 = vmul.f32 -1.442695, %v844_v33  ;;  %v801_v43 = vpop.f32.mrb[19].mxu0  ;;  %v842_v45 = vpop.f32.mrb[19].mxu1 }
 0x553   :  { %v1334_v46 = vmul.f32 -1.442695, %v845_v39  ;;  %v1335_v48 = vmul.f32 -1.442695, %v847_v1  ;;  %v1535_v43 = vld [vmem:[#allocation10] ss:$16 sps:$4 sm:$0xff]  }
 0x554   :  { %1469 = vpow2.f32 %v1333_v42  ;;  %v1536_v45 = vld [vmem:[#allocation10 + $0x8] ss:$16 sps:$4 sm:$0xff]   ;;  %v1539_v1 = vld [vmem:[#allocation10 + $0x20] ss:$16 sps:$4 sm:$0xff]  }
 0x555   :  { %1471 = vpow2.f32 %v1334_v46  ;;  %v1537_v46 = vld [vmem:[#allocation10 + $0x24] ss:$16 sps:$4 sm:$0xff]  }
 0x556   :  { %1473 = vpow2.f32 %v1335_v48  ;;  %v1541_v48 = vld [vmem:[#allocation10 + $0x44] ss:$16 sps:$4 sm:$0xff]  }
 0x557   :  { %1475 = vtanh.f32 %v846_v37  ;;  %v1542_v37 = vld [vmem:[#allocation10 + $0x4c] ss:$16 sps:$4 sm:$0xff]  }
 0x55e   :  { %v1470_v49 = vpop.eup %1469 }
 0x55f   :  { %v1472_v51 = vpop.eup %1471  ;;  %v851_v52 = vadd.f32 1.0, %v1470_v49  ;;  %v1543_v49 = vld [vmem:[#allocation10 + $0x40] ss:$16 sps:$4 sm:$0xff]  }
 0x560   :  { %v857_v53 = vadd.f32 1.0, %v1472_v51  ;;  %v1474_v54 = vpop.eup %1473  ;;  %v1544_v51 = vld [vmem:[#allocation10 + $0x48] ss:$16 sps:$4 sm:$0xff]  }
 0x561   :  { %1477 = vrcp.f32 %v851_v52  ;;  %v1476_v44 = vpop.eup %1475  ;;  %v864_v59 = vadd.f32 1.0, %v1474_v54  ;;  %v1545_v52 = vld [vmem:[#allocation10 + $0x64] ss:$16 sps:$4 sm:$0xff]   ;;  %v1547_v54 = vld [vmem:[#allocation10 + $0x60] ss:$16 sps:$4 sm:$0xff]  }
 0x562   :  { %1479 = vrcp.f32 %v857_v53  ;;  %v1546_v53 = vld [vmem:[#allocation10 + $0x6c] ss:$16 sps:$4 sm:$0xff]  }
 0x563   :  { %1481 = vrcp.f32 %v864_v59  ;;  %v1553_v59 = vld [vmem:[#allocation10 + $0xa4] ss:$16 sps:$4 sm:$0xff]  }
 0x56b   :  { %v1478_v55 = vpop.eup %1477 }
 0x56c   :  { %v1480_v57 = vpop.eup %1479  ;;  %v868_v58 = vmul.f32 %v1478_v55, %v1476_v44  ;;  %v1548_v44 = vld [vmem:[#allocation10 + $0x68] ss:$16 sps:$4 sm:$0xff]   ;;  %v1550_v55 = vld [vmem:[#allocation10 + $0x8c] ss:$16 sps:$4 sm:$0xff]  }
 0x56d   :  { %v867_v60 = vmul.f32 %v1480_v57, %v2092_v56  ;;  %v1482_v61 = vpop.eup %1481  ;;  %v1551_v57 = vld [vmem:[#allocation10 + $0x80] ss:$16 sps:$4 sm:$0xff]  }
 0x56f   :  { %v2130_v50 = vadd.f32 %v868_v58, %v867_v60  ;;  %v1552_v58 = vld [vmem:[#allocation10 + $0x88] ss:$16 sps:$4 sm:$0xff]   ;;  %v1554_v60 = vld [vmem:[#allocation10 + $0xac] ss:$16 sps:$4 sm:$0xff]  }
 0x571   :  { %1483 = vtanh.f32 %v2130_v50 }
 0x57b   :  { %v1484_v62 = vpop.eup %1483 }
 0x57c   :  { %v871_v63 = vmul.f32 %v1484_v62, %v1482_v61  ;;  %v1556_v61 = vld [vmem:[#allocation10 + $0xa8] ss:$16 sps:$4 sm:$0xff]   ;;  %v1557_v62 = vld [vmem:[#allocation10 + $0xc4] ss:$16 sps:$4 sm:$0xff]  }
 0x57e   :  { %873 = vst [vmem:[#allocation12 + $0x20] sm:$0xff] %v871_v63  ;;  %v881_v30 = vpack.c.bf16 %v871_v63, %v871_v63  ;;  %v1558_v63 = vld [vmem:[#allocation10 + $0xcc] ss:$16 sps:$4 sm:$0xff]  }
 0x580   :  { %915 = vmatmul.mubr.bf16.vlgmr.msra.gmra.mrb[20].mxu0 %v881_v30  ;;  %956 = vmatmul.mubr.bf16.vlgmr.msra.gmra.mrb[20].mxu1 %v881_v30  ;;  %v1559_v30 = vld [vmem:[#allocation10 + $0xc0] ss:$16 sps:$4 sm:$0xff]  }
 0x581   :  { %1003 = vmatpush1.bf16.msra.mxu0 %v1848_v2  ;;  %1044 = vmatpush1.bf16.msra.mxu1 %v1861_v7  ;;  %v1533_v2 = vld [vmem:[#allocation10 + $0x4] ss:$16 sps:$4 sm:$0xff]  }
 0x582   :  { %1004 = vmatprep.subr.bf16.mxu0 %v1851_v3  ;;  %1045 = vmatprep.subr.bf16.mxu1 %v1871_v10  ;;  %v1534_v3 = vld [vmem:[#allocation10 + $0xc] ss:$16 sps:$4 sm:$0xff]  }
 0x583   :  { %1034 = vmatprep.mubr.bf16.mxu0 %v1735_v0  ;;  %1075 = vmatprep.mubr.bf16.mxu1 %v1735_v0 }
 0x585   :  { %1005 = vmatpush1.bf16.msra.mxu0 %v1854_v4  ;;  %1046 = vmatpush1.bf16.msra.mxu1 %v1873_v11  ;;  %v875_v4 = vld [vmem:[#allocation4 + $0x50] sm:$0xff]  ;;  %v876_v11 = vld [vmem:[#allocation4 + $0x58] sm:$0xff] }
 0x586   :  { %1006 = vmatprep.subr.bf16.mxu0 %v1857_v5  ;;  %1047 = vmatprep.subr.bf16.mxu1 %v1881_v14  ;;  %v877_v5 = vunpack.c.l.bf16 %v875_v4  ;;  %v878_v7 = vunpack.c.h.bf16 %v875_v4  ;;  %v1562_v4 = vld [vmem:[#allocation10 + $0xec] ss:$16 sps:$4 sm:$0xff]  }
 0x589   :  { %1007 = vmatpush1.bf16.msra.mxu0 %v1864_v8  ;;  %1048 = vmatpush1.bf16.msra.mxu1 %v1885_v15 }
 0x58a   :  { %1008 = vmatprep.subr.bf16.mxu0 %v1868_v9  ;;  %1049 = vmatprep.subr.bf16.mxu1 %v1888_v16 }
 0x58d   :  { %1009 = vmatpush1.bf16.msra.mxu0 %v1877_v12  ;;  %1050 = vmatpush1.bf16.msra.mxu1 %v1897_v19 }
 0x58e   :  { %1010 = vmatprep.subr.bf16.mxu0 %v1879_v13  ;;  %1051 = vmatprep.subr.bf16.mxu1 %v1900_v20 }
 0x591   :  { %1011 = vmatpush1.bf16.msra.mxu0 %v1891_v17  ;;  %1052 = vmatpush1.bf16.msra.mxu1 %v1909_v23  ;;  %v879_v23 = vunpack.c.l.bf16 %v876_v11 }
 0x592   :  { %1012 = vmatprep.subr.bf16.mxu0 %v1894_v18  ;;  %1053 = vmatprep.subr.bf16.mxu1 %v1912_v24 }
 0x595   :  { %1013 = vmatpush1.bf16.msra.mxu0 %v1902_v21  ;;  %1054 = vmatpush1.bf16.msra.mxu1 %v1921_v27  ;;  %v880_v21 = vunpack.c.h.bf16 %v876_v11 }
 0x596   :  { %1014 = vmatprep.subr.bf16.mxu0 %v1905_v22  ;;  %1055 = vmatprep.subr.bf16.mxu1 %v1924_v28 }
 0x599   :  { %1015 = vmatpush1.bf16.msra.mxu0 %v1915_v25  ;;  %1056 = vmatpush1.bf16.msra.mxu1 %v1931_v31 }
 0x59a   :  { %1016 = vmatprep.subr.bf16.mxu0 %v1918_v26  ;;  %1057 = vmatprep.subr.bf16.mxu1 %v1934_v32 }
 0x59d   :  { %1017 = vmatpush1.bf16.msra.mxu0 %v1927_v29  ;;  %1058 = vmatpush1.bf16.msra.mxu1 %v1938_v34 }
 0x59e   :  { %1122 = vmatprep.subr.bf16.mxu0 %v1533_v2  ;;  %1163 = vmatprep.subr.bf16.mxu1 %v1534_v3  ;;  %v1560_v2 = vld [vmem:[#allocation10 + $0xc8] ss:$16 sps:$4 sm:$0xff]   ;;  %v1561_v3 = vld [vmem:[#allocation10 + $0xe4] ss:$16 sps:$4 sm:$0xff]  }
 0x653   :  { %v916_v8 = vpop.f32.mrb[20].mxu0  ;;  %v957_v9 = vpop.f32.mrb[20].mxu1 }
 0x654   :  { %v964_v10 = vadd.f32 %v916_v8, %v877_v5  ;;  %v918_v12 = vpop.f32.mrb[21].mxu0  ;;  %v959_v13 = vpop.f32.mrb[21].mxu1  ;;  %v966_v25 = vadd.f32 %v957_v9, %v879_v23  ;;  %v1563_v5 = vld [vmem:[#allocation10 + $0xe0] ss:$16 sps:$4 sm:$0xff]  }
 0x655   :  { %v965_v14 = vadd.f32 %v918_v12, %v878_v7  ;;  %v920_v15 = vpop.f32.mrb[22].mxu0  ;;  %v961_v16 = vpop.f32.mrb[22].mxu1  ;;  %v967_v22 = vadd.f32 %v959_v13, %v880_v21  ;;  %v1564_v7 = vld [vmem:[#allocation10 + $0xe8] ss:$16 sps:$4 sm:$0xff]   ;;  %v995_v8 = vld [vmem:[#allocation4 + $0x60] sm:$0xff] }
 0x656   :  { %v1336_v17 = vmul.f32 -1.442695, %v964_v10  ;;  %v921_v18 = vpop.f32.mrb[23].mxu0  ;;  %v962_v19 = vpop.f32.mrb[23].mxu1  ;;  %v997_v9 = vunpack.c.l.bf16 %v995_v8  ;;  %v998_v10 = vunpack.c.h.bf16 %v995_v8 }
 0x657   :  { %v1337_v20 = vmul.f32 -1.442695, %v965_v14  ;;  %v1338_v24 = vmul.f32 -1.442695, %v967_v22  ;;  %v996_v14 = vld [vmem:[#allocation4 + $0x68] sm:$0xff] }
 0x658   :  { %1485 = vpow2.f32 %v1336_v17 }
 0x659   :  { %1487 = vpow2.f32 %v1337_v20 }
 0x65a   :  { %1489 = vpow2.f32 %v1338_v24  ;;  %v1000_v24 = vunpack.c.h.bf16 %v996_v14 }
 0x65b   :  { %1491 = vtanh.f32 %v966_v25 }
 0x662   :  { %v1486_v26 = vpop.eup %1485 }
 0x663   :  { %v1488_v27 = vpop.eup %1487  ;;  %v971_v28 = vadd.f32 1.0, %v1486_v26  ;;  %v999_v26 = vunpack.c.l.bf16 %v996_v14 }
 0x664   :  { %v977_v29 = vadd.f32 1.0, %v1488_v27  ;;  %v1490_v31 = vpop.eup %1489 }
 0x665   :  { %1493 = vrcp.f32 %v971_v28  ;;  %v1492_v32 = vpop.eup %1491  ;;  %v984_v35 = vadd.f32 1.0, %v1490_v31 }
 0x666   :  { %1495 = vrcp.f32 %v977_v29 }
 0x667   :  { %1497 = vrcp.f32 %v984_v35 }
 0x66f   :  { %v1494_v34 = vpop.eup %1493 }
 0x670   :  { %v1496_v56 = vpop.eup %1495  ;;  %v988_v33 = vmul.f32 %v1494_v34, %v1492_v32 }
 0x671   :  { %v987_v36 = vmul.f32 %v1496_v56, %v2130_v50  ;;  %v1498_v39 = vpop.eup %1497  ;;  %v1555_v50 = vld [vmem:[#allocation10 + $0xa0] ss:$16 sps:$4 sm:$0xff]  }
 0x673   :  { %v2166_v38 = vadd.f32 %v988_v33, %v987_v36 }
 0x675   :  { %1499 = vtanh.f32 %v2166_v38 }
 0x67f   :  { %v1500_v40 = vpop.eup %1499 }
 0x680   :  { %v991_v41 = vmul.f32 %v1500_v40, %v1498_v39 }
 0x682   :  { %993 = vst [vmem:[#allocation12 + $0x28] sm:$0xff] %v991_v41  ;;  %v1001_v42 = vpack.c.bf16 %v991_v41, %v991_v41 }
 0x684   :  { %1035 = vmatmul.mubr.bf16.vlgmr.msra.gmra.mrb[24].mxu0 %v1001_v42  ;;  %1076 = vmatmul.mubr.bf16.vlgmr.msra.gmra.mrb[24].mxu1 %v1001_v42 }
 0x685   :  { %1123 = vmatpush1.bf16.msra.mxu0 %v1535_v43  ;;  %1164 = vmatpush1.bf16.msra.mxu1 %v1536_v45 }
 0x686   :  { %1124 = vmatprep.subr.bf16.mxu0 %v1537_v46  ;;  %1165 = vmatprep.subr.bf16.mxu1 %v1538_v47 }
 0x687   :  { %1154 = vmatprep.mubr.bf16.mxu0 %v1735_v0  ;;  %1195 = vmatprep.mubr.bf16.mxu1 %v1735_v0  ;;  %v1549_v0 = vld [vmem:[#allocation10 + $0x84] ss:$16 sps:$4 sm:$0xff]  }
 0x689   :  { %1125 = vmatpush1.bf16.msra.mxu0 %v1539_v1  ;;  %1166 = vmatpush1.bf16.msra.mxu1 %v1540_v6  ;;  %v1115_v1 = vld [vmem:[#allocation4 + $0x70] sm:$0xff] }
 0x68a   :  { %1126 = vmatprep.subr.bf16.mxu0 %v1541_v48  ;;  %1167 = vmatprep.subr.bf16.mxu1 %v1542_v37  ;;  %v1117_v6 = vunpack.c.l.bf16 %v1115_v1  ;;  %v1118_v48 = vunpack.c.h.bf16 %v1115_v1 }
 0x68d   :  { %1127 = vmatpush1.bf16.msra.mxu0 %v1543_v49  ;;  %1168 = vmatpush1.bf16.msra.mxu1 %v1544_v51 }
 0x68e   :  { %1128 = vmatprep.subr.bf16.mxu0 %v1545_v52  ;;  %1169 = vmatprep.subr.bf16.mxu1 %v1546_v53  ;;  %v1116_v52 = vld [vmem:[#allocation4 + $0x78] sm:$0xff] }
 0x691   :  { %1129 = vmatpush1.bf16.msra.mxu0 %v1547_v54  ;;  %1170 = vmatpush1.bf16.msra.mxu1 %v1548_v44 }
 0x692   :  { %1130 = vmatprep.subr.bf16.mxu0 %v1549_v0  ;;  %1171 = vmatprep.subr.bf16.mxu1 %v1550_v55 }
 0x695   :  { %1131 = vmatpush1.bf16.msra.mxu0 %v1551_v57  ;;  %1172 = vmatpush1.bf16.msra.mxu1 %v1552_v58 }
 0x696   :  { %1132 = vmatprep.subr.bf16.mxu0 %v1553_v59  ;;  %1173 = vmatprep.subr.bf16.mxu1 %v1554_v60  ;;  %v1120_v60 = vunpack.c.h.bf16 %v1116_v52 }
 0x699   :  { %1133 = vmatpush1.bf16.msra.mxu0 %v1555_v50  ;;  %1174 = vmatpush1.bf16.msra.mxu1 %v1556_v61  ;;  %v1119_v61 = vunpack.c.l.bf16 %v1116_v52 }
 0x69a   :  { %1134 = vmatprep.subr.bf16.mxu0 %v1557_v62  ;;  %1175 = vmatprep.subr.bf16.mxu1 %v1558_v63 }
 0x69d   :  { %1135 = vmatpush1.bf16.msra.mxu0 %v1559_v30  ;;  %1176 = vmatpush1.bf16.msra.mxu1 %v1560_v2 }
 0x69e   :  { %1136 = vmatprep.subr.bf16.mxu0 %v1561_v3  ;;  %1177 = vmatprep.subr.bf16.mxu1 %v1562_v4 }
 0x6a1   :  { %1137 = vmatpush1.bf16.msra.mxu0 %v1563_v5  ;;  %1178 = vmatpush1.bf16.msra.mxu1 %v1564_v7 }
 0x757   :  { %v1036_v11 = vpop.f32.mrb[24].mxu0  ;;  %v1077_v12 = vpop.f32.mrb[24].mxu1 }
 0x758   :  { %v1084_v13 = vadd.f32 %v1036_v11, %v997_v9  ;;  %v1038_v15 = vpop.f32.mrb[25].mxu0  ;;  %v1079_v16 = vpop.f32.mrb[25].mxu1  ;;  %v1086_v28 = vadd.f32 %v1077_v12, %v999_v26 }
 0x759   :  { %v1085_v17 = vadd.f32 %v1038_v15, %v998_v10  ;;  %v1040_v18 = vpop.f32.mrb[26].mxu0  ;;  %v1081_v19 = vpop.f32.mrb[26].mxu1  ;;  %v1087_v25 = vadd.f32 %v1079_v16, %v1000_v24 }
 0x75a   :  { %v1339_v20 = vmul.f32 -1.442695, %v1084_v13  ;;  %v1041_v21 = vpop.f32.mrb[27].mxu0  ;;  %v1082_v22 = vpop.f32.mrb[27].mxu1 }
 0x75b   :  { %v1340_v23 = vmul.f32 -1.442695, %v1085_v17  ;;  %v1341_v27 = vmul.f32 -1.442695, %v1087_v25 }
 0x75c   :  { %1501 = vpow2.f32 %v1339_v20 }
 0x75d   :  { %1503 = vpow2.f32 %v1340_v23 }
 0x75e   :  { %1505 = vpow2.f32 %v1341_v27 }
 0x75f   :  { %1507 = vtanh.f32 %v1086_v28 }
 0x766   :  { %v1502_v29 = vpop.eup %1501 }
 0x767   :  { %v1504_v31 = vpop.eup %1503  ;;  %v1091_v32 = vadd.f32 1.0, %v1502_v29 }
 0x768   :  { %v1097_v34 = vadd.f32 1.0, %v1504_v31  ;;  %v1506_v56 = vpop.eup %1505 }
 0x769   :  { %1509 = vrcp.f32 %v1091_v32  ;;  %v1508_v33 = vpop.eup %1507  ;;  %v1104_v40 = vadd.f32 1.0, %v1506_v56 }
 0x76a   :  { %1511 = vrcp.f32 %v1097_v34 }
 0x76b   :  { %1513 = vrcp.f32 %v1104_v40 }
 0x773   :  { %v1510_v35 = vpop.eup %1509 }
 0x774   :  { %v1512_v36 = vpop.eup %1511  ;;  %v1108_v39 = vmul.f32 %v1510_v35, %v1508_v33 }
 0x775   :  { %v1107_v41 = vmul.f32 %v1512_v36, %v2166_v38  ;;  %v1514_v43 = vpop.eup %1513 }
 0x777   :  { %v1109_v42 = vadd.f32 %v1108_v39, %v1107_v41 }
 0x779   :  { %1515 = vtanh.f32 %v1109_v42 }
 0x783   :  { %v1516_v45 = vpop.eup %1515 }
 0x784   :  { %v1111_v46 = vmul.f32 %v1516_v45, %v1514_v43 }
 0x786   :  { %1113 = vst [vmem:[#allocation12 + $0x30] sm:$0xff] %v1111_v46  ;;  %v1121_v47 = vpack.c.bf16 %v1111_v46, %v1111_v46 }
 0x788   :  { %1155 = vmatmul.mubr.bf16.vlgmr.msra.gmra.mrb[28].mxu0 %v1121_v47  ;;  %1196 = vmatmul.mubr.bf16.vlgmr.msra.gmra.mrb[28].mxu1 %v1121_v47 }
 0x85b   :  { %v1156_v37 = vpop.f32.mrb[28].mxu0  ;;  %v1197_v49 = vpop.f32.mrb[28].mxu1 }
 0x85c   :  { %v1204_v51 = vadd.f32 %v1156_v37, %v1117_v6  ;;  %v1158_v53 = vpop.f32.mrb[29].mxu0  ;;  %v1199_v54 = vpop.f32.mrb[29].mxu1  ;;  %v1206_v63 = vadd.f32 %v1197_v49, %v1119_v61 }
 0x85d   :  { %v1205_v38 = vadd.f32 %v1158_v53, %v1118_v48  ;;  %v1160_v44 = vpop.f32.mrb[30].mxu0  ;;  %v1201_v0 = vpop.f32.mrb[30].mxu1  ;;  %v1207_v50 = vadd.f32 %v1199_v54, %v1120_v60 }
 0x85e   :  { %v1342_v55 = vmul.f32 -1.442695, %v1204_v51  ;;  %v1161_v57 = vpop.f32.mrb[31].mxu0  ;;  %v1202_v58 = vpop.f32.mrb[31].mxu1 }
 0x85f   :  { %v1343_v59 = vmul.f32 -1.442695, %v1205_v38  ;;  %v1344_v62 = vmul.f32 -1.442695, %v1207_v50 }
 0x860   :  { %1517 = vpow2.f32 %v1342_v55 }
 0x861   :  { %1519 = vpow2.f32 %v1343_v59 }
 0x862   :  { %1521 = vpow2.f32 %v1344_v62 }
 0x863   :  { %1523 = vtanh.f32 %v1206_v63 }
 0x86a   :  { %v1518_v30 = vpop.eup %1517 }
 0x86b   :  { %v1520_v2 = vpop.eup %1519  ;;  %v1211_v3 = vadd.f32 1.0, %v1518_v30 }
 0x86c   :  { %v1217_v4 = vadd.f32 1.0, %v1520_v2  ;;  %v1522_v5 = vpop.eup %1521 }
 0x86d   :  { %1525 = vrcp.f32 %v1211_v3  ;;  %v1524_v7 = vpop.eup %1523  ;;  %v1224_v11 = vadd.f32 1.0, %v1522_v5 }
 0x86e   :  { %1527 = vrcp.f32 %v1217_v4 }
 0x86f   :  { %1529 = vrcp.f32 %v1224_v11 }
 0x877   :  { %v1526_v8 = vpop.eup %1525 }
 0x878   :  { %v1528_v9 = vpop.eup %1527  ;;  %v1228_v10 = vmul.f32 %v1526_v8, %v1524_v7 }
 0x879   :  { %v1227_v12 = vmul.f32 %v1528_v9, %v1109_v42  ;;  %v1530_v14 = vpop.eup %1529 }
 0x87b   :  { %v1229_v13 = vadd.f32 %v1228_v10, %v1227_v12 }
 0x87d   :  { %1531 = vtanh.f32 %v1229_v13  ;;  %1242 = vst [vmem:[#allocation15] sm:$0xff] %v1229_v13 }
 0x887   :  { %v1532_v15 = vpop.eup %1531 }
 0x888   :  { %v1231_v16 = vmul.f32 %v1532_v15, %v1530_v14 }
 0x88a   :  { %1233 = vst [vmem:[#allocation12 + $0x38] sm:$0xff] %v1231_v16  ;;  %1240 = vst [vmem:[#allocation13] sm:$0xff] %v1231_v16 }
 0x88b   :  { %1664 = shalt.err (!%p1661_p8)
}
 0x88c   :  { %s1665_s28 = scalar_lea.hbm %s2227_s5, 128 }
 0x88d   :  { %p1666_p9 = scmp.ne.s32.totalorder %s2227_s5, %s1665_s28  ;;  %p1669_p10 = scmp.lt.u32.totalorder %s1665_s28, %s2227_s5 }
 0x88f   :  { %p1671_p11 = pnand %p1669_p10, %p1666_p9 }
 0x891   :  { %1674 = shalt.err (!%p1671_p11)
}
 0x892   :  { %1264 = dma.vmem_to_hbm [thread:$0]  %s1262_s1, 128, %s2227_s5, [#allocation14]  }
 0x893   :  { %s1675_s24 = scalar_lea.vmem %s2172_s21, 1024  ;;  %p1680_p13 = scmp.lt.s32.totalorder %s2172_s21, %s2172_s21 }
 0x894   :  { %p1676_p12 = scmp.ne.s32.totalorder %s2172_s21, %s1675_s24  ;;  %p1681_p0 = scmp.lt.s32.totalorder %s1675_s24, %s1675_s24 }
 0x896   :  { %p1682_p1 = por %p1681_p0, %p1680_p13 }
 0x898   :  { %p1683_p2 = pnand %p1682_p1, %p1676_p12 }
 0x89a   :  { %1686 = shalt.err (!%p1683_p2)
}
 0x89b   :  { %s1687_s12 = scalar_lea.hbm %s2226_s4, 1024 }
 0x89c   :  { %p1688_p3 = scmp.ne.s32.totalorder %s2226_s4, %s1687_s12  ;;  %p1691_p4 = scmp.lt.u32.totalorder %s1687_s12, %s2226_s4 }
 0x89e   :  { %p1693_p5 = pnand %p1691_p4, %p1688_p3 }
 0x8a0   :  { %1696 = shalt.err (!%p1693_p5)
}
 0x8a1   :  { %s1739_s5 = smov 128   ;;  %s1740_s17 = smov 8  }
 0x8a2   :  { %1254 = dma.vmem_to_hbm [thread:$0]  %s2172_s21, 1024, %s2226_s4, [#allocation6], %s1739_s5, %s1739_s5, %s1740_s17  }
 0x8a3   :  { %s1697_s20 = scalar_lea.vmem %s2174_s23, 128  ;;  %p1702_p7 = scmp.lt.s32.totalorder %s2174_s23, %s2174_s23 }
 0x8a4   :  { %p1698_p6 = scmp.ne.s32.totalorder %s2174_s23, %s1697_s20  ;;  %p1703_p8 = scmp.lt.s32.totalorder %s1697_s20, %s1697_s20 }
 0x8a6   :  { %p1704_p9 = por %p1703_p8, %p1702_p7 }
 0x8a8   :  { %p1705_p10 = pnand %p1704_p9, %p1698_p6 }
 0x8aa   :  { %1708 = shalt.err (!%p1705_p10)
}
 0x8ab   :  { %s1709_s19 = scalar_lea.hbm %s2228_s6, 128 }
 0x8ac   :  { %p1710_p11 = scmp.ne.s32.totalorder %s2228_s6, %s1709_s19  ;;  %p1713_p12 = scmp.lt.u32.totalorder %s1709_s19, %s2228_s6 }
 0x8ae   :  { %p1715_p13 = pnand %p1713_p12, %p1710_p11 }
 0x8b0   :  { %1718 = shalt.err (!%p1715_p13)
}
 0x8b1   :  { %1274 = dma.vmem_to_hbm [thread:$0]  %s2174_s23, 128, %s2228_s6, [#allocation14]  }
 0x8b2   :  { %1725 = dma.done.wait [#allocation6], 1024  }
 0x8b3   :  { %1726 = vsyncadd [#allocation6], 4294966272 }
 0x8b4   :  { %1727 = dma.done.wait [#allocation14], 256  }
 0x8b5   :  { %1728 = vsyncadd [#allocation14], 4294967040 }
 0x8b6   :  { %1284 = vsyncpa [#allocation5], 1 }
 0x8b7   :  { %1285 = vsyncpa [#allocation8], 1 }
 0x8b8   :  { %1286 = vsyncpa [#allocation11], 1 }
 0x8b9   :  { %1287 = vsyncpa [#allocation6], 1 }
 0x8ba   :  { %1288 = vsyncpa [#allocation14], 1 }

</bundles_post_ra>
